<compile_context>
chip_gen: v5e
topology: v5e:2x2
jax: 0.10.0
libtpu: 0.0.40
codegen_flags: <defaults>
</compile_context>

<pallas_src>
import math
import functools

import numpy as np
import jax
import jax.numpy as jnp
from jax.experimental import pallas as pl
from jax.experimental.pallas import tpu as pltpu

# ----------------------------- config (small) --------------------------------
VOCAB = 64
N_EMBED = 32
N_HEAD = 4
N_LAYER = 2
BLOCK_SIZE = 8          # == seq len T in the example
NUM_EXPERTS = 4
TOP_K = 2
CAPACITY_FACTOR = 1.0
LN_EPS = 1e-5           # torch.nn.LayerNorm default
HEAD_DIM = N_EMBED // N_HEAD


# ------------------------------ in-kernel helpers -----------------------------
def _layernorm(x, g, b):
    mu = jnp.mean(x, axis=-1, keepdims=True)
    var = jnp.mean(jnp.square(x - mu), axis=-1, keepdims=True)
    return (x - mu) * jax.lax.rsqrt(var + LN_EPS) * g + b


def _softplus(x):
    return jnp.maximum(x, 0.0) + jnp.log(1.0 + jnp.exp(-jnp.abs(x)))


def _full_spec(a):
    nd = a.ndim
    return pl.BlockSpec(a.shape, lambda *_args, _nd=nd: (0,) * _nd)


# -------------------- host-built constant permutation matrices ----------------
def _build_permutation_constants(B, T):
    """0/1 gather matrices reproducing torch's view/permute/reshape scrambles."""
    H, D = N_HEAD, HEAD_DIM
    N = B * T
    # Input scramble: torch does view(B,T,3,H,D).permute(0,2,1,3,4)
    # .reshape(B*T,3,H,D), i.e. flash stream `str` at position q reads packed
    # slot s*T + t == 3q + str of the per-batch [Q;K;V] stream-stacked matrix.
    scr = np.zeros((3 * N, 3 * N), np.float32)
    for stream in range(3):
        for b in range(B):
            for q in range(T):
                flat = 3 * q + stream
                s, t = flat // T, flat % T
                scr[stream * N + b * T + q, s * N + b * T + t] = 1.0
    # Output scramble: view(B,T,H,D).permute(0,2,1,3).reshape(B,T,C), i.e.
    # output row g, column block j reads head h, position t with
    # g*H + j == h*T + t, from O2 rows ordered ((h*B + b)*T + t).
    ugat = np.zeros((H * N, H * B * T), np.float32)
    for b in range(B):
        for g in range(T):
            for j in range(H):
                flat = g * H + j
                h, t = flat // T, flat % T
                ugat[j * N + b * T + g, (h * B + b) * T + t] = 1.0
    return jnp.asarray(scr), jnp.asarray(ugat)


# ------------------------------ fused forward kernel ---------------------------
def _forward_kernel(x_ref, noise_ref, scr_ref, ugat_ref,
                    ln1_g_ref, ln1_b_ref, ln2_g_ref, ln2_b_ref,
                    qkv_w_ref, out_w_ref, rt_w_ref, rt_b_ref,
                    e_w1_ref, e_b1_ref, e_w2_ref, e_b2_ref,
                    lnf_g_ref, lnf_b_ref,
                    ebm_w1_ref, ebm_b1_ref, ebm_w2_ref, ebm_b2_ref,
                    head_w_ref, head_b_ref,
                    o_ref, *, B, T, capacity):
    C, H, D, E, K, L = N_EMBED, N_HEAD, HEAD_DIM, NUM_EXPERTS, TOP_K, N_LAYER
    N = B * T
    scale = 1.0 / math.sqrt(D)
    bf16, f32 = jnp.bfloat16, jnp.float32

    # -------- constants, loaded / built once per forward (hoisted from loop) ---
    scr = scr_ref[...]                                  # (3N, 3N)
    ugat = ugat_ref[...]                                # (H*N, H*B*T)
    col_idx = jax.lax.broadcasted_iota(jnp.int32, (N, E), 1)

    x = x_ref[...]                                      # (N, C) f32, VMEM-resident

    def split_heads(mat):                               # (N, C) -> (H*B, T, D)
        parts = [mat[:, h * D:(h + 1) * D].reshape(B, T, D) for h in range(H)]
        return jnp.concatenate(parts, axis=0)

    for li in range(L):
        # ---------------- LN1 + QKV projection (bias-free) ----------------
        h1 = _layernorm(x, ln1_g_ref[li], ln1_b_ref[li])
        qkv = jnp.dot(h1.astype(bf16), qkv_w_ref[li],
                      preferred_element_type=f32)                       # (N, 3C)
        # stream-stack -> (3N, C), then one constant gather matmul reproduces
        # the torch view/permute/reshape scramble for Q', K', V'.
        qkv_stacked = jnp.concatenate(
            [qkv[:, 0:C], qkv[:, C:2 * C], qkv[:, 2 * C:3 * C]], axis=0)
        qkv_scr = jnp.dot(scr, qkv_stacked, preferred_element_type=f32)  # (3N, C)
        qh = split_heads(qkv_scr[0:N])                                   # (HB, T, D)
        kh = split_heads(qkv_scr[N:2 * N])
        vh = split_heads(qkv_scr[2 * N:3 * N])

        # ---------------- attention, batched over all B*H heads ----------------
        s = jnp.einsum('bqd,bkd->bqk', qh.astype(bf16), kh.astype(bf16),
                       preferred_element_type=f32) * scale               # (HB, T, T)
        s = s - jnp.max(s, axis=-1, keepdims=True)
        p = jnp.exp(s)
        p = p / jnp.sum(p, axis=-1, keepdims=True)       # exact divide (no approx)
        o = jnp.einsum('bqk,bkd->bqd', p.astype(bf16), vh.astype(bf16),
                       preferred_element_type=f32)                        # (HB, T, D)
        o2 = o.reshape(H * B * T, D)
        # constant gather matmul for the output scramble, then fold the
        # out_proj column-block placement into per-block matmul-adds
        # (no masked lane concats).
        y = jnp.dot(ugat, o2, preferred_element_type=f32)                 # (H*N, D)
        attn_proj = jnp.zeros((N, C), f32)
        for j in range(H):
            attn_proj = attn_proj + jnp.dot(
                y[j * N:(j + 1) * N, :].astype(bf16),
                out_w_ref[li * H + j],                                    # (D, C)
                preferred_element_type=f32)
        x = x + attn_proj

        # ---------------- LN2 + noisy top-k router (fused route/noise matmul) --
        h2 = _layernorm(x, ln2_g_ref[li], ln2_b_ref[li])
        rt = jnp.dot(h2, rt_w_ref[li], preferred_element_type=f32) + rt_b_ref[li]
        logits = rt[:, 0:E]
        noise_logits = rt[:, E:2 * E]
        noisy = logits + noise_ref[li] * _softplus(noise_logits)          # (N, E)

        # top-k membership (rank < K; ties -> lower expert index, = torch.topk)
        mask_cols = []
        for e in range(E):
            ce = noisy[:, e:e + 1]
            beats = jnp.logical_or(noisy > ce,
                                   jnp.logical_and(noisy == ce, col_idx < e))
            cnt = jnp.sum(beats.astype(f32), axis=-1, keepdims=True)
            mask_cols.append((cnt < float(K)).astype(f32))
        topk_mask = jnp.concatenate(mask_cols, axis=1)                    # (N, E)

        # softmax over the sparse (top-k only) logits
        masked = jnp.where(topk_mask > 0.0, noisy, jnp.float32(-1e30))
        masked = masked - jnp.max(masked, axis=-1, keepdims=True)
        pe = jnp.exp(masked)
        router = pe / jnp.sum(pe, axis=-1, keepdims=True)                 # (N, E)

        # capacity limit: per expert, keep only the first `capacity` selected
        # tokens in flat index order.  Inclusive prefix count via a log-depth
        # shift-add scan (no O(N^2) triangular matrix).
        cum = topk_mask
        shift = 1
        while shift < N:
            cum = cum + jnp.concatenate(
                [jnp.zeros((shift, E), f32), cum[:N - shift, :]], axis=0)
            shift *= 2
        keep = (cum <= float(capacity)).astype(f32) * topk_mask
        gate = router * keep                                              # (N, E)

        # ---------------- experts: dense compute, gated (eval: dropout = id) ---
        h2b = h2.astype(bf16)
        moe = jnp.zeros((N, C), f32)
        for e in range(E):
            hh = jnp.dot(h2b, e_w1_ref[li * E + e],
                         preferred_element_type=f32) + e_b1_ref[li * E + e]
            hh = jnp.maximum(hh, 0.0)
            ye = jnp.dot(hh.astype(bf16), e_w2_ref[li * E + e],
                         preferred_element_type=f32) + e_b2_ref[li * E + e]
            moe = moe + ye * gate[:, e:e + 1]
        x = x + moe

    # ---------------- ln_f -> mean pool -> regression head + EBM ----------------
    xn = _layernorm(x, lnf_g_ref[...], lnf_b_ref[...])
    emb = jnp.concatenate(
        [jnp.mean(xn[b * T:(b + 1) * T, :], axis=0, keepdims=True) for b in range(B)],
        axis=0)                                                           # (B, C)
    out = jnp.dot(emb, head_w_ref[...], preferred_element_type=f32) + head_b_ref[...]
    hh = jnp.maximum(
        jnp.dot(emb, ebm_w1_ref[...], preferred_element_type=f32) + ebm_b1_ref[...],
        0.0)
    energy = jnp.dot(hh, ebm_w2_ref[...], preferred_element_type=f32) + ebm_b2_ref[...]
    o_ref[...] = jnp.concatenate([out, energy], axis=1).astype(o_ref.dtype)  # (B, 2)


# ------------------------------ model forward ---------------------------------
def forward(params, input_ids, noise_key):
    """SparseMoELanguageModel.forward, eval mode, targets=None."""
    B, T = input_ids.shape
    C, E, L, H = N_EMBED, NUM_EXPERTS, N_LAYER, N_HEAD
    N = B * T
    capacity = int(B * T * TOP_K / NUM_EXPERTS * CAPACITY_FACTOR)

    # preprocess_input: no pad tokens & T == block_size -> plain embedding lookup
    comp_emb = params['tok_emb'][input_ids]                    # (B, T, C)
    pos_emb = params['pos_emb'][:T]                            # (T, C)
    x0 = (comp_emb + pos_emb[None, :, :]).reshape(N, C).astype(jnp.float32)

    # router noise for every layer: one tiny input for the whole fused forward
    noise = jax.random.normal(noise_key, (L, N, E), jnp.float32)

    scr, ugat = _build_permutation_constants(B, T)

    blocks = params['blocks']
    stack = lambda name: jnp.stack([blk[name] for blk in blocks])
    bf16 = jnp.bfloat16

    ln1_g = stack('ln1_g').reshape(L, 1, C)
    ln1_b = stack('ln1_b').reshape(L, 1, C)
    ln2_g = stack('ln2_g').reshape(L, 1, C)
    ln2_b = stack('ln2_b').reshape(L, 1, C)
    qkv_w = stack('qkv_w').astype(bf16)                                    # (L, C, 3C)
    out_w = stack('out_w').reshape(L * H, HEAD_DIM, C).astype(bf16)        # (L*H, D, C)
    rt_w = jnp.stack([jnp.concatenate([blk['route_w'], blk['noise_w']], axis=1)
                      for blk in blocks])                                  # (L, C, 2E)
    rt_b = jnp.stack([jnp.concatenate([blk['route_b'], blk['noise_b']])
                      for blk in blocks]).reshape(L, 1, 2 * E)
    e_w1 = stack('exp_w1').reshape(L * E, C, 4 * C).astype(bf16)
    e_b1 = stack('exp_b1').reshape(L * E, 1, 4 * C)
    e_w2 = stack('exp_w2').reshape(L * E, 4 * C, C).astype(bf16)
    e_b2 = stack('exp_b2').reshape(L * E, 1, C)

    args = (x0, noise, scr, ugat,
            ln1_g, ln1_b, ln2_g, ln2_b,
            qkv_w, out_w, rt_w, rt_b,
            e_w1, e_b1, e_w2, e_b2,
            params['lnf_g'].reshape(1, C), params['lnf_b'].reshape(1, C),
            params['ebm_w1'], params['ebm_b1'].reshape(1, C),
            params['ebm_w2'], params['ebm_b2'].reshape(1, 1),
            params['head_w'], params['head_b'].reshape(1, 1))

    kernel = functools.partial(_forward_kernel, B=B, T=T, capacity=capacity)
    res = pl.pallas_call(
        kernel,
        out_shape=jax.ShapeDtypeStruct((B, 2), jnp.float32),
        grid=(1,),
        in_specs=[_full_spec(a) for a in args],
        out_specs=pl.BlockSpec((B, 2), lambda *_: (0, 0)),
        compiler_params=pltpu.CompilerParams(dimension_semantics=("arbitrary",)),
    )(*args)

    output = res[:, 0]
    ebm_energy = res[:, 1]
    zero = jnp.zeros((), jnp.float32)
    return {'output': output, 'ebm_energy': ebm_energy, 'task_loss': zero,
            'tiny_loss': zero, 'ebm_loss': zero, 'entropy_loss': zero}


# ------------------------------ deterministic init ----------------------------
def init_params(key):
    counter = [0]

    def nxt():
        counter[0] += 1
        return jax.random.fold_in(key, counter[0])

    def nrm(shape, scale=0.02):
        return scale * jax.random.normal(nxt(), shape, jnp.float32)

    params = {
        'tok_emb': nrm((VOCAB, N_EMBED), 1.0),
        'pos_emb': nrm((BLOCK_SIZE, N_EMBED), 1.0),
        'lnf_g': jnp.ones((N_EMBED,), jnp.float32),
        'lnf_b': jnp.zeros((N_EMBED,), jnp.float32),
        'head_w': nrm((N_EMBED, 1)),
        'head_b': jnp.zeros((1,), jnp.float32),
        'ebm_w1': nrm((N_EMBED, N_EMBED)),
        'ebm_b1': jnp.zeros((N_EMBED,), jnp.float32),
        'ebm_w2': nrm((N_EMBED, 1)),
        'ebm_b2': jnp.zeros((1,), jnp.float32),
        'blocks': [],
    }
    for _ in range(N_LAYER):
        blk = {
            'ln1_g': jnp.ones((N_EMBED,), jnp.float32),
            'ln1_b': jnp.zeros((N_EMBED,), jnp.float32),
            'ln2_g': jnp.ones((N_EMBED,), jnp.float32),
            'ln2_b': jnp.zeros((N_EMBED,), jnp.float32),
            'qkv_w': nrm((N_EMBED, 3 * N_EMBED)),
            'out_w': nrm((N_EMBED, N_EMBED)),
            'route_w': nrm((N_EMBED, NUM_EXPERTS)),
            'route_b': jnp.zeros((NUM_EXPERTS,), jnp.float32),
            'noise_w': nrm((N_EMBED, NUM_EXPERTS)),
            'noise_b': jnp.zeros((NUM_EXPERTS,), jnp.float32),
            'exp_w1': nrm((NUM_EXPERTS, N_EMBED, 4 * N_EMBED)),
            'exp_b1': jnp.zeros((NUM_EXPERTS, 4 * N_EMBED), jnp.float32),
            'exp_w2': nrm((NUM_EXPERTS, 4 * N_EMBED, N_EMBED)),
            'exp_b2': jnp.zeros((NUM_EXPERTS, N_EMBED), jnp.float32),
        }
        params['blocks'].append(blk)
    return params


# ------------------------------------ main -------------------------------------
if __name__ == "__main__":
    root = jax.random.PRNGKey(0)
    pkey, ikey, nkey = jax.random.split(root, 3)
    params = init_params(pkey)
    B, T = 2, BLOCK_SIZE
    # token ids in [1, VOCAB) so there are no pad tokens (pad_id assumed 0)
    input_ids = jax.random.randint(ikey, (B, T), 1, VOCAB, dtype=jnp.int32)

    fwd = jax.jit(forward)
    out = fwd(params, input_ids, nkey)
    out = jax.tree_util.tree_map(jax.block_until_ready, out)

    assert out['output'].shape == (B,)
    assert out['ebm_energy'].shape == (B,)
    assert jnp.all(jnp.isfinite(out['output']))
    assert jnp.all(jnp.isfinite(out['ebm_energy']))
    print("KERNEL_OK")
</pallas_src>

<mosaic_0001>
module attributes {stable_mosaic.version = 11 : i64} {
  func.func @_forward_kernel(%arg0: i32, %arg1: memref<16x32xf32, #tpu.memory_space<vmem>>, %arg2: memref<2x16x4xf32, #tpu.memory_space<vmem>>, %arg3: memref<48x48xf32, #tpu.memory_space<vmem>>, %arg4: memref<64x64xf32, #tpu.memory_space<vmem>>, %arg5: memref<2x1x32xf32, #tpu.memory_space<vmem>>, %arg6: memref<2x1x32xf32, #tpu.memory_space<vmem>>, %arg7: memref<2x1x32xf32, #tpu.memory_space<vmem>>, %arg8: memref<2x1x32xf32, #tpu.memory_space<vmem>>, %arg9: memref<2x32x96xbf16, #tpu.memory_space<vmem>>, %arg10: memref<8x8x32xbf16, #tpu.memory_space<vmem>>, %arg11: memref<2x32x8xf32, #tpu.memory_space<vmem>>, %arg12: memref<2x1x8xf32, #tpu.memory_space<vmem>>, %arg13: memref<8x32x128xbf16, #tpu.memory_space<vmem>>, %arg14: memref<8x1x128xf32, #tpu.memory_space<vmem>>, %arg15: memref<8x128x32xbf16, #tpu.memory_space<vmem>>, %arg16: memref<8x1x32xf32, #tpu.memory_space<vmem>>, %arg17: memref<1x32xf32, #tpu.memory_space<vmem>>, %arg18: memref<1x32xf32, #tpu.memory_space<vmem>>, %arg19: memref<32x32xf32, #tpu.memory_space<vmem>>, %arg20: memref<1x32xf32, #tpu.memory_space<vmem>>, %arg21: memref<32x1xf32, #tpu.memory_space<vmem>>, %arg22: memref<1x1xf32, #tpu.memory_space<vmem>>, %arg23: memref<32x1xf32, #tpu.memory_space<vmem>>, %arg24: memref<1x1xf32, #tpu.memory_space<vmem>>, %arg25: memref<2x2xf32, #tpu.memory_space<vmem>>) attributes {dimension_semantics = [#tpu.dimension_semantics<arbitrary>], iteration_bounds = array<i64: 1>, scalar_prefetch = 0 : i64, scratch_operands = 0 : i64, tpu.core_type = #tpu.core_type<tc>, window_params = [{pipeline_mode = #tpu.pipeline_mode<synchronous>, transform_indices = @transform_0, window_bounds = array<i64: 16, 32>}, {pipeline_mode = #tpu.pipeline_mode<synchronous>, transform_indices = @transform_1, window_bounds = array<i64: 2, 16, 4>}, {pipeline_mode = #tpu.pipeline_mode<synchronous>, transform_indices = @transform_2, window_bounds = array<i64: 48, 48>}, {pipeline_mode = #tpu.pipeline_mode<synchronous>, transform_indices = @transform_3, window_bounds = array<i64: 64, 64>}, {pipeline_mode = #tpu.pipeline_mode<synchronous>, transform_indices = @transform_4, window_bounds = array<i64: 2, 1, 32>}, {pipeline_mode = #tpu.pipeline_mode<synchronous>, transform_indices = @transform_5, window_bounds = array<i64: 2, 1, 32>}, {pipeline_mode = #tpu.pipeline_mode<synchronous>, transform_indices = @transform_6, window_bounds = array<i64: 2, 1, 32>}, {pipeline_mode = #tpu.pipeline_mode<synchronous>, transform_indices = @transform_7, window_bounds = array<i64: 2, 1, 32>}, {pipeline_mode = #tpu.pipeline_mode<synchronous>, transform_indices = @transform_8, window_bounds = array<i64: 2, 32, 96>}, {pipeline_mode = #tpu.pipeline_mode<synchronous>, transform_indices = @transform_9, window_bounds = array<i64: 8, 8, 32>}, {pipeline_mode = #tpu.pipeline_mode<synchronous>, transform_indices = @transform_10, window_bounds = array<i64: 2, 32, 8>}, {pipeline_mode = #tpu.pipeline_mode<synchronous>, transform_indices = @transform_11, window_bounds = array<i64: 2, 1, 8>}, {pipeline_mode = #tpu.pipeline_mode<synchronous>, transform_indices = @transform_12, window_bounds = array<i64: 8, 32, 128>}, {pipeline_mode = #tpu.pipeline_mode<synchronous>, transform_indices = @transform_13, window_bounds = array<i64: 8, 1, 128>}, {pipeline_mode = #tpu.pipeline_mode<synchronous>, transform_indices = @transform_14, window_bounds = array<i64: 8, 128, 32>}, {pipeline_mode = #tpu.pipeline_mode<synchronous>, transform_indices = @transform_15, window_bounds = array<i64: 8, 1, 32>}, {pipeline_mode = #tpu.pipeline_mode<synchronous>, transform_indices = @transform_16, window_bounds = array<i64: 1, 32>}, {pipeline_mode = #tpu.pipeline_mode<synchronous>, transform_indices = @transform_17, window_bounds = array<i64: 1, 32>}, {pipeline_mode = #tpu.pipeline_mode<synchronous>, transform_indices = @transform_18, window_bounds = array<i64: 32, 32>}, {pipeline_mode = #tpu.pipeline_mode<synchronous>, transform_indices = @transform_19, window_bounds = array<i64: 1, 32>}, {pipeline_mode = #tpu.pipeline_mode<synchronous>, transform_indices = @transform_20, window_bounds = array<i64: 32, 1>}, {pipeline_mode = #tpu.pipeline_mode<synchronous>, transform_indices = @transform_21, window_bounds = array<i64: 1, 1>}, {pipeline_mode = #tpu.pipeline_mode<synchronous>, transform_indices = @transform_22, window_bounds = array<i64: 32, 1>}, {pipeline_mode = #tpu.pipeline_mode<synchronous>, transform_indices = @transform_23, window_bounds = array<i64: 1, 1>}, {pipeline_mode = #tpu.pipeline_mode<synchronous>, transform_indices = @transform_24, window_bounds = array<i64: 2, 2>}]} {
    %c0 = arith.constant 0 : index
    %c0_0 = arith.constant 0 : index
    %0 = vector.load %arg3[%c0, %c0_0] : memref<48x48xf32, #tpu.memory_space<vmem>>, vector<48x48xf32>
    %c0_1 = arith.constant 0 : index
    %c0_2 = arith.constant 0 : index
    %1 = vector.load %arg4[%c0_1, %c0_2] : memref<64x64xf32, #tpu.memory_space<vmem>>, vector<64x64xf32>
    %2 = tpu.iota {dimensions = array<i32: 1>} : vector<16x4xi32>
    %c0_3 = arith.constant 0 : index
    %c0_4 = arith.constant 0 : index
    %3 = vector.load %arg1[%c0_3, %c0_4] : memref<16x32xf32, #tpu.memory_space<vmem>>, vector<16x32xf32>
    %c0_5 = arith.constant 0 : index
    %c0_6 = arith.constant 0 : index
    %c0_7 = arith.constant 0 : index
    %4 = vector.load %arg5[%c0_5, %c0_6, %c0_7] : memref<2x1x32xf32, #tpu.memory_space<vmem>>, vector<1x1x32xf32>
    %5 = vector.shape_cast %4 : vector<1x1x32xf32> to vector<1x32xf32>
    %c0_8 = arith.constant 0 : index
    %c0_9 = arith.constant 0 : index
    %c0_10 = arith.constant 0 : index
    %6 = vector.load %arg6[%c0_8, %c0_9, %c0_10] : memref<2x1x32xf32, #tpu.memory_space<vmem>>, vector<1x1x32xf32>
    %7 = vector.shape_cast %6 : vector<1x1x32xf32> to vector<1x32xf32>
    %cst = arith.constant dense<0.000000e+00> : vector<16xf32>
    %8 = vector.multi_reduction <add>, %3, %cst [1] : vector<16x32xf32> to vector<16xf32>
    %9 = vector.shape_cast %8 : vector<16xf32> to vector<16x1xf32>
    %cst_11 = arith.constant 3.200000e+01 : f32
    %10 = vector.broadcast %cst_11 : f32 to vector<16x1xf32>
    %11 = arith.divf %9, %10 : vector<16x1xf32>
    %12 = vector.broadcast %11 : vector<16x1xf32> to vector<16x32xf32>
    %13 = arith.subf %3, %12 : vector<16x32xf32>
    %14 = arith.mulf %13, %13 : vector<16x32xf32>
    %cst_12 = arith.constant dense<0.000000e+00> : vector<16xf32>
    %15 = vector.multi_reduction <add>, %14, %cst_12 [1] : vector<16x32xf32> to vector<16xf32>
    %16 = vector.shape_cast %15 : vector<16xf32> to vector<16x1xf32>
    %cst_13 = arith.constant 3.200000e+01 : f32
    %17 = vector.broadcast %cst_13 : f32 to vector<16x1xf32>
    %18 = arith.divf %16, %17 : vector<16x1xf32>
    %19 = vector.broadcast %11 : vector<16x1xf32> to vector<16x32xf32>
    %20 = arith.subf %3, %19 : vector<16x32xf32>
    %cst_14 = arith.constant 9.99999974E-6 : f32
    %21 = vector.broadcast %cst_14 : f32 to vector<16x1xf32>
    %22 = arith.addf %18, %21 : vector<16x1xf32>
    %23 = math.rsqrt %22 : vector<16x1xf32>
    %24 = vector.broadcast %23 : vector<16x1xf32> to vector<16x32xf32>
    %25 = arith.mulf %20, %24 : vector<16x32xf32>
    %26 = vector.broadcast %5 : vector<1x32xf32> to vector<16x32xf32>
    %27 = arith.mulf %25, %26 : vector<16x32xf32>
    %28 = vector.broadcast %7 : vector<1x32xf32> to vector<16x32xf32>
    %29 = arith.addf %27, %28 : vector<16x32xf32>
    %30 = arith.truncf %29 : vector<16x32xf32> to vector<16x32xbf16>
    %c0_15 = arith.constant 0 : index
    %c0_16 = arith.constant 0 : index
    %c0_17 = arith.constant 0 : index
    %31 = vector.load %arg9[%c0_15, %c0_16, %c0_17] : memref<2x32x96xbf16, #tpu.memory_space<vmem>>, vector<1x32x96xbf16>
    %32 = vector.shape_cast %31 : vector<1x32x96xbf16> to vector<32x96xbf16>
    %cst_18 = arith.constant dense<0.000000e+00> : vector<16x96xf32>
    %33 = tpu.matmul %30, %32, %cst_18 {dimension_numbers = #tpu.dot_dimension_numbers<[1], [0], [0], [1], [0, 0, 1, 1], [], []>} : vector<16x32xbf16>, vector<32x96xbf16>, vector<16x96xf32> -> vector<16x96xf32>
    %34 = vector.extract_strided_slice %33 {offsets = [0, 0], sizes = [16, 32], strides = [1, 1]} : vector<16x96xf32> to vector<16x32xf32>
    %35 = vector.extract_strided_slice %33 {offsets = [0, 32], sizes = [16, 32], strides = [1, 1]} : vector<16x96xf32> to vector<16x32xf32>
    %36 = vector.extract_strided_slice %33 {offsets = [0, 64], sizes = [16, 32], strides = [1, 1]} : vector<16x96xf32> to vector<16x32xf32>
    %37 = tpu.concatenate %34, %35, %36 in 0 : vector<16x32xf32>, vector<16x32xf32>, vector<16x32xf32> -> vector<48x32xf32>
    %cst_19 = arith.constant dense<0.000000e+00> : vector<48x32xf32>
    %38 = tpu.matmul %0, %37, %cst_19 {dimension_numbers = #tpu.dot_dimension_numbers<[1], [0], [0], [1], [0, 0, 1, 1], [], []>} : vector<48x48xf32>, vector<48x32xf32>, vector<48x32xf32> -> vector<48x32xf32>
    %39 = vector.extract_strided_slice %38 {offsets = [0, 0], sizes = [16, 32], strides = [1, 1]} : vector<48x32xf32> to vector<16x32xf32>
    %40 = vector.extract_strided_slice %39 {offsets = [0, 0], sizes = [16, 8], strides = [1, 1]} : vector<16x32xf32> to vector<16x8xf32>
    %41 = vector.shape_cast %40 : vector<16x8xf32> to vector<2x8x8xf32>
    %42 = vector.extract_strided_slice %39 {offsets = [0, 8], sizes = [16, 8], strides = [1, 1]} : vector<16x32xf32> to vector<16x8xf32>
    %43 = vector.shape_cast %42 : vector<16x8xf32> to vector<2x8x8xf32>
    %44 = vector.extract_strided_slice %39 {offsets = [0, 16], sizes = [16, 8], strides = [1, 1]} : vector<16x32xf32> to vector<16x8xf32>
    %45 = vector.shape_cast %44 : vector<16x8xf32> to vector<2x8x8xf32>
    %46 = vector.extract_strided_slice %39 {offsets = [0, 24], sizes = [16, 8], strides = [1, 1]} : vector<16x32xf32> to vector<16x8xf32>
    %47 = vector.shape_cast %46 : vector<16x8xf32> to vector<2x8x8xf32>
    %48 = tpu.concatenate %41, %43, %45, %47 in 0 : vector<2x8x8xf32>, vector<2x8x8xf32>, vector<2x8x8xf32>, vector<2x8x8xf32> -> vector<8x8x8xf32>
    %49 = vector.extract_strided_slice %38 {offsets = [16, 0], sizes = [16, 32], strides = [1, 1]} : vector<48x32xf32> to vector<16x32xf32>
    %50 = vector.extract_strided_slice %49 {offsets = [0, 0], sizes = [16, 8], strides = [1, 1]} : vector<16x32xf32> to vector<16x8xf32>
    %51 = vector.shape_cast %50 : vector<16x8xf32> to vector<2x8x8xf32>
    %52 = vector.extract_strided_slice %49 {offsets = [0, 8], sizes = [16, 8], strides = [1, 1]} : vector<16x32xf32> to vector<16x8xf32>
    %53 = vector.shape_cast %52 : vector<16x8xf32> to vector<2x8x8xf32>
    %54 = vector.extract_strided_slice %49 {offsets = [0, 16], sizes = [16, 8], strides = [1, 1]} : vector<16x32xf32> to vector<16x8xf32>
    %55 = vector.shape_cast %54 : vector<16x8xf32> to vector<2x8x8xf32>
    %56 = vector.extract_strided_slice %49 {offsets = [0, 24], sizes = [16, 8], strides = [1, 1]} : vector<16x32xf32> to vector<16x8xf32>
    %57 = vector.shape_cast %56 : vector<16x8xf32> to vector<2x8x8xf32>
    %58 = tpu.concatenate %51, %53, %55, %57 in 0 : vector<2x8x8xf32>, vector<2x8x8xf32>, vector<2x8x8xf32>, vector<2x8x8xf32> -> vector<8x8x8xf32>
    %59 = vector.extract_strided_slice %38 {offsets = [32, 0], sizes = [16, 32], strides = [1, 1]} : vector<48x32xf32> to vector<16x32xf32>
    %60 = vector.extract_strided_slice %59 {offsets = [0, 0], sizes = [16, 8], strides = [1, 1]} : vector<16x32xf32> to vector<16x8xf32>
    %61 = vector.shape_cast %60 : vector<16x8xf32> to vector<2x8x8xf32>
    %62 = vector.extract_strided_slice %59 {offsets = [0, 8], sizes = [16, 8], strides = [1, 1]} : vector<16x32xf32> to vector<16x8xf32>
    %63 = vector.shape_cast %62 : vector<16x8xf32> to vector<2x8x8xf32>
    %64 = vector.extract_strided_slice %59 {offsets = [0, 16], sizes = [16, 8], strides = [1, 1]} : vector<16x32xf32> to vector<16x8xf32>
    %65 = vector.shape_cast %64 : vector<16x8xf32> to vector<2x8x8xf32>
    %66 = vector.extract_strided_slice %59 {offsets = [0, 24], sizes = [16, 8], strides = [1, 1]} : vector<16x32xf32> to vector<16x8xf32>
    %67 = vector.shape_cast %66 : vector<16x8xf32> to vector<2x8x8xf32>
    %68 = tpu.concatenate %61, %63, %65, %67 in 0 : vector<2x8x8xf32>, vector<2x8x8xf32>, vector<2x8x8xf32>, vector<2x8x8xf32> -> vector<8x8x8xf32>
    %69 = arith.truncf %48 : vector<8x8x8xf32> to vector<8x8x8xbf16>
    %70 = arith.truncf %58 : vector<8x8x8xf32> to vector<8x8x8xbf16>
    "tpu.trace_start"() <{level = 10 : i32, message = "bqd,bkd->bqk"}> : () -> ()
    %cst_20 = arith.constant dense<0.000000e+00> : vector<8x8x8xf32>
    %71 = tpu.matmul %69, %70, %cst_20 {dimension_numbers = #tpu.dot_dimension_numbers<[2], [2], [1], [1], [0, 0, 0, 1, 1, 1], [0], [0]>} : vector<8x8x8xbf16>, vector<8x8x8xbf16>, vector<8x8x8xf32> -> vector<8x8x8xf32>
    "tpu.trace_stop"() : () -> ()
    %cst_21 = arith.constant 0.353553385 : f32
    %72 = vector.broadcast %cst_21 : f32 to vector<8x8x8xf32>
    %73 = arith.mulf %71, %72 : vector<8x8x8xf32>
    %cst_22 = arith.constant dense<0xFF800000> : vector<8x8xf32>
    %74 = vector.multi_reduction <maximumf>, %73, %cst_22 [2] : vector<8x8x8xf32> to vector<8x8xf32>
    %75 = vector.shape_cast %74 : vector<8x8xf32> to vector<8x8x1xf32>
    %76 = vector.broadcast %75 : vector<8x8x1xf32> to vector<8x8x8xf32>
    %77 = arith.subf %73, %76 : vector<8x8x8xf32>
    %78 = math.exp %77 : vector<8x8x8xf32>
    %cst_23 = arith.constant dense<0.000000e+00> : vector<8x8xf32>
    %79 = vector.multi_reduction <add>, %78, %cst_23 [2] : vector<8x8x8xf32> to vector<8x8xf32>
    %80 = vector.shape_cast %79 : vector<8x8xf32> to vector<8x8x1xf32>
    %81 = vector.broadcast %80 : vector<8x8x1xf32> to vector<8x8x8xf32>
    %82 = arith.divf %78, %81 : vector<8x8x8xf32>
    %83 = arith.truncf %82 : vector<8x8x8xf32> to vector<8x8x8xbf16>
    %84 = arith.truncf %68 : vector<8x8x8xf32> to vector<8x8x8xbf16>
    "tpu.trace_start"() <{level = 10 : i32, message = "bqk,bkd->bqd"}> : () -> ()
    %cst_24 = arith.constant dense<0.000000e+00> : vector<8x8x8xf32>
    %85 = tpu.matmul %83, %84, %cst_24 {dimension_numbers = #tpu.dot_dimension_numbers<[2], [1], [1], [2], [0, 0, 0, 1, 1, 2], [0], [0]>} : vector<8x8x8xbf16>, vector<8x8x8xbf16>, vector<8x8x8xf32> -> vector<8x8x8xf32>
    "tpu.trace_stop"() : () -> ()
    %86 = vector.shape_cast %85 : vector<8x8x8xf32> to vector<64x8xf32>
    %cst_25 = arith.constant dense<0.000000e+00> : vector<64x8xf32>
    %87 = tpu.matmul %1, %86, %cst_25 {dimension_numbers = #tpu.dot_dimension_numbers<[1], [0], [0], [1], [0, 0, 1, 1], [], []>} : vector<64x64xf32>, vector<64x8xf32>, vector<64x8xf32> -> vector<64x8xf32>
    %cst_26 = arith.constant 0.000000e+00 : f32
    %88 = vector.broadcast %cst_26 : f32 to vector<16x32xf32>
    %89 = vector.extract_strided_slice %87 {offsets = [0, 0], sizes = [16, 8], strides = [1, 1]} : vector<64x8xf32> to vector<16x8xf32>
    %90 = arith.truncf %89 : vector<16x8xf32> to vector<16x8xbf16>
    %c0_27 = arith.constant 0 : index
    %c0_28 = arith.constant 0 : index
    %c0_29 = arith.constant 0 : index
    %91 = vector.load %arg10[%c0_27, %c0_28, %c0_29] : memref<8x8x32xbf16, #tpu.memory_space<vmem>>, vector<1x8x32xbf16>
    %92 = vector.shape_cast %91 : vector<1x8x32xbf16> to vector<8x32xbf16>
    %cst_30 = arith.constant dense<0.000000e+00> : vector<16x32xf32>
    %93 = tpu.matmul %90, %92, %cst_30 {dimension_numbers = #tpu.dot_dimension_numbers<[1], [0], [0], [1], [0, 0, 1, 1], [], []>} : vector<16x8xbf16>, vector<8x32xbf16>, vector<16x32xf32> -> vector<16x32xf32>
    %94 = arith.addf %88, %93 : vector<16x32xf32>
    %95 = vector.extract_strided_slice %87 {offsets = [16, 0], sizes = [16, 8], strides = [1, 1]} : vector<64x8xf32> to vector<16x8xf32>
    %96 = arith.truncf %95 : vector<16x8xf32> to vector<16x8xbf16>
    %c1 = arith.constant 1 : index
    %c0_31 = arith.constant 0 : index
    %c0_32 = arith.constant 0 : index
    %97 = vector.load %arg10[%c1, %c0_31, %c0_32] : memref<8x8x32xbf16, #tpu.memory_space<vmem>>, vector<1x8x32xbf16>
    %98 = vector.shape_cast %97 : vector<1x8x32xbf16> to vector<8x32xbf16>
    %cst_33 = arith.constant dense<0.000000e+00> : vector<16x32xf32>
    %99 = tpu.matmul %96, %98, %cst_33 {dimension_numbers = #tpu.dot_dimension_numbers<[1], [0], [0], [1], [0, 0, 1, 1], [], []>} : vector<16x8xbf16>, vector<8x32xbf16>, vector<16x32xf32> -> vector<16x32xf32>
    %100 = arith.addf %94, %99 : vector<16x32xf32>
    %101 = vector.extract_strided_slice %87 {offsets = [32, 0], sizes = [16, 8], strides = [1, 1]} : vector<64x8xf32> to vector<16x8xf32>
    %102 = arith.truncf %101 : vector<16x8xf32> to vector<16x8xbf16>
    %c2 = arith.constant 2 : index
    %c0_34 = arith.constant 0 : index
    %c0_35 = arith.constant 0 : index
    %103 = vector.load %arg10[%c2, %c0_34, %c0_35] : memref<8x8x32xbf16, #tpu.memory_space<vmem>>, vector<1x8x32xbf16>
    %104 = vector.shape_cast %103 : vector<1x8x32xbf16> to vector<8x32xbf16>
    %cst_36 = arith.constant dense<0.000000e+00> : vector<16x32xf32>
    %105 = tpu.matmul %102, %104, %cst_36 {dimension_numbers = #tpu.dot_dimension_numbers<[1], [0], [0], [1], [0, 0, 1, 1], [], []>} : vector<16x8xbf16>, vector<8x32xbf16>, vector<16x32xf32> -> vector<16x32xf32>
    %106 = arith.addf %100, %105 : vector<16x32xf32>
    %107 = vector.extract_strided_slice %87 {offsets = [48, 0], sizes = [16, 8], strides = [1, 1]} : vector<64x8xf32> to vector<16x8xf32>
    %108 = arith.truncf %107 : vector<16x8xf32> to vector<16x8xbf16>
    %c3 = arith.constant 3 : index
    %c0_37 = arith.constant 0 : index
    %c0_38 = arith.constant 0 : index
    %109 = vector.load %arg10[%c3, %c0_37, %c0_38] : memref<8x8x32xbf16, #tpu.memory_space<vmem>>, vector<1x8x32xbf16>
    %110 = vector.shape_cast %109 : vector<1x8x32xbf16> to vector<8x32xbf16>
    %cst_39 = arith.constant dense<0.000000e+00> : vector<16x32xf32>
    %111 = tpu.matmul %108, %110, %cst_39 {dimension_numbers = #tpu.dot_dimension_numbers<[1], [0], [0], [1], [0, 0, 1, 1], [], []>} : vector<16x8xbf16>, vector<8x32xbf16>, vector<16x32xf32> -> vector<16x32xf32>
    %112 = arith.addf %106, %111 : vector<16x32xf32>
    %113 = arith.addf %3, %112 : vector<16x32xf32>
    %c0_40 = arith.constant 0 : index
    %c0_41 = arith.constant 0 : index
    %c0_42 = arith.constant 0 : index
    %114 = vector.load %arg7[%c0_40, %c0_41, %c0_42] : memref<2x1x32xf32, #tpu.memory_space<vmem>>, vector<1x1x32xf32>
    %115 = vector.shape_cast %114 : vector<1x1x32xf32> to vector<1x32xf32>
    %c0_43 = arith.constant 0 : index
    %c0_44 = arith.constant 0 : index
    %c0_45 = arith.constant 0 : index
    %116 = vector.load %arg8[%c0_43, %c0_44, %c0_45] : memref<2x1x32xf32, #tpu.memory_space<vmem>>, vector<1x1x32xf32>
    %117 = vector.shape_cast %116 : vector<1x1x32xf32> to vector<1x32xf32>
    %cst_46 = arith.constant dense<0.000000e+00> : vector<16xf32>
    %118 = vector.multi_reduction <add>, %113, %cst_46 [1] : vector<16x32xf32> to vector<16xf32>
    %119 = vector.shape_cast %118 : vector<16xf32> to vector<16x1xf32>
    %cst_47 = arith.constant 3.200000e+01 : f32
    %120 = vector.broadcast %cst_47 : f32 to vector<16x1xf32>
    %121 = arith.divf %119, %120 : vector<16x1xf32>
    %122 = vector.broadcast %121 : vector<16x1xf32> to vector<16x32xf32>
    %123 = arith.subf %113, %122 : vector<16x32xf32>
    %124 = arith.mulf %123, %123 : vector<16x32xf32>
    %cst_48 = arith.constant dense<0.000000e+00> : vector<16xf32>
    %125 = vector.multi_reduction <add>, %124, %cst_48 [1] : vector<16x32xf32> to vector<16xf32>
    %126 = vector.shape_cast %125 : vector<16xf32> to vector<16x1xf32>
    %cst_49 = arith.constant 3.200000e+01 : f32
    %127 = vector.broadcast %cst_49 : f32 to vector<16x1xf32>
    %128 = arith.divf %126, %127 : vector<16x1xf32>
    %129 = vector.broadcast %121 : vector<16x1xf32> to vector<16x32xf32>
    %130 = arith.subf %113, %129 : vector<16x32xf32>
    %cst_50 = arith.constant 9.99999974E-6 : f32
    %131 = vector.broadcast %cst_50 : f32 to vector<16x1xf32>
    %132 = arith.addf %128, %131 : vector<16x1xf32>
    %133 = math.rsqrt %132 : vector<16x1xf32>
    %134 = vector.broadcast %133 : vector<16x1xf32> to vector<16x32xf32>
    %135 = arith.mulf %130, %134 : vector<16x32xf32>
    %136 = vector.broadcast %115 : vector<1x32xf32> to vector<16x32xf32>
    %137 = arith.mulf %135, %136 : vector<16x32xf32>
    %138 = vector.broadcast %117 : vector<1x32xf32> to vector<16x32xf32>
    %139 = arith.addf %137, %138 : vector<16x32xf32>
    %c0_51 = arith.constant 0 : index
    %c0_52 = arith.constant 0 : index
    %c0_53 = arith.constant 0 : index
    %140 = vector.load %arg11[%c0_51, %c0_52, %c0_53] : memref<2x32x8xf32, #tpu.memory_space<vmem>>, vector<1x32x8xf32>
    %141 = vector.shape_cast %140 : vector<1x32x8xf32> to vector<32x8xf32>
    %cst_54 = arith.constant dense<0.000000e+00> : vector<16x8xf32>
    %142 = tpu.matmul %139, %141, %cst_54 {dimension_numbers = #tpu.dot_dimension_numbers<[1], [0], [0], [1], [0, 0, 1, 1], [], []>} : vector<16x32xf32>, vector<32x8xf32>, vector<16x8xf32> -> vector<16x8xf32>
    %c0_55 = arith.constant 0 : index
    %c0_56 = arith.constant 0 : index
    %c0_57 = arith.constant 0 : index
    %143 = vector.load %arg12[%c0_55, %c0_56, %c0_57] : memref<2x1x8xf32, #tpu.memory_space<vmem>>, vector<1x1x8xf32>
    %144 = vector.shape_cast %143 : vector<1x1x8xf32> to vector<1x8xf32>
    %145 = vector.broadcast %144 : vector<1x8xf32> to vector<16x8xf32>
    %146 = arith.addf %142, %145 : vector<16x8xf32>
    %147 = vector.extract_strided_slice %146 {offsets = [0, 0], sizes = [16, 4], strides = [1, 1]} : vector<16x8xf32> to vector<16x4xf32>
    %148 = vector.extract_strided_slice %146 {offsets = [0, 4], sizes = [16, 4], strides = [1, 1]} : vector<16x8xf32> to vector<16x4xf32>
    %c0_58 = arith.constant 0 : index
    %c0_59 = arith.constant 0 : index
    %c0_60 = arith.constant 0 : index
    %149 = vector.load %arg2[%c0_58, %c0_59, %c0_60] : memref<2x16x4xf32, #tpu.memory_space<vmem>>, vector<1x16x4xf32>
    %150 = vector.shape_cast %149 : vector<1x16x4xf32> to vector<16x4xf32>
    %cst_61 = arith.constant 0.000000e+00 : f32
    %151 = vector.broadcast %cst_61 : f32 to vector<16x4xf32>
    %152 = arith.maximumf %148, %151 : vector<16x4xf32>
    %153 = math.absf %148 : vector<16x4xf32>
    %cst_62 = arith.constant 0.000000e+00 : f32
    %154 = vector.broadcast %cst_62 : f32 to vector<16x4xf32>
    %155 = arith.subf %154, %153 : vector<16x4xf32>
    %156 = math.exp %155 : vector<16x4xf32>
    %cst_63 = arith.constant 1.000000e+00 : f32
    %157 = vector.broadcast %cst_63 : f32 to vector<16x4xf32>
    %158 = arith.addf %157, %156 : vector<16x4xf32>
    %159 = math.log %158 : vector<16x4xf32>
    %160 = arith.addf %152, %159 : vector<16x4xf32>
    %161 = arith.mulf %150, %160 : vector<16x4xf32>
    %162 = arith.addf %147, %161 : vector<16x4xf32>
    %163 = vector.extract_strided_slice %162 {offsets = [0, 0], sizes = [16, 1], strides = [1, 1]} : vector<16x4xf32> to vector<16x1xf32>
    %164 = vector.broadcast %163 : vector<16x1xf32> to vector<16x4xf32>
    %165 = arith.cmpf ogt, %162, %164 : vector<16x4xf32>
    %166 = vector.broadcast %163 : vector<16x1xf32> to vector<16x4xf32>
    %167 = arith.cmpf oeq, %162, %166 : vector<16x4xf32>
    %c0_i32 = arith.constant 0 : i32
    %168 = vector.broadcast %c0_i32 : i32 to vector<16x4xi32>
    %169 = arith.cmpi slt, %2, %168 : vector<16x4xi32>
    %170 = arith.andi %167, %169 : vector<16x4xi1>
    %171 = arith.ori %165, %170 : vector<16x4xi1>
    %172 = arith.extui %171 : vector<16x4xi1> to vector<16x4xi32>
    %173 = arith.sitofp %172 : vector<16x4xi32> to vector<16x4xf32>
    %cst_64 = arith.constant dense<0.000000e+00> : vector<16xf32>
    %174 = vector.multi_reduction <add>, %173, %cst_64 [1] : vector<16x4xf32> to vector<16xf32>
    %175 = vector.shape_cast %174 : vector<16xf32> to vector<16x1xf32>
    %cst_65 = arith.constant 2.000000e+00 : f32
    %176 = vector.broadcast %cst_65 : f32 to vector<16x1xf32>
    %177 = arith.cmpf olt, %175, %176 : vector<16x1xf32>
    %178 = arith.extui %177 : vector<16x1xi1> to vector<16x1xi32>
    %179 = arith.sitofp %178 : vector<16x1xi32> to vector<16x1xf32>
    %180 = vector.extract_strided_slice %162 {offsets = [0, 1], sizes = [16, 1], strides = [1, 1]} : vector<16x4xf32> to vector<16x1xf32>
    %181 = vector.broadcast %180 : vector<16x1xf32> to vector<16x4xf32>
    %182 = arith.cmpf ogt, %162, %181 : vector<16x4xf32>
    %183 = vector.broadcast %180 : vector<16x1xf32> to vector<16x4xf32>
    %184 = arith.cmpf oeq, %162, %183 : vector<16x4xf32>
    %c1_i32 = arith.constant 1 : i32
    %185 = vector.broadcast %c1_i32 : i32 to vector<16x4xi32>
    %186 = arith.cmpi slt, %2, %185 : vector<16x4xi32>
    %187 = arith.andi %184, %186 : vector<16x4xi1>
    %188 = arith.ori %182, %187 : vector<16x4xi1>
    %189 = arith.extui %188 : vector<16x4xi1> to vector<16x4xi32>
    %190 = arith.sitofp %189 : vector<16x4xi32> to vector<16x4xf32>
    %cst_66 = arith.constant dense<0.000000e+00> : vector<16xf32>
    %191 = vector.multi_reduction <add>, %190, %cst_66 [1] : vector<16x4xf32> to vector<16xf32>
    %192 = vector.shape_cast %191 : vector<16xf32> to vector<16x1xf32>
    %cst_67 = arith.constant 2.000000e+00 : f32
    %193 = vector.broadcast %cst_67 : f32 to vector<16x1xf32>
    %194 = arith.cmpf olt, %192, %193 : vector<16x1xf32>
    %195 = arith.extui %194 : vector<16x1xi1> to vector<16x1xi32>
    %196 = arith.sitofp %195 : vector<16x1xi32> to vector<16x1xf32>
    %197 = vector.extract_strided_slice %162 {offsets = [0, 2], sizes = [16, 1], strides = [1, 1]} : vector<16x4xf32> to vector<16x1xf32>
    %198 = vector.broadcast %197 : vector<16x1xf32> to vector<16x4xf32>
    %199 = arith.cmpf ogt, %162, %198 : vector<16x4xf32>
    %200 = vector.broadcast %197 : vector<16x1xf32> to vector<16x4xf32>
    %201 = arith.cmpf oeq, %162, %200 : vector<16x4xf32>
    %c2_i32 = arith.constant 2 : i32
    %202 = vector.broadcast %c2_i32 : i32 to vector<16x4xi32>
    %203 = arith.cmpi slt, %2, %202 : vector<16x4xi32>
    %204 = arith.andi %201, %203 : vector<16x4xi1>
    %205 = arith.ori %199, %204 : vector<16x4xi1>
    %206 = arith.extui %205 : vector<16x4xi1> to vector<16x4xi32>
    %207 = arith.sitofp %206 : vector<16x4xi32> to vector<16x4xf32>
    %cst_68 = arith.constant dense<0.000000e+00> : vector<16xf32>
    %208 = vector.multi_reduction <add>, %207, %cst_68 [1] : vector<16x4xf32> to vector<16xf32>
    %209 = vector.shape_cast %208 : vector<16xf32> to vector<16x1xf32>
    %cst_69 = arith.constant 2.000000e+00 : f32
    %210 = vector.broadcast %cst_69 : f32 to vector<16x1xf32>
    %211 = arith.cmpf olt, %209, %210 : vector<16x1xf32>
    %212 = arith.extui %211 : vector<16x1xi1> to vector<16x1xi32>
    %213 = arith.sitofp %212 : vector<16x1xi32> to vector<16x1xf32>
    %214 = vector.extract_strided_slice %162 {offsets = [0, 3], sizes = [16, 1], strides = [1, 1]} : vector<16x4xf32> to vector<16x1xf32>
    %215 = vector.broadcast %214 : vector<16x1xf32> to vector<16x4xf32>
    %216 = arith.cmpf ogt, %162, %215 : vector<16x4xf32>
    %217 = vector.broadcast %214 : vector<16x1xf32> to vector<16x4xf32>
    %218 = arith.cmpf oeq, %162, %217 : vector<16x4xf32>
    %c3_i32 = arith.constant 3 : i32
    %219 = vector.broadcast %c3_i32 : i32 to vector<16x4xi32>
    %220 = arith.cmpi slt, %2, %219 : vector<16x4xi32>
    %221 = arith.andi %218, %220 : vector<16x4xi1>
    %222 = arith.ori %216, %221 : vector<16x4xi1>
    %223 = arith.extui %222 : vector<16x4xi1> to vector<16x4xi32>
    %224 = arith.sitofp %223 : vector<16x4xi32> to vector<16x4xf32>
    %cst_70 = arith.constant dense<0.000000e+00> : vector<16xf32>
    %225 = vector.multi_reduction <add>, %224, %cst_70 [1] : vector<16x4xf32> to vector<16xf32>
    %226 = vector.shape_cast %225 : vector<16xf32> to vector<16x1xf32>
    %cst_71 = arith.constant 2.000000e+00 : f32
    %227 = vector.broadcast %cst_71 : f32 to vector<16x1xf32>
    %228 = arith.cmpf olt, %226, %227 : vector<16x1xf32>
    %229 = arith.extui %228 : vector<16x1xi1> to vector<16x1xi32>
    %230 = arith.sitofp %229 : vector<16x1xi32> to vector<16x1xf32>
    %231 = tpu.concatenate %179, %196, %213, %230 in 1 : vector<16x1xf32>, vector<16x1xf32>, vector<16x1xf32>, vector<16x1xf32> -> vector<16x4xf32>
    %cst_72 = arith.constant 0.000000e+00 : f32
    %232 = vector.broadcast %cst_72 : f32 to vector<16x4xf32>
    %233 = arith.cmpf ogt, %231, %232 : vector<16x4xf32>
    %cst_73 = arith.constant -1.000000e+30 : f32
    %234 = vector.broadcast %cst_73 : f32 to vector<16x4xf32>
    %235 = arith.select %233, %162, %234 : vector<16x4xi1>, vector<16x4xf32>
    %cst_74 = arith.constant dense<0xFF800000> : vector<16xf32>
    %236 = vector.multi_reduction <maximumf>, %235, %cst_74 [1] : vector<16x4xf32> to vector<16xf32>
    %237 = vector.shape_cast %236 : vector<16xf32> to vector<16x1xf32>
    %238 = vector.broadcast %237 : vector<16x1xf32> to vector<16x4xf32>
    %239 = arith.subf %235, %238 : vector<16x4xf32>
    %240 = math.exp %239 : vector<16x4xf32>
    %cst_75 = arith.constant dense<0.000000e+00> : vector<16xf32>
    %241 = vector.multi_reduction <add>, %240, %cst_75 [1] : vector<16x4xf32> to vector<16xf32>
    %242 = vector.shape_cast %241 : vector<16xf32> to vector<16x1xf32>
    %243 = vector.broadcast %242 : vector<16x1xf32> to vector<16x4xf32>
    %244 = arith.divf %240, %243 : vector<16x4xf32>
    %cst_76 = arith.constant 0.000000e+00 : f32
    %245 = vector.broadcast %cst_76 : f32 to vector<1x4xf32>
    %246 = vector.extract_strided_slice %231 {offsets = [0, 0], sizes = [15, 4], strides = [1, 1]} : vector<16x4xf32> to vector<15x4xf32>
    %247 = tpu.concatenate %245, %246 in 0 : vector<1x4xf32>, vector<15x4xf32> -> vector<16x4xf32>
    %248 = arith.addf %231, %247 : vector<16x4xf32>
    %cst_77 = arith.constant 0.000000e+00 : f32
    %249 = vector.broadcast %cst_77 : f32 to vector<2x4xf32>
    %250 = vector.extract_strided_slice %248 {offsets = [0, 0], sizes = [14, 4], strides = [1, 1]} : vector<16x4xf32> to vector<14x4xf32>
    %251 = tpu.concatenate %249, %250 in 0 : vector<2x4xf32>, vector<14x4xf32> -> vector<16x4xf32>
    %252 = arith.addf %248, %251 : vector<16x4xf32>
    %cst_78 = arith.constant 0.000000e+00 : f32
    %253 = vector.broadcast %cst_78 : f32 to vector<4x4xf32>
    %254 = vector.extract_strided_slice %252 {offsets = [0, 0], sizes = [12, 4], strides = [1, 1]} : vector<16x4xf32> to vector<12x4xf32>
    %255 = tpu.concatenate %253, %254 in 0 : vector<4x4xf32>, vector<12x4xf32> -> vector<16x4xf32>
    %256 = arith.addf %252, %255 : vector<16x4xf32>
    %cst_79 = arith.constant 0.000000e+00 : f32
    %257 = vector.broadcast %cst_79 : f32 to vector<8x4xf32>
    %258 = vector.extract_strided_slice %256 {offsets = [0, 0], sizes = [8, 4], strides = [1, 1]} : vector<16x4xf32> to vector<8x4xf32>
    %259 = tpu.concatenate %257, %258 in 0 : vector<8x4xf32>, vector<8x4xf32> -> vector<16x4xf32>
    %260 = arith.addf %256, %259 : vector<16x4xf32>
    %cst_80 = arith.constant 8.000000e+00 : f32
    %261 = vector.broadcast %cst_80 : f32 to vector<16x4xf32>
    %262 = arith.cmpf ole, %260, %261 : vector<16x4xf32>
    %263 = arith.extui %262 : vector<16x4xi1> to vector<16x4xi32>
    %264 = arith.sitofp %263 : vector<16x4xi32> to vector<16x4xf32>
    %265 = arith.mulf %264, %231 : vector<16x4xf32>
    %266 = arith.mulf %244, %265 : vector<16x4xf32>
    %267 = arith.truncf %139 : vector<16x32xf32> to vector<16x32xbf16>
    %cst_81 = arith.constant 0.000000e+00 : f32
    %268 = vector.broadcast %cst_81 : f32 to vector<16x32xf32>
    %c0_82 = arith.constant 0 : index
    %c0_83 = arith.constant 0 : index
    %c0_84 = arith.constant 0 : index
    %269 = vector.load %arg13[%c0_82, %c0_83, %c0_84] : memref<8x32x128xbf16, #tpu.memory_space<vmem>>, vector<1x32x128xbf16>
    %270 = vector.shape_cast %269 : vector<1x32x128xbf16> to vector<32x128xbf16>
    %cst_85 = arith.constant dense<0.000000e+00> : vector<16x128xf32>
    %271 = tpu.matmul %267, %270, %cst_85 {dimension_numbers = #tpu.dot_dimension_numbers<[1], [0], [0], [1], [0, 0, 1, 1], [], []>} : vector<16x32xbf16>, vector<32x128xbf16>, vector<16x128xf32> -> vector<16x128xf32>
    %c0_86 = arith.constant 0 : index
    %c0_87 = arith.constant 0 : index
    %c0_88 = arith.constant 0 : index
    %272 = vector.load %arg14[%c0_86, %c0_87, %c0_88] : memref<8x1x128xf32, #tpu.memory_space<vmem>>, vector<1x1x128xf32>
    %273 = vector.shape_cast %272 : vector<1x1x128xf32> to vector<1x128xf32>
    %274 = vector.broadcast %273 : vector<1x128xf32> to vector<16x128xf32>
    %275 = arith.addf %271, %274 : vector<16x128xf32>
    %cst_89 = arith.constant 0.000000e+00 : f32
    %276 = vector.broadcast %cst_89 : f32 to vector<16x128xf32>
    %277 = arith.maximumf %275, %276 : vector<16x128xf32>
    %278 = arith.truncf %277 : vector<16x128xf32> to vector<16x128xbf16>
    %c0_90 = arith.constant 0 : index
    %c0_91 = arith.constant 0 : index
    %c0_92 = arith.constant 0 : index
    %279 = vector.load %arg15[%c0_90, %c0_91, %c0_92] : memref<8x128x32xbf16, #tpu.memory_space<vmem>>, vector<1x128x32xbf16>
    %280 = vector.shape_cast %279 : vector<1x128x32xbf16> to vector<128x32xbf16>
    %cst_93 = arith.constant dense<0.000000e+00> : vector<16x32xf32>
    %281 = tpu.matmul %278, %280, %cst_93 {dimension_numbers = #tpu.dot_dimension_numbers<[1], [0], [0], [1], [0, 0, 1, 1], [], []>} : vector<16x128xbf16>, vector<128x32xbf16>, vector<16x32xf32> -> vector<16x32xf32>
    %c0_94 = arith.constant 0 : index
    %c0_95 = arith.constant 0 : index
    %c0_96 = arith.constant 0 : index
    %282 = vector.load %arg16[%c0_94, %c0_95, %c0_96] : memref<8x1x32xf32, #tpu.memory_space<vmem>>, vector<1x1x32xf32>
    %283 = vector.shape_cast %282 : vector<1x1x32xf32> to vector<1x32xf32>
    %284 = vector.broadcast %283 : vector<1x32xf32> to vector<16x32xf32>
    %285 = arith.addf %281, %284 : vector<16x32xf32>
    %286 = vector.extract_strided_slice %266 {offsets = [0, 0], sizes = [16, 1], strides = [1, 1]} : vector<16x4xf32> to vector<16x1xf32>
    %287 = vector.broadcast %286 : vector<16x1xf32> to vector<16x32xf32>
    %288 = arith.mulf %285, %287 : vector<16x32xf32>
    %289 = arith.addf %268, %288 : vector<16x32xf32>
    %c1_97 = arith.constant 1 : index
    %c0_98 = arith.constant 0 : index
    %c0_99 = arith.constant 0 : index
    %290 = vector.load %arg13[%c1_97, %c0_98, %c0_99] : memref<8x32x128xbf16, #tpu.memory_space<vmem>>, vector<1x32x128xbf16>
    %291 = vector.shape_cast %290 : vector<1x32x128xbf16> to vector<32x128xbf16>
    %cst_100 = arith.constant dense<0.000000e+00> : vector<16x128xf32>
    %292 = tpu.matmul %267, %291, %cst_100 {dimension_numbers = #tpu.dot_dimension_numbers<[1], [0], [0], [1], [0, 0, 1, 1], [], []>} : vector<16x32xbf16>, vector<32x128xbf16>, vector<16x128xf32> -> vector<16x128xf32>
    %c1_101 = arith.constant 1 : index
    %c0_102 = arith.constant 0 : index
    %c0_103 = arith.constant 0 : index
    %293 = vector.load %arg14[%c1_101, %c0_102, %c0_103] : memref<8x1x128xf32, #tpu.memory_space<vmem>>, vector<1x1x128xf32>
    %294 = vector.shape_cast %293 : vector<1x1x128xf32> to vector<1x128xf32>
    %295 = vector.broadcast %294 : vector<1x128xf32> to vector<16x128xf32>
    %296 = arith.addf %292, %295 : vector<16x128xf32>
    %cst_104 = arith.constant 0.000000e+00 : f32
    %297 = vector.broadcast %cst_104 : f32 to vector<16x128xf32>
    %298 = arith.maximumf %296, %297 : vector<16x128xf32>
    %299 = arith.truncf %298 : vector<16x128xf32> to vector<16x128xbf16>
    %c1_105 = arith.constant 1 : index
    %c0_106 = arith.constant 0 : index
    %c0_107 = arith.constant 0 : index
    %300 = vector.load %arg15[%c1_105, %c0_106, %c0_107] : memref<8x128x32xbf16, #tpu.memory_space<vmem>>, vector<1x128x32xbf16>
    %301 = vector.shape_cast %300 : vector<1x128x32xbf16> to vector<128x32xbf16>
    %cst_108 = arith.constant dense<0.000000e+00> : vector<16x32xf32>
    %302 = tpu.matmul %299, %301, %cst_108 {dimension_numbers = #tpu.dot_dimension_numbers<[1], [0], [0], [1], [0, 0, 1, 1], [], []>} : vector<16x128xbf16>, vector<128x32xbf16>, vector<16x32xf32> -> vector<16x32xf32>
    %c1_109 = arith.constant 1 : index
    %c0_110 = arith.constant 0 : index
    %c0_111 = arith.constant 0 : index
    %303 = vector.load %arg16[%c1_109, %c0_110, %c0_111] : memref<8x1x32xf32, #tpu.memory_space<vmem>>, vector<1x1x32xf32>
    %304 = vector.shape_cast %303 : vector<1x1x32xf32> to vector<1x32xf32>
    %305 = vector.broadcast %304 : vector<1x32xf32> to vector<16x32xf32>
    %306 = arith.addf %302, %305 : vector<16x32xf32>
    %307 = vector.extract_strided_slice %266 {offsets = [0, 1], sizes = [16, 1], strides = [1, 1]} : vector<16x4xf32> to vector<16x1xf32>
    %308 = vector.broadcast %307 : vector<16x1xf32> to vector<16x32xf32>
    %309 = arith.mulf %306, %308 : vector<16x32xf32>
    %310 = arith.addf %289, %309 : vector<16x32xf32>
    %c2_112 = arith.constant 2 : index
    %c0_113 = arith.constant 0 : index
    %c0_114 = arith.constant 0 : index
    %311 = vector.load %arg13[%c2_112, %c0_113, %c0_114] : memref<8x32x128xbf16, #tpu.memory_space<vmem>>, vector<1x32x128xbf16>
    %312 = vector.shape_cast %311 : vector<1x32x128xbf16> to vector<32x128xbf16>
    %cst_115 = arith.constant dense<0.000000e+00> : vector<16x128xf32>
    %313 = tpu.matmul %267, %312, %cst_115 {dimension_numbers = #tpu.dot_dimension_numbers<[1], [0], [0], [1], [0, 0, 1, 1], [], []>} : vector<16x32xbf16>, vector<32x128xbf16>, vector<16x128xf32> -> vector<16x128xf32>
    %c2_116 = arith.constant 2 : index
    %c0_117 = arith.constant 0 : index
    %c0_118 = arith.constant 0 : index
    %314 = vector.load %arg14[%c2_116, %c0_117, %c0_118] : memref<8x1x128xf32, #tpu.memory_space<vmem>>, vector<1x1x128xf32>
    %315 = vector.shape_cast %314 : vector<1x1x128xf32> to vector<1x128xf32>
    %316 = vector.broadcast %315 : vector<1x128xf32> to vector<16x128xf32>
    %317 = arith.addf %313, %316 : vector<16x128xf32>
    %cst_119 = arith.constant 0.000000e+00 : f32
    %318 = vector.broadcast %cst_119 : f32 to vector<16x128xf32>
    %319 = arith.maximumf %317, %318 : vector<16x128xf32>
    %320 = arith.truncf %319 : vector<16x128xf32> to vector<16x128xbf16>
    %c2_120 = arith.constant 2 : index
    %c0_121 = arith.constant 0 : index
    %c0_122 = arith.constant 0 : index
    %321 = vector.load %arg15[%c2_120, %c0_121, %c0_122] : memref<8x128x32xbf16, #tpu.memory_space<vmem>>, vector<1x128x32xbf16>
    %322 = vector.shape_cast %321 : vector<1x128x32xbf16> to vector<128x32xbf16>
    %cst_123 = arith.constant dense<0.000000e+00> : vector<16x32xf32>
    %323 = tpu.matmul %320, %322, %cst_123 {dimension_numbers = #tpu.dot_dimension_numbers<[1], [0], [0], [1], [0, 0, 1, 1], [], []>} : vector<16x128xbf16>, vector<128x32xbf16>, vector<16x32xf32> -> vector<16x32xf32>
    %c2_124 = arith.constant 2 : index
    %c0_125 = arith.constant 0 : index
    %c0_126 = arith.constant 0 : index
    %324 = vector.load %arg16[%c2_124, %c0_125, %c0_126] : memref<8x1x32xf32, #tpu.memory_space<vmem>>, vector<1x1x32xf32>
    %325 = vector.shape_cast %324 : vector<1x1x32xf32> to vector<1x32xf32>
    %326 = vector.broadcast %325 : vector<1x32xf32> to vector<16x32xf32>
    %327 = arith.addf %323, %326 : vector<16x32xf32>
    %328 = vector.extract_strided_slice %266 {offsets = [0, 2], sizes = [16, 1], strides = [1, 1]} : vector<16x4xf32> to vector<16x1xf32>
    %329 = vector.broadcast %328 : vector<16x1xf32> to vector<16x32xf32>
    %330 = arith.mulf %327, %329 : vector<16x32xf32>
    %331 = arith.addf %310, %330 : vector<16x32xf32>
    %c3_127 = arith.constant 3 : index
    %c0_128 = arith.constant 0 : index
    %c0_129 = arith.constant 0 : index
    %332 = vector.load %arg13[%c3_127, %c0_128, %c0_129] : memref<8x32x128xbf16, #tpu.memory_space<vmem>>, vector<1x32x128xbf16>
    %333 = vector.shape_cast %332 : vector<1x32x128xbf16> to vector<32x128xbf16>
    %cst_130 = arith.constant dense<0.000000e+00> : vector<16x128xf32>
    %334 = tpu.matmul %267, %333, %cst_130 {dimension_numbers = #tpu.dot_dimension_numbers<[1], [0], [0], [1], [0, 0, 1, 1], [], []>} : vector<16x32xbf16>, vector<32x128xbf16>, vector<16x128xf32> -> vector<16x128xf32>
    %c3_131 = arith.constant 3 : index
    %c0_132 = arith.constant 0 : index
    %c0_133 = arith.constant 0 : index
    %335 = vector.load %arg14[%c3_131, %c0_132, %c0_133] : memref<8x1x128xf32, #tpu.memory_space<vmem>>, vector<1x1x128xf32>
    %336 = vector.shape_cast %335 : vector<1x1x128xf32> to vector<1x128xf32>
    %337 = vector.broadcast %336 : vector<1x128xf32> to vector<16x128xf32>
    %338 = arith.addf %334, %337 : vector<16x128xf32>
    %cst_134 = arith.constant 0.000000e+00 : f32
    %339 = vector.broadcast %cst_134 : f32 to vector<16x128xf32>
    %340 = arith.maximumf %338, %339 : vector<16x128xf32>
    %341 = arith.truncf %340 : vector<16x128xf32> to vector<16x128xbf16>
    %c3_135 = arith.constant 3 : index
    %c0_136 = arith.constant 0 : index
    %c0_137 = arith.constant 0 : index
    %342 = vector.load %arg15[%c3_135, %c0_136, %c0_137] : memref<8x128x32xbf16, #tpu.memory_space<vmem>>, vector<1x128x32xbf16>
    %343 = vector.shape_cast %342 : vector<1x128x32xbf16> to vector<128x32xbf16>
    %cst_138 = arith.constant dense<0.000000e+00> : vector<16x32xf32>
    %344 = tpu.matmul %341, %343, %cst_138 {dimension_numbers = #tpu.dot_dimension_numbers<[1], [0], [0], [1], [0, 0, 1, 1], [], []>} : vector<16x128xbf16>, vector<128x32xbf16>, vector<16x32xf32> -> vector<16x32xf32>
    %c3_139 = arith.constant 3 : index
    %c0_140 = arith.constant 0 : index
    %c0_141 = arith.constant 0 : index
    %345 = vector.load %arg16[%c3_139, %c0_140, %c0_141] : memref<8x1x32xf32, #tpu.memory_space<vmem>>, vector<1x1x32xf32>
    %346 = vector.shape_cast %345 : vector<1x1x32xf32> to vector<1x32xf32>
    %347 = vector.broadcast %346 : vector<1x32xf32> to vector<16x32xf32>
    %348 = arith.addf %344, %347 : vector<16x32xf32>
    %349 = vector.extract_strided_slice %266 {offsets = [0, 3], sizes = [16, 1], strides = [1, 1]} : vector<16x4xf32> to vector<16x1xf32>
    %350 = vector.broadcast %349 : vector<16x1xf32> to vector<16x32xf32>
    %351 = arith.mulf %348, %350 : vector<16x32xf32>
    %352 = arith.addf %331, %351 : vector<16x32xf32>
    %353 = arith.addf %113, %352 : vector<16x32xf32>
    %c1_142 = arith.constant 1 : index
    %c0_143 = arith.constant 0 : index
    %c0_144 = arith.constant 0 : index
    %354 = vector.load %arg5[%c1_142, %c0_143, %c0_144] : memref<2x1x32xf32, #tpu.memory_space<vmem>>, vector<1x1x32xf32>
    %355 = vector.shape_cast %354 : vector<1x1x32xf32> to vector<1x32xf32>
    %c1_145 = arith.constant 1 : index
    %c0_146 = arith.constant 0 : index
    %c0_147 = arith.constant 0 : index
    %356 = vector.load %arg6[%c1_145, %c0_146, %c0_147] : memref<2x1x32xf32, #tpu.memory_space<vmem>>, vector<1x1x32xf32>
    %357 = vector.shape_cast %356 : vector<1x1x32xf32> to vector<1x32xf32>
    %cst_148 = arith.constant dense<0.000000e+00> : vector<16xf32>
    %358 = vector.multi_reduction <add>, %353, %cst_148 [1] : vector<16x32xf32> to vector<16xf32>
    %359 = vector.shape_cast %358 : vector<16xf32> to vector<16x1xf32>
    %cst_149 = arith.constant 3.200000e+01 : f32
    %360 = vector.broadcast %cst_149 : f32 to vector<16x1xf32>
    %361 = arith.divf %359, %360 : vector<16x1xf32>
    %362 = vector.broadcast %361 : vector<16x1xf32> to vector<16x32xf32>
    %363 = arith.subf %353, %362 : vector<16x32xf32>
    %364 = arith.mulf %363, %363 : vector<16x32xf32>
    %cst_150 = arith.constant dense<0.000000e+00> : vector<16xf32>
    %365 = vector.multi_reduction <add>, %364, %cst_150 [1] : vector<16x32xf32> to vector<16xf32>
    %366 = vector.shape_cast %365 : vector<16xf32> to vector<16x1xf32>
    %cst_151 = arith.constant 3.200000e+01 : f32
    %367 = vector.broadcast %cst_151 : f32 to vector<16x1xf32>
    %368 = arith.divf %366, %367 : vector<16x1xf32>
    %369 = vector.broadcast %361 : vector<16x1xf32> to vector<16x32xf32>
    %370 = arith.subf %353, %369 : vector<16x32xf32>
    %cst_152 = arith.constant 9.99999974E-6 : f32
    %371 = vector.broadcast %cst_152 : f32 to vector<16x1xf32>
    %372 = arith.addf %368, %371 : vector<16x1xf32>
    %373 = math.rsqrt %372 : vector<16x1xf32>
    %374 = vector.broadcast %373 : vector<16x1xf32> to vector<16x32xf32>
    %375 = arith.mulf %370, %374 : vector<16x32xf32>
    %376 = vector.broadcast %355 : vector<1x32xf32> to vector<16x32xf32>
    %377 = arith.mulf %375, %376 : vector<16x32xf32>
    %378 = vector.broadcast %357 : vector<1x32xf32> to vector<16x32xf32>
    %379 = arith.addf %377, %378 : vector<16x32xf32>
    %380 = arith.truncf %379 : vector<16x32xf32> to vector<16x32xbf16>
    %c1_153 = arith.constant 1 : index
    %c0_154 = arith.constant 0 : index
    %c0_155 = arith.constant 0 : index
    %381 = vector.load %arg9[%c1_153, %c0_154, %c0_155] : memref<2x32x96xbf16, #tpu.memory_space<vmem>>, vector<1x32x96xbf16>
    %382 = vector.shape_cast %381 : vector<1x32x96xbf16> to vector<32x96xbf16>
    %cst_156 = arith.constant dense<0.000000e+00> : vector<16x96xf32>
    %383 = tpu.matmul %380, %382, %cst_156 {dimension_numbers = #tpu.dot_dimension_numbers<[1], [0], [0], [1], [0, 0, 1, 1], [], []>} : vector<16x32xbf16>, vector<32x96xbf16>, vector<16x96xf32> -> vector<16x96xf32>
    %384 = vector.extract_strided_slice %383 {offsets = [0, 0], sizes = [16, 32], strides = [1, 1]} : vector<16x96xf32> to vector<16x32xf32>
    %385 = vector.extract_strided_slice %383 {offsets = [0, 32], sizes = [16, 32], strides = [1, 1]} : vector<16x96xf32> to vector<16x32xf32>
    %386 = vector.extract_strided_slice %383 {offsets = [0, 64], sizes = [16, 32], strides = [1, 1]} : vector<16x96xf32> to vector<16x32xf32>
    %387 = tpu.concatenate %384, %385, %386 in 0 : vector<16x32xf32>, vector<16x32xf32>, vector<16x32xf32> -> vector<48x32xf32>
    %cst_157 = arith.constant dense<0.000000e+00> : vector<48x32xf32>
    %388 = tpu.matmul %0, %387, %cst_157 {dimension_numbers = #tpu.dot_dimension_numbers<[1], [0], [0], [1], [0, 0, 1, 1], [], []>} : vector<48x48xf32>, vector<48x32xf32>, vector<48x32xf32> -> vector<48x32xf32>
    %389 = vector.extract_strided_slice %388 {offsets = [0, 0], sizes = [16, 32], strides = [1, 1]} : vector<48x32xf32> to vector<16x32xf32>
    %390 = vector.extract_strided_slice %389 {offsets = [0, 0], sizes = [16, 8], strides = [1, 1]} : vector<16x32xf32> to vector<16x8xf32>
    %391 = vector.shape_cast %390 : vector<16x8xf32> to vector<2x8x8xf32>
    %392 = vector.extract_strided_slice %389 {offsets = [0, 8], sizes = [16, 8], strides = [1, 1]} : vector<16x32xf32> to vector<16x8xf32>
    %393 = vector.shape_cast %392 : vector<16x8xf32> to vector<2x8x8xf32>
    %394 = vector.extract_strided_slice %389 {offsets = [0, 16], sizes = [16, 8], strides = [1, 1]} : vector<16x32xf32> to vector<16x8xf32>
    %395 = vector.shape_cast %394 : vector<16x8xf32> to vector<2x8x8xf32>
    %396 = vector.extract_strided_slice %389 {offsets = [0, 24], sizes = [16, 8], strides = [1, 1]} : vector<16x32xf32> to vector<16x8xf32>
    %397 = vector.shape_cast %396 : vector<16x8xf32> to vector<2x8x8xf32>
    %398 = tpu.concatenate %391, %393, %395, %397 in 0 : vector<2x8x8xf32>, vector<2x8x8xf32>, vector<2x8x8xf32>, vector<2x8x8xf32> -> vector<8x8x8xf32>
    %399 = vector.extract_strided_slice %388 {offsets = [16, 0], sizes = [16, 32], strides = [1, 1]} : vector<48x32xf32> to vector<16x32xf32>
    %400 = vector.extract_strided_slice %399 {offsets = [0, 0], sizes = [16, 8], strides = [1, 1]} : vector<16x32xf32> to vector<16x8xf32>
    %401 = vector.shape_cast %400 : vector<16x8xf32> to vector<2x8x8xf32>
    %402 = vector.extract_strided_slice %399 {offsets = [0, 8], sizes = [16, 8], strides = [1, 1]} : vector<16x32xf32> to vector<16x8xf32>
    %403 = vector.shape_cast %402 : vector<16x8xf32> to vector<2x8x8xf32>
    %404 = vector.extract_strided_slice %399 {offsets = [0, 16], sizes = [16, 8], strides = [1, 1]} : vector<16x32xf32> to vector<16x8xf32>
    %405 = vector.shape_cast %404 : vector<16x8xf32> to vector<2x8x8xf32>
    %406 = vector.extract_strided_slice %399 {offsets = [0, 24], sizes = [16, 8], strides = [1, 1]} : vector<16x32xf32> to vector<16x8xf32>
    %407 = vector.shape_cast %406 : vector<16x8xf32> to vector<2x8x8xf32>
    %408 = tpu.concatenate %401, %403, %405, %407 in 0 : vector<2x8x8xf32>, vector<2x8x8xf32>, vector<2x8x8xf32>, vector<2x8x8xf32> -> vector<8x8x8xf32>
    %409 = vector.extract_strided_slice %388 {offsets = [32, 0], sizes = [16, 32], strides = [1, 1]} : vector<48x32xf32> to vector<16x32xf32>
    %410 = vector.extract_strided_slice %409 {offsets = [0, 0], sizes = [16, 8], strides = [1, 1]} : vector<16x32xf32> to vector<16x8xf32>
    %411 = vector.shape_cast %410 : vector<16x8xf32> to vector<2x8x8xf32>
    %412 = vector.extract_strided_slice %409 {offsets = [0, 8], sizes = [16, 8], strides = [1, 1]} : vector<16x32xf32> to vector<16x8xf32>
    %413 = vector.shape_cast %412 : vector<16x8xf32> to vector<2x8x8xf32>
    %414 = vector.extract_strided_slice %409 {offsets = [0, 16], sizes = [16, 8], strides = [1, 1]} : vector<16x32xf32> to vector<16x8xf32>
    %415 = vector.shape_cast %414 : vector<16x8xf32> to vector<2x8x8xf32>
    %416 = vector.extract_strided_slice %409 {offsets = [0, 24], sizes = [16, 8], strides = [1, 1]} : vector<16x32xf32> to vector<16x8xf32>
    %417 = vector.shape_cast %416 : vector<16x8xf32> to vector<2x8x8xf32>
    %418 = tpu.concatenate %411, %413, %415, %417 in 0 : vector<2x8x8xf32>, vector<2x8x8xf32>, vector<2x8x8xf32>, vector<2x8x8xf32> -> vector<8x8x8xf32>
    %419 = arith.truncf %398 : vector<8x8x8xf32> to vector<8x8x8xbf16>
    %420 = arith.truncf %408 : vector<8x8x8xf32> to vector<8x8x8xbf16>
    "tpu.trace_start"() <{level = 10 : i32, message = "bqd,bkd->bqk"}> : () -> ()
    %cst_158 = arith.constant dense<0.000000e+00> : vector<8x8x8xf32>
    %421 = tpu.matmul %419, %420, %cst_158 {dimension_numbers = #tpu.dot_dimension_numbers<[2], [2], [1], [1], [0, 0, 0, 1, 1, 1], [0], [0]>} : vector<8x8x8xbf16>, vector<8x8x8xbf16>, vector<8x8x8xf32> -> vector<8x8x8xf32>
    "tpu.trace_stop"() : () -> ()
    %cst_159 = arith.constant 0.353553385 : f32
    %422 = vector.broadcast %cst_159 : f32 to vector<8x8x8xf32>
    %423 = arith.mulf %421, %422 : vector<8x8x8xf32>
    %cst_160 = arith.constant dense<0xFF800000> : vector<8x8xf32>
    %424 = vector.multi_reduction <maximumf>, %423, %cst_160 [2] : vector<8x8x8xf32> to vector<8x8xf32>
    %425 = vector.shape_cast %424 : vector<8x8xf32> to vector<8x8x1xf32>
    %426 = vector.broadcast %425 : vector<8x8x1xf32> to vector<8x8x8xf32>
    %427 = arith.subf %423, %426 : vector<8x8x8xf32>
    %428 = math.exp %427 : vector<8x8x8xf32>
    %cst_161 = arith.constant dense<0.000000e+00> : vector<8x8xf32>
    %429 = vector.multi_reduction <add>, %428, %cst_161 [2] : vector<8x8x8xf32> to vector<8x8xf32>
    %430 = vector.shape_cast %429 : vector<8x8xf32> to vector<8x8x1xf32>
    %431 = vector.broadcast %430 : vector<8x8x1xf32> to vector<8x8x8xf32>
    %432 = arith.divf %428, %431 : vector<8x8x8xf32>
    %433 = arith.truncf %432 : vector<8x8x8xf32> to vector<8x8x8xbf16>
    %434 = arith.truncf %418 : vector<8x8x8xf32> to vector<8x8x8xbf16>
    "tpu.trace_start"() <{level = 10 : i32, message = "bqk,bkd->bqd"}> : () -> ()
    %cst_162 = arith.constant dense<0.000000e+00> : vector<8x8x8xf32>
    %435 = tpu.matmul %433, %434, %cst_162 {dimension_numbers = #tpu.dot_dimension_numbers<[2], [1], [1], [2], [0, 0, 0, 1, 1, 2], [0], [0]>} : vector<8x8x8xbf16>, vector<8x8x8xbf16>, vector<8x8x8xf32> -> vector<8x8x8xf32>
    "tpu.trace_stop"() : () -> ()
    %436 = vector.shape_cast %435 : vector<8x8x8xf32> to vector<64x8xf32>
    %cst_163 = arith.constant dense<0.000000e+00> : vector<64x8xf32>
    %437 = tpu.matmul %1, %436, %cst_163 {dimension_numbers = #tpu.dot_dimension_numbers<[1], [0], [0], [1], [0, 0, 1, 1], [], []>} : vector<64x64xf32>, vector<64x8xf32>, vector<64x8xf32> -> vector<64x8xf32>
    %cst_164 = arith.constant 0.000000e+00 : f32
    %438 = vector.broadcast %cst_164 : f32 to vector<16x32xf32>
    %439 = vector.extract_strided_slice %437 {offsets = [0, 0], sizes = [16, 8], strides = [1, 1]} : vector<64x8xf32> to vector<16x8xf32>
    %440 = arith.truncf %439 : vector<16x8xf32> to vector<16x8xbf16>
    %c4 = arith.constant 4 : index
    %c0_165 = arith.constant 0 : index
    %c0_166 = arith.constant 0 : index
    %441 = vector.load %arg10[%c4, %c0_165, %c0_166] : memref<8x8x32xbf16, #tpu.memory_space<vmem>>, vector<1x8x32xbf16>
    %442 = vector.shape_cast %441 : vector<1x8x32xbf16> to vector<8x32xbf16>
    %cst_167 = arith.constant dense<0.000000e+00> : vector<16x32xf32>
    %443 = tpu.matmul %440, %442, %cst_167 {dimension_numbers = #tpu.dot_dimension_numbers<[1], [0], [0], [1], [0, 0, 1, 1], [], []>} : vector<16x8xbf16>, vector<8x32xbf16>, vector<16x32xf32> -> vector<16x32xf32>
    %444 = arith.addf %438, %443 : vector<16x32xf32>
    %445 = vector.extract_strided_slice %437 {offsets = [16, 0], sizes = [16, 8], strides = [1, 1]} : vector<64x8xf32> to vector<16x8xf32>
    %446 = arith.truncf %445 : vector<16x8xf32> to vector<16x8xbf16>
    %c5 = arith.constant 5 : index
    %c0_168 = arith.constant 0 : index
    %c0_169 = arith.constant 0 : index
    %447 = vector.load %arg10[%c5, %c0_168, %c0_169] : memref<8x8x32xbf16, #tpu.memory_space<vmem>>, vector<1x8x32xbf16>
    %448 = vector.shape_cast %447 : vector<1x8x32xbf16> to vector<8x32xbf16>
    %cst_170 = arith.constant dense<0.000000e+00> : vector<16x32xf32>
    %449 = tpu.matmul %446, %448, %cst_170 {dimension_numbers = #tpu.dot_dimension_numbers<[1], [0], [0], [1], [0, 0, 1, 1], [], []>} : vector<16x8xbf16>, vector<8x32xbf16>, vector<16x32xf32> -> vector<16x32xf32>
    %450 = arith.addf %444, %449 : vector<16x32xf32>
    %451 = vector.extract_strided_slice %437 {offsets = [32, 0], sizes = [16, 8], strides = [1, 1]} : vector<64x8xf32> to vector<16x8xf32>
    %452 = arith.truncf %451 : vector<16x8xf32> to vector<16x8xbf16>
    %c6 = arith.constant 6 : index
    %c0_171 = arith.constant 0 : index
    %c0_172 = arith.constant 0 : index
    %453 = vector.load %arg10[%c6, %c0_171, %c0_172] : memref<8x8x32xbf16, #tpu.memory_space<vmem>>, vector<1x8x32xbf16>
    %454 = vector.shape_cast %453 : vector<1x8x32xbf16> to vector<8x32xbf16>
    %cst_173 = arith.constant dense<0.000000e+00> : vector<16x32xf32>
    %455 = tpu.matmul %452, %454, %cst_173 {dimension_numbers = #tpu.dot_dimension_numbers<[1], [0], [0], [1], [0, 0, 1, 1], [], []>} : vector<16x8xbf16>, vector<8x32xbf16>, vector<16x32xf32> -> vector<16x32xf32>
    %456 = arith.addf %450, %455 : vector<16x32xf32>
    %457 = vector.extract_strided_slice %437 {offsets = [48, 0], sizes = [16, 8], strides = [1, 1]} : vector<64x8xf32> to vector<16x8xf32>
    %458 = arith.truncf %457 : vector<16x8xf32> to vector<16x8xbf16>
    %c7 = arith.constant 7 : index
    %c0_174 = arith.constant 0 : index
    %c0_175 = arith.constant 0 : index
    %459 = vector.load %arg10[%c7, %c0_174, %c0_175] : memref<8x8x32xbf16, #tpu.memory_space<vmem>>, vector<1x8x32xbf16>
    %460 = vector.shape_cast %459 : vector<1x8x32xbf16> to vector<8x32xbf16>
    %cst_176 = arith.constant dense<0.000000e+00> : vector<16x32xf32>
    %461 = tpu.matmul %458, %460, %cst_176 {dimension_numbers = #tpu.dot_dimension_numbers<[1], [0], [0], [1], [0, 0, 1, 1], [], []>} : vector<16x8xbf16>, vector<8x32xbf16>, vector<16x32xf32> -> vector<16x32xf32>
    %462 = arith.addf %456, %461 : vector<16x32xf32>
    %463 = arith.addf %353, %462 : vector<16x32xf32>
    %c1_177 = arith.constant 1 : index
    %c0_178 = arith.constant 0 : index
    %c0_179 = arith.constant 0 : index
    %464 = vector.load %arg7[%c1_177, %c0_178, %c0_179] : memref<2x1x32xf32, #tpu.memory_space<vmem>>, vector<1x1x32xf32>
    %465 = vector.shape_cast %464 : vector<1x1x32xf32> to vector<1x32xf32>
    %c1_180 = arith.constant 1 : index
    %c0_181 = arith.constant 0 : index
    %c0_182 = arith.constant 0 : index
    %466 = vector.load %arg8[%c1_180, %c0_181, %c0_182] : memref<2x1x32xf32, #tpu.memory_space<vmem>>, vector<1x1x32xf32>
    %467 = vector.shape_cast %466 : vector<1x1x32xf32> to vector<1x32xf32>
    %cst_183 = arith.constant dense<0.000000e+00> : vector<16xf32>
    %468 = vector.multi_reduction <add>, %463, %cst_183 [1] : vector<16x32xf32> to vector<16xf32>
    %469 = vector.shape_cast %468 : vector<16xf32> to vector<16x1xf32>
    %cst_184 = arith.constant 3.200000e+01 : f32
    %470 = vector.broadcast %cst_184 : f32 to vector<16x1xf32>
    %471 = arith.divf %469, %470 : vector<16x1xf32>
    %472 = vector.broadcast %471 : vector<16x1xf32> to vector<16x32xf32>
    %473 = arith.subf %463, %472 : vector<16x32xf32>
    %474 = arith.mulf %473, %473 : vector<16x32xf32>
    %cst_185 = arith.constant dense<0.000000e+00> : vector<16xf32>
    %475 = vector.multi_reduction <add>, %474, %cst_185 [1] : vector<16x32xf32> to vector<16xf32>
    %476 = vector.shape_cast %475 : vector<16xf32> to vector<16x1xf32>
    %cst_186 = arith.constant 3.200000e+01 : f32
    %477 = vector.broadcast %cst_186 : f32 to vector<16x1xf32>
    %478 = arith.divf %476, %477 : vector<16x1xf32>
    %479 = vector.broadcast %471 : vector<16x1xf32> to vector<16x32xf32>
    %480 = arith.subf %463, %479 : vector<16x32xf32>
    %cst_187 = arith.constant 9.99999974E-6 : f32
    %481 = vector.broadcast %cst_187 : f32 to vector<16x1xf32>
    %482 = arith.addf %478, %481 : vector<16x1xf32>
    %483 = math.rsqrt %482 : vector<16x1xf32>
    %484 = vector.broadcast %483 : vector<16x1xf32> to vector<16x32xf32>
    %485 = arith.mulf %480, %484 : vector<16x32xf32>
    %486 = vector.broadcast %465 : vector<1x32xf32> to vector<16x32xf32>
    %487 = arith.mulf %485, %486 : vector<16x32xf32>
    %488 = vector.broadcast %467 : vector<1x32xf32> to vector<16x32xf32>
    %489 = arith.addf %487, %488 : vector<16x32xf32>
    %c1_188 = arith.constant 1 : index
    %c0_189 = arith.constant 0 : index
    %c0_190 = arith.constant 0 : index
    %490 = vector.load %arg11[%c1_188, %c0_189, %c0_190] : memref<2x32x8xf32, #tpu.memory_space<vmem>>, vector<1x32x8xf32>
    %491 = vector.shape_cast %490 : vector<1x32x8xf32> to vector<32x8xf32>
    %cst_191 = arith.constant dense<0.000000e+00> : vector<16x8xf32>
    %492 = tpu.matmul %489, %491, %cst_191 {dimension_numbers = #tpu.dot_dimension_numbers<[1], [0], [0], [1], [0, 0, 1, 1], [], []>} : vector<16x32xf32>, vector<32x8xf32>, vector<16x8xf32> -> vector<16x8xf32>
    %c1_192 = arith.constant 1 : index
    %c0_193 = arith.constant 0 : index
    %c0_194 = arith.constant 0 : index
    %493 = vector.load %arg12[%c1_192, %c0_193, %c0_194] : memref<2x1x8xf32, #tpu.memory_space<vmem>>, vector<1x1x8xf32>
    %494 = vector.shape_cast %493 : vector<1x1x8xf32> to vector<1x8xf32>
    %495 = vector.broadcast %494 : vector<1x8xf32> to vector<16x8xf32>
    %496 = arith.addf %492, %495 : vector<16x8xf32>
    %497 = vector.extract_strided_slice %496 {offsets = [0, 0], sizes = [16, 4], strides = [1, 1]} : vector<16x8xf32> to vector<16x4xf32>
    %498 = vector.extract_strided_slice %496 {offsets = [0, 4], sizes = [16, 4], strides = [1, 1]} : vector<16x8xf32> to vector<16x4xf32>
    %c1_195 = arith.constant 1 : index
    %c0_196 = arith.constant 0 : index
    %c0_197 = arith.constant 0 : index
    %499 = vector.load %arg2[%c1_195, %c0_196, %c0_197] : memref<2x16x4xf32, #tpu.memory_space<vmem>>, vector<1x16x4xf32>
    %500 = vector.shape_cast %499 : vector<1x16x4xf32> to vector<16x4xf32>
    %cst_198 = arith.constant 0.000000e+00 : f32
    %501 = vector.broadcast %cst_198 : f32 to vector<16x4xf32>
    %502 = arith.maximumf %498, %501 : vector<16x4xf32>
    %503 = math.absf %498 : vector<16x4xf32>
    %cst_199 = arith.constant 0.000000e+00 : f32
    %504 = vector.broadcast %cst_199 : f32 to vector<16x4xf32>
    %505 = arith.subf %504, %503 : vector<16x4xf32>
    %506 = math.exp %505 : vector<16x4xf32>
    %cst_200 = arith.constant 1.000000e+00 : f32
    %507 = vector.broadcast %cst_200 : f32 to vector<16x4xf32>
    %508 = arith.addf %507, %506 : vector<16x4xf32>
    %509 = math.log %508 : vector<16x4xf32>
    %510 = arith.addf %502, %509 : vector<16x4xf32>
    %511 = arith.mulf %500, %510 : vector<16x4xf32>
    %512 = arith.addf %497, %511 : vector<16x4xf32>
    %513 = vector.extract_strided_slice %512 {offsets = [0, 0], sizes = [16, 1], strides = [1, 1]} : vector<16x4xf32> to vector<16x1xf32>
    %514 = vector.broadcast %513 : vector<16x1xf32> to vector<16x4xf32>
    %515 = arith.cmpf ogt, %512, %514 : vector<16x4xf32>
    %516 = vector.broadcast %513 : vector<16x1xf32> to vector<16x4xf32>
    %517 = arith.cmpf oeq, %512, %516 : vector<16x4xf32>
    %c0_i32_201 = arith.constant 0 : i32
    %518 = vector.broadcast %c0_i32_201 : i32 to vector<16x4xi32>
    %519 = arith.cmpi slt, %2, %518 : vector<16x4xi32>
    %520 = arith.andi %517, %519 : vector<16x4xi1>
    %521 = arith.ori %515, %520 : vector<16x4xi1>
    %522 = arith.extui %521 : vector<16x4xi1> to vector<16x4xi32>
    %523 = arith.sitofp %522 : vector<16x4xi32> to vector<16x4xf32>
    %cst_202 = arith.constant dense<0.000000e+00> : vector<16xf32>
    %524 = vector.multi_reduction <add>, %523, %cst_202 [1] : vector<16x4xf32> to vector<16xf32>
    %525 = vector.shape_cast %524 : vector<16xf32> to vector<16x1xf32>
    %cst_203 = arith.constant 2.000000e+00 : f32
    %526 = vector.broadcast %cst_203 : f32 to vector<16x1xf32>
    %527 = arith.cmpf olt, %525, %526 : vector<16x1xf32>
    %528 = arith.extui %527 : vector<16x1xi1> to vector<16x1xi32>
    %529 = arith.sitofp %528 : vector<16x1xi32> to vector<16x1xf32>
    %530 = vector.extract_strided_slice %512 {offsets = [0, 1], sizes = [16, 1], strides = [1, 1]} : vector<16x4xf32> to vector<16x1xf32>
    %531 = vector.broadcast %530 : vector<16x1xf32> to vector<16x4xf32>
    %532 = arith.cmpf ogt, %512, %531 : vector<16x4xf32>
    %533 = vector.broadcast %530 : vector<16x1xf32> to vector<16x4xf32>
    %534 = arith.cmpf oeq, %512, %533 : vector<16x4xf32>
    %c1_i32_204 = arith.constant 1 : i32
    %535 = vector.broadcast %c1_i32_204 : i32 to vector<16x4xi32>
    %536 = arith.cmpi slt, %2, %535 : vector<16x4xi32>
    %537 = arith.andi %534, %536 : vector<16x4xi1>
    %538 = arith.ori %532, %537 : vector<16x4xi1>
    %539 = arith.extui %538 : vector<16x4xi1> to vector<16x4xi32>
    %540 = arith.sitofp %539 : vector<16x4xi32> to vector<16x4xf32>
    %cst_205 = arith.constant dense<0.000000e+00> : vector<16xf32>
    %541 = vector.multi_reduction <add>, %540, %cst_205 [1] : vector<16x4xf32> to vector<16xf32>
    %542 = vector.shape_cast %541 : vector<16xf32> to vector<16x1xf32>
    %cst_206 = arith.constant 2.000000e+00 : f32
    %543 = vector.broadcast %cst_206 : f32 to vector<16x1xf32>
    %544 = arith.cmpf olt, %542, %543 : vector<16x1xf32>
    %545 = arith.extui %544 : vector<16x1xi1> to vector<16x1xi32>
    %546 = arith.sitofp %545 : vector<16x1xi32> to vector<16x1xf32>
    %547 = vector.extract_strided_slice %512 {offsets = [0, 2], sizes = [16, 1], strides = [1, 1]} : vector<16x4xf32> to vector<16x1xf32>
    %548 = vector.broadcast %547 : vector<16x1xf32> to vector<16x4xf32>
    %549 = arith.cmpf ogt, %512, %548 : vector<16x4xf32>
    %550 = vector.broadcast %547 : vector<16x1xf32> to vector<16x4xf32>
    %551 = arith.cmpf oeq, %512, %550 : vector<16x4xf32>
    %c2_i32_207 = arith.constant 2 : i32
    %552 = vector.broadcast %c2_i32_207 : i32 to vector<16x4xi32>
    %553 = arith.cmpi slt, %2, %552 : vector<16x4xi32>
    %554 = arith.andi %551, %553 : vector<16x4xi1>
    %555 = arith.ori %549, %554 : vector<16x4xi1>
    %556 = arith.extui %555 : vector<16x4xi1> to vector<16x4xi32>
    %557 = arith.sitofp %556 : vector<16x4xi32> to vector<16x4xf32>
    %cst_208 = arith.constant dense<0.000000e+00> : vector<16xf32>
    %558 = vector.multi_reduction <add>, %557, %cst_208 [1] : vector<16x4xf32> to vector<16xf32>
    %559 = vector.shape_cast %558 : vector<16xf32> to vector<16x1xf32>
    %cst_209 = arith.constant 2.000000e+00 : f32
    %560 = vector.broadcast %cst_209 : f32 to vector<16x1xf32>
    %561 = arith.cmpf olt, %559, %560 : vector<16x1xf32>
    %562 = arith.extui %561 : vector<16x1xi1> to vector<16x1xi32>
    %563 = arith.sitofp %562 : vector<16x1xi32> to vector<16x1xf32>
    %564 = vector.extract_strided_slice %512 {offsets = [0, 3], sizes = [16, 1], strides = [1, 1]} : vector<16x4xf32> to vector<16x1xf32>
    %565 = vector.broadcast %564 : vector<16x1xf32> to vector<16x4xf32>
    %566 = arith.cmpf ogt, %512, %565 : vector<16x4xf32>
    %567 = vector.broadcast %564 : vector<16x1xf32> to vector<16x4xf32>
    %568 = arith.cmpf oeq, %512, %567 : vector<16x4xf32>
    %c3_i32_210 = arith.constant 3 : i32
    %569 = vector.broadcast %c3_i32_210 : i32 to vector<16x4xi32>
    %570 = arith.cmpi slt, %2, %569 : vector<16x4xi32>
    %571 = arith.andi %568, %570 : vector<16x4xi1>
    %572 = arith.ori %566, %571 : vector<16x4xi1>
    %573 = arith.extui %572 : vector<16x4xi1> to vector<16x4xi32>
    %574 = arith.sitofp %573 : vector<16x4xi32> to vector<16x4xf32>
    %cst_211 = arith.constant dense<0.000000e+00> : vector<16xf32>
    %575 = vector.multi_reduction <add>, %574, %cst_211 [1] : vector<16x4xf32> to vector<16xf32>
    %576 = vector.shape_cast %575 : vector<16xf32> to vector<16x1xf32>
    %cst_212 = arith.constant 2.000000e+00 : f32
    %577 = vector.broadcast %cst_212 : f32 to vector<16x1xf32>
    %578 = arith.cmpf olt, %576, %577 : vector<16x1xf32>
    %579 = arith.extui %578 : vector<16x1xi1> to vector<16x1xi32>
    %580 = arith.sitofp %579 : vector<16x1xi32> to vector<16x1xf32>
    %581 = tpu.concatenate %529, %546, %563, %580 in 1 : vector<16x1xf32>, vector<16x1xf32>, vector<16x1xf32>, vector<16x1xf32> -> vector<16x4xf32>
    %cst_213 = arith.constant 0.000000e+00 : f32
    %582 = vector.broadcast %cst_213 : f32 to vector<16x4xf32>
    %583 = arith.cmpf ogt, %581, %582 : vector<16x4xf32>
    %cst_214 = arith.constant -1.000000e+30 : f32
    %584 = vector.broadcast %cst_214 : f32 to vector<16x4xf32>
    %585 = arith.select %583, %512, %584 : vector<16x4xi1>, vector<16x4xf32>
    %cst_215 = arith.constant dense<0xFF800000> : vector<16xf32>
    %586 = vector.multi_reduction <maximumf>, %585, %cst_215 [1] : vector<16x4xf32> to vector<16xf32>
    %587 = vector.shape_cast %586 : vector<16xf32> to vector<16x1xf32>
    %588 = vector.broadcast %587 : vector<16x1xf32> to vector<16x4xf32>
    %589 = arith.subf %585, %588 : vector<16x4xf32>
    %590 = math.exp %589 : vector<16x4xf32>
    %cst_216 = arith.constant dense<0.000000e+00> : vector<16xf32>
    %591 = vector.multi_reduction <add>, %590, %cst_216 [1] : vector<16x4xf32> to vector<16xf32>
    %592 = vector.shape_cast %591 : vector<16xf32> to vector<16x1xf32>
    %593 = vector.broadcast %592 : vector<16x1xf32> to vector<16x4xf32>
    %594 = arith.divf %590, %593 : vector<16x4xf32>
    %cst_217 = arith.constant 0.000000e+00 : f32
    %595 = vector.broadcast %cst_217 : f32 to vector<1x4xf32>
    %596 = vector.extract_strided_slice %581 {offsets = [0, 0], sizes = [15, 4], strides = [1, 1]} : vector<16x4xf32> to vector<15x4xf32>
    %597 = tpu.concatenate %595, %596 in 0 : vector<1x4xf32>, vector<15x4xf32> -> vector<16x4xf32>
    %598 = arith.addf %581, %597 : vector<16x4xf32>
    %cst_218 = arith.constant 0.000000e+00 : f32
    %599 = vector.broadcast %cst_218 : f32 to vector<2x4xf32>
    %600 = vector.extract_strided_slice %598 {offsets = [0, 0], sizes = [14, 4], strides = [1, 1]} : vector<16x4xf32> to vector<14x4xf32>
    %601 = tpu.concatenate %599, %600 in 0 : vector<2x4xf32>, vector<14x4xf32> -> vector<16x4xf32>
    %602 = arith.addf %598, %601 : vector<16x4xf32>
    %cst_219 = arith.constant 0.000000e+00 : f32
    %603 = vector.broadcast %cst_219 : f32 to vector<4x4xf32>
    %604 = vector.extract_strided_slice %602 {offsets = [0, 0], sizes = [12, 4], strides = [1, 1]} : vector<16x4xf32> to vector<12x4xf32>
    %605 = tpu.concatenate %603, %604 in 0 : vector<4x4xf32>, vector<12x4xf32> -> vector<16x4xf32>
    %606 = arith.addf %602, %605 : vector<16x4xf32>
    %cst_220 = arith.constant 0.000000e+00 : f32
    %607 = vector.broadcast %cst_220 : f32 to vector<8x4xf32>
    %608 = vector.extract_strided_slice %606 {offsets = [0, 0], sizes = [8, 4], strides = [1, 1]} : vector<16x4xf32> to vector<8x4xf32>
    %609 = tpu.concatenate %607, %608 in 0 : vector<8x4xf32>, vector<8x4xf32> -> vector<16x4xf32>
    %610 = arith.addf %606, %609 : vector<16x4xf32>
    %cst_221 = arith.constant 8.000000e+00 : f32
    %611 = vector.broadcast %cst_221 : f32 to vector<16x4xf32>
    %612 = arith.cmpf ole, %610, %611 : vector<16x4xf32>
    %613 = arith.extui %612 : vector<16x4xi1> to vector<16x4xi32>
    %614 = arith.sitofp %613 : vector<16x4xi32> to vector<16x4xf32>
    %615 = arith.mulf %614, %581 : vector<16x4xf32>
    %616 = arith.mulf %594, %615 : vector<16x4xf32>
    %617 = arith.truncf %489 : vector<16x32xf32> to vector<16x32xbf16>
    %cst_222 = arith.constant 0.000000e+00 : f32
    %618 = vector.broadcast %cst_222 : f32 to vector<16x32xf32>
    %c4_223 = arith.constant 4 : index
    %c0_224 = arith.constant 0 : index
    %c0_225 = arith.constant 0 : index
    %619 = vector.load %arg13[%c4_223, %c0_224, %c0_225] : memref<8x32x128xbf16, #tpu.memory_space<vmem>>, vector<1x32x128xbf16>
    %620 = vector.shape_cast %619 : vector<1x32x128xbf16> to vector<32x128xbf16>
    %cst_226 = arith.constant dense<0.000000e+00> : vector<16x128xf32>
    %621 = tpu.matmul %617, %620, %cst_226 {dimension_numbers = #tpu.dot_dimension_numbers<[1], [0], [0], [1], [0, 0, 1, 1], [], []>} : vector<16x32xbf16>, vector<32x128xbf16>, vector<16x128xf32> -> vector<16x128xf32>
    %c4_227 = arith.constant 4 : index
    %c0_228 = arith.constant 0 : index
    %c0_229 = arith.constant 0 : index
    %622 = vector.load %arg14[%c4_227, %c0_228, %c0_229] : memref<8x1x128xf32, #tpu.memory_space<vmem>>, vector<1x1x128xf32>
    %623 = vector.shape_cast %622 : vector<1x1x128xf32> to vector<1x128xf32>
    %624 = vector.broadcast %623 : vector<1x128xf32> to vector<16x128xf32>
    %625 = arith.addf %621, %624 : vector<16x128xf32>
    %cst_230 = arith.constant 0.000000e+00 : f32
    %626 = vector.broadcast %cst_230 : f32 to vector<16x128xf32>
    %627 = arith.maximumf %625, %626 : vector<16x128xf32>
    %628 = arith.truncf %627 : vector<16x128xf32> to vector<16x128xbf16>
    %c4_231 = arith.constant 4 : index
    %c0_232 = arith.constant 0 : index
    %c0_233 = arith.constant 0 : index
    %629 = vector.load %arg15[%c4_231, %c0_232, %c0_233] : memref<8x128x32xbf16, #tpu.memory_space<vmem>>, vector<1x128x32xbf16>
    %630 = vector.shape_cast %629 : vector<1x128x32xbf16> to vector<128x32xbf16>
    %cst_234 = arith.constant dense<0.000000e+00> : vector<16x32xf32>
    %631 = tpu.matmul %628, %630, %cst_234 {dimension_numbers = #tpu.dot_dimension_numbers<[1], [0], [0], [1], [0, 0, 1, 1], [], []>} : vector<16x128xbf16>, vector<128x32xbf16>, vector<16x32xf32> -> vector<16x32xf32>
    %c4_235 = arith.constant 4 : index
    %c0_236 = arith.constant 0 : index
    %c0_237 = arith.constant 0 : index
    %632 = vector.load %arg16[%c4_235, %c0_236, %c0_237] : memref<8x1x32xf32, #tpu.memory_space<vmem>>, vector<1x1x32xf32>
    %633 = vector.shape_cast %632 : vector<1x1x32xf32> to vector<1x32xf32>
    %634 = vector.broadcast %633 : vector<1x32xf32> to vector<16x32xf32>
    %635 = arith.addf %631, %634 : vector<16x32xf32>
    %636 = vector.extract_strided_slice %616 {offsets = [0, 0], sizes = [16, 1], strides = [1, 1]} : vector<16x4xf32> to vector<16x1xf32>
    %637 = vector.broadcast %636 : vector<16x1xf32> to vector<16x32xf32>
    %638 = arith.mulf %635, %637 : vector<16x32xf32>
    %639 = arith.addf %618, %638 : vector<16x32xf32>
    %c5_238 = arith.constant 5 : index
    %c0_239 = arith.constant 0 : index
    %c0_240 = arith.constant 0 : index
    %640 = vector.load %arg13[%c5_238, %c0_239, %c0_240] : memref<8x32x128xbf16, #tpu.memory_space<vmem>>, vector<1x32x128xbf16>
    %641 = vector.shape_cast %640 : vector<1x32x128xbf16> to vector<32x128xbf16>
    %cst_241 = arith.constant dense<0.000000e+00> : vector<16x128xf32>
    %642 = tpu.matmul %617, %641, %cst_241 {dimension_numbers = #tpu.dot_dimension_numbers<[1], [0], [0], [1], [0, 0, 1, 1], [], []>} : vector<16x32xbf16>, vector<32x128xbf16>, vector<16x128xf32> -> vector<16x128xf32>
    %c5_242 = arith.constant 5 : index
    %c0_243 = arith.constant 0 : index
    %c0_244 = arith.constant 0 : index
    %643 = vector.load %arg14[%c5_242, %c0_243, %c0_244] : memref<8x1x128xf32, #tpu.memory_space<vmem>>, vector<1x1x128xf32>
    %644 = vector.shape_cast %643 : vector<1x1x128xf32> to vector<1x128xf32>
    %645 = vector.broadcast %644 : vector<1x128xf32> to vector<16x128xf32>
    %646 = arith.addf %642, %645 : vector<16x128xf32>
    %cst_245 = arith.constant 0.000000e+00 : f32
    %647 = vector.broadcast %cst_245 : f32 to vector<16x128xf32>
    %648 = arith.maximumf %646, %647 : vector<16x128xf32>
    %649 = arith.truncf %648 : vector<16x128xf32> to vector<16x128xbf16>
    %c5_246 = arith.constant 5 : index
    %c0_247 = arith.constant 0 : index
    %c0_248 = arith.constant 0 : index
    %650 = vector.load %arg15[%c5_246, %c0_247, %c0_248] : memref<8x128x32xbf16, #tpu.memory_space<vmem>>, vector<1x128x32xbf16>
    %651 = vector.shape_cast %650 : vector<1x128x32xbf16> to vector<128x32xbf16>
    %cst_249 = arith.constant dense<0.000000e+00> : vector<16x32xf32>
    %652 = tpu.matmul %649, %651, %cst_249 {dimension_numbers = #tpu.dot_dimension_numbers<[1], [0], [0], [1], [0, 0, 1, 1], [], []>} : vector<16x128xbf16>, vector<128x32xbf16>, vector<16x32xf32> -> vector<16x32xf32>
    %c5_250 = arith.constant 5 : index
    %c0_251 = arith.constant 0 : index
    %c0_252 = arith.constant 0 : index
    %653 = vector.load %arg16[%c5_250, %c0_251, %c0_252] : memref<8x1x32xf32, #tpu.memory_space<vmem>>, vector<1x1x32xf32>
    %654 = vector.shape_cast %653 : vector<1x1x32xf32> to vector<1x32xf32>
    %655 = vector.broadcast %654 : vector<1x32xf32> to vector<16x32xf32>
    %656 = arith.addf %652, %655 : vector<16x32xf32>
    %657 = vector.extract_strided_slice %616 {offsets = [0, 1], sizes = [16, 1], strides = [1, 1]} : vector<16x4xf32> to vector<16x1xf32>
    %658 = vector.broadcast %657 : vector<16x1xf32> to vector<16x32xf32>
    %659 = arith.mulf %656, %658 : vector<16x32xf32>
    %660 = arith.addf %639, %659 : vector<16x32xf32>
    %c6_253 = arith.constant 6 : index
    %c0_254 = arith.constant 0 : index
    %c0_255 = arith.constant 0 : index
    %661 = vector.load %arg13[%c6_253, %c0_254, %c0_255] : memref<8x32x128xbf16, #tpu.memory_space<vmem>>, vector<1x32x128xbf16>
    %662 = vector.shape_cast %661 : vector<1x32x128xbf16> to vector<32x128xbf16>
    %cst_256 = arith.constant dense<0.000000e+00> : vector<16x128xf32>
    %663 = tpu.matmul %617, %662, %cst_256 {dimension_numbers = #tpu.dot_dimension_numbers<[1], [0], [0], [1], [0, 0, 1, 1], [], []>} : vector<16x32xbf16>, vector<32x128xbf16>, vector<16x128xf32> -> vector<16x128xf32>
    %c6_257 = arith.constant 6 : index
    %c0_258 = arith.constant 0 : index
    %c0_259 = arith.constant 0 : index
    %664 = vector.load %arg14[%c6_257, %c0_258, %c0_259] : memref<8x1x128xf32, #tpu.memory_space<vmem>>, vector<1x1x128xf32>
    %665 = vector.shape_cast %664 : vector<1x1x128xf32> to vector<1x128xf32>
    %666 = vector.broadcast %665 : vector<1x128xf32> to vector<16x128xf32>
    %667 = arith.addf %663, %666 : vector<16x128xf32>
    %cst_260 = arith.constant 0.000000e+00 : f32
    %668 = vector.broadcast %cst_260 : f32 to vector<16x128xf32>
    %669 = arith.maximumf %667, %668 : vector<16x128xf32>
    %670 = arith.truncf %669 : vector<16x128xf32> to vector<16x128xbf16>
    %c6_261 = arith.constant 6 : index
    %c0_262 = arith.constant 0 : index
    %c0_263 = arith.constant 0 : index
    %671 = vector.load %arg15[%c6_261, %c0_262, %c0_263] : memref<8x128x32xbf16, #tpu.memory_space<vmem>>, vector<1x128x32xbf16>
    %672 = vector.shape_cast %671 : vector<1x128x32xbf16> to vector<128x32xbf16>
    %cst_264 = arith.constant dense<0.000000e+00> : vector<16x32xf32>
    %673 = tpu.matmul %670, %672, %cst_264 {dimension_numbers = #tpu.dot_dimension_numbers<[1], [0], [0], [1], [0, 0, 1, 1], [], []>} : vector<16x128xbf16>, vector<128x32xbf16>, vector<16x32xf32> -> vector<16x32xf32>
    %c6_265 = arith.constant 6 : index
    %c0_266 = arith.constant 0 : index
    %c0_267 = arith.constant 0 : index
    %674 = vector.load %arg16[%c6_265, %c0_266, %c0_267] : memref<8x1x32xf32, #tpu.memory_space<vmem>>, vector<1x1x32xf32>
    %675 = vector.shape_cast %674 : vector<1x1x32xf32> to vector<1x32xf32>
    %676 = vector.broadcast %675 : vector<1x32xf32> to vector<16x32xf32>
    %677 = arith.addf %673, %676 : vector<16x32xf32>
    %678 = vector.extract_strided_slice %616 {offsets = [0, 2], sizes = [16, 1], strides = [1, 1]} : vector<16x4xf32> to vector<16x1xf32>
    %679 = vector.broadcast %678 : vector<16x1xf32> to vector<16x32xf32>
    %680 = arith.mulf %677, %679 : vector<16x32xf32>
    %681 = arith.addf %660, %680 : vector<16x32xf32>
    %c7_268 = arith.constant 7 : index
    %c0_269 = arith.constant 0 : index
    %c0_270 = arith.constant 0 : index
    %682 = vector.load %arg13[%c7_268, %c0_269, %c0_270] : memref<8x32x128xbf16, #tpu.memory_space<vmem>>, vector<1x32x128xbf16>
    %683 = vector.shape_cast %682 : vector<1x32x128xbf16> to vector<32x128xbf16>
    %cst_271 = arith.constant dense<0.000000e+00> : vector<16x128xf32>
    %684 = tpu.matmul %617, %683, %cst_271 {dimension_numbers = #tpu.dot_dimension_numbers<[1], [0], [0], [1], [0, 0, 1, 1], [], []>} : vector<16x32xbf16>, vector<32x128xbf16>, vector<16x128xf32> -> vector<16x128xf32>
    %c7_272 = arith.constant 7 : index
    %c0_273 = arith.constant 0 : index
    %c0_274 = arith.constant 0 : index
    %685 = vector.load %arg14[%c7_272, %c0_273, %c0_274] : memref<8x1x128xf32, #tpu.memory_space<vmem>>, vector<1x1x128xf32>
    %686 = vector.shape_cast %685 : vector<1x1x128xf32> to vector<1x128xf32>
    %687 = vector.broadcast %686 : vector<1x128xf32> to vector<16x128xf32>
    %688 = arith.addf %684, %687 : vector<16x128xf32>
    %cst_275 = arith.constant 0.000000e+00 : f32
    %689 = vector.broadcast %cst_275 : f32 to vector<16x128xf32>
    %690 = arith.maximumf %688, %689 : vector<16x128xf32>
    %691 = arith.truncf %690 : vector<16x128xf32> to vector<16x128xbf16>
    %c7_276 = arith.constant 7 : index
    %c0_277 = arith.constant 0 : index
    %c0_278 = arith.constant 0 : index
    %692 = vector.load %arg15[%c7_276, %c0_277, %c0_278] : memref<8x128x32xbf16, #tpu.memory_space<vmem>>, vector<1x128x32xbf16>
    %693 = vector.shape_cast %692 : vector<1x128x32xbf16> to vector<128x32xbf16>
    %cst_279 = arith.constant dense<0.000000e+00> : vector<16x32xf32>
    %694 = tpu.matmul %691, %693, %cst_279 {dimension_numbers = #tpu.dot_dimension_numbers<[1], [0], [0], [1], [0, 0, 1, 1], [], []>} : vector<16x128xbf16>, vector<128x32xbf16>, vector<16x32xf32> -> vector<16x32xf32>
    %c7_280 = arith.constant 7 : index
    %c0_281 = arith.constant 0 : index
    %c0_282 = arith.constant 0 : index
    %695 = vector.load %arg16[%c7_280, %c0_281, %c0_282] : memref<8x1x32xf32, #tpu.memory_space<vmem>>, vector<1x1x32xf32>
    %696 = vector.shape_cast %695 : vector<1x1x32xf32> to vector<1x32xf32>
    %697 = vector.broadcast %696 : vector<1x32xf32> to vector<16x32xf32>
    %698 = arith.addf %694, %697 : vector<16x32xf32>
    %699 = vector.extract_strided_slice %616 {offsets = [0, 3], sizes = [16, 1], strides = [1, 1]} : vector<16x4xf32> to vector<16x1xf32>
    %700 = vector.broadcast %699 : vector<16x1xf32> to vector<16x32xf32>
    %701 = arith.mulf %698, %700 : vector<16x32xf32>
    %702 = arith.addf %681, %701 : vector<16x32xf32>
    %703 = arith.addf %463, %702 : vector<16x32xf32>
    %c0_283 = arith.constant 0 : index
    %c0_284 = arith.constant 0 : index
    %704 = vector.load %arg17[%c0_283, %c0_284] : memref<1x32xf32, #tpu.memory_space<vmem>>, vector<1x32xf32>
    %c0_285 = arith.constant 0 : index
    %c0_286 = arith.constant 0 : index
    %705 = vector.load %arg18[%c0_285, %c0_286] : memref<1x32xf32, #tpu.memory_space<vmem>>, vector<1x32xf32>
    %cst_287 = arith.constant dense<0.000000e+00> : vector<16xf32>
    %706 = vector.multi_reduction <add>, %703, %cst_287 [1] : vector<16x32xf32> to vector<16xf32>
    %707 = vector.shape_cast %706 : vector<16xf32> to vector<16x1xf32>
    %cst_288 = arith.constant 3.200000e+01 : f32
    %708 = vector.broadcast %cst_288 : f32 to vector<16x1xf32>
    %709 = arith.divf %707, %708 : vector<16x1xf32>
    %710 = vector.broadcast %709 : vector<16x1xf32> to vector<16x32xf32>
    %711 = arith.subf %703, %710 : vector<16x32xf32>
    %712 = arith.mulf %711, %711 : vector<16x32xf32>
    %cst_289 = arith.constant dense<0.000000e+00> : vector<16xf32>
    %713 = vector.multi_reduction <add>, %712, %cst_289 [1] : vector<16x32xf32> to vector<16xf32>
    %714 = vector.shape_cast %713 : vector<16xf32> to vector<16x1xf32>
    %cst_290 = arith.constant 3.200000e+01 : f32
    %715 = vector.broadcast %cst_290 : f32 to vector<16x1xf32>
    %716 = arith.divf %714, %715 : vector<16x1xf32>
    %717 = vector.broadcast %709 : vector<16x1xf32> to vector<16x32xf32>
    %718 = arith.subf %703, %717 : vector<16x32xf32>
    %cst_291 = arith.constant 9.99999974E-6 : f32
    %719 = vector.broadcast %cst_291 : f32 to vector<16x1xf32>
    %720 = arith.addf %716, %719 : vector<16x1xf32>
    %721 = math.rsqrt %720 : vector<16x1xf32>
    %722 = vector.broadcast %721 : vector<16x1xf32> to vector<16x32xf32>
    %723 = arith.mulf %718, %722 : vector<16x32xf32>
    %724 = vector.broadcast %704 : vector<1x32xf32> to vector<16x32xf32>
    %725 = arith.mulf %723, %724 : vector<16x32xf32>
    %726 = vector.broadcast %705 : vector<1x32xf32> to vector<16x32xf32>
    %727 = arith.addf %725, %726 : vector<16x32xf32>
    %728 = vector.extract_strided_slice %727 {offsets = [0, 0], sizes = [8, 32], strides = [1, 1]} : vector<16x32xf32> to vector<8x32xf32>
    %cst_292 = arith.constant dense<0.000000e+00> : vector<32xf32>
    %729 = vector.multi_reduction <add>, %728, %cst_292 [0] : vector<8x32xf32> to vector<32xf32>
    %730 = vector.shape_cast %729 : vector<32xf32> to vector<1x32xf32>
    %cst_293 = arith.constant 8.000000e+00 : f32
    %731 = vector.broadcast %cst_293 : f32 to vector<1x32xf32>
    %732 = arith.divf %730, %731 : vector<1x32xf32>
    %733 = vector.extract_strided_slice %727 {offsets = [8, 0], sizes = [8, 32], strides = [1, 1]} : vector<16x32xf32> to vector<8x32xf32>
    %cst_294 = arith.constant dense<0.000000e+00> : vector<32xf32>
    %734 = vector.multi_reduction <add>, %733, %cst_294 [0] : vector<8x32xf32> to vector<32xf32>
    %735 = vector.shape_cast %734 : vector<32xf32> to vector<1x32xf32>
    %cst_295 = arith.constant 8.000000e+00 : f32
    %736 = vector.broadcast %cst_295 : f32 to vector<1x32xf32>
    %737 = arith.divf %735, %736 : vector<1x32xf32>
    %738 = tpu.concatenate %732, %737 in 0 : vector<1x32xf32>, vector<1x32xf32> -> vector<2x32xf32>
    %c0_296 = arith.constant 0 : index
    %c0_297 = arith.constant 0 : index
    %739 = vector.load %arg23[%c0_296, %c0_297] : memref<32x1xf32, #tpu.memory_space<vmem>>, vector<32x1xf32>
    %cst_298 = arith.constant dense<0.000000e+00> : vector<2x1xf32>
    %740 = tpu.matmul %738, %739, %cst_298 {dimension_numbers = #tpu.dot_dimension_numbers<[1], [0], [0], [1], [0, 0, 1, 1], [], []>} : vector<2x32xf32>, vector<32x1xf32>, vector<2x1xf32> -> vector<2x1xf32>
    %c0_299 = arith.constant 0 : index
    %c0_300 = arith.constant 0 : index
    %741 = vector.load %arg24[%c0_299, %c0_300] : memref<1x1xf32, #tpu.memory_space<vmem>>, vector<1x1xf32>
    %742 = vector.broadcast %741 : vector<1x1xf32> to vector<2x1xf32>
    %743 = arith.addf %740, %742 : vector<2x1xf32>
    %c0_301 = arith.constant 0 : index
    %c0_302 = arith.constant 0 : index
    %744 = vector.load %arg19[%c0_301, %c0_302] : memref<32x32xf32, #tpu.memory_space<vmem>>, vector<32x32xf32>
    %cst_303 = arith.constant dense<0.000000e+00> : vector<2x32xf32>
    %745 = tpu.matmul %738, %744, %cst_303 {dimension_numbers = #tpu.dot_dimension_numbers<[1], [0], [0], [1], [0, 0, 1, 1], [], []>} : vector<2x32xf32>, vector<32x32xf32>, vector<2x32xf32> -> vector<2x32xf32>
    %c0_304 = arith.constant 0 : index
    %c0_305 = arith.constant 0 : index
    %746 = vector.load %arg20[%c0_304, %c0_305] : memref<1x32xf32, #tpu.memory_space<vmem>>, vector<1x32xf32>
    %747 = vector.broadcast %746 : vector<1x32xf32> to vector<2x32xf32>
    %748 = arith.addf %745, %747 : vector<2x32xf32>
    %cst_306 = arith.constant 0.000000e+00 : f32
    %749 = vector.broadcast %cst_306 : f32 to vector<2x32xf32>
    %750 = arith.maximumf %748, %749 : vector<2x32xf32>
    %c0_307 = arith.constant 0 : index
    %c0_308 = arith.constant 0 : index
    %751 = vector.load %arg21[%c0_307, %c0_308] : memref<32x1xf32, #tpu.memory_space<vmem>>, vector<32x1xf32>
    %cst_309 = arith.constant dense<0.000000e+00> : vector<2x1xf32>
    %752 = tpu.matmul %750, %751, %cst_309 {dimension_numbers = #tpu.dot_dimension_numbers<[1], [0], [0], [1], [0, 0, 1, 1], [], []>} : vector<2x32xf32>, vector<32x1xf32>, vector<2x1xf32> -> vector<2x1xf32>
    %c0_310 = arith.constant 0 : index
    %c0_311 = arith.constant 0 : index
    %753 = vector.load %arg22[%c0_310, %c0_311] : memref<1x1xf32, #tpu.memory_space<vmem>>, vector<1x1xf32>
    %754 = vector.broadcast %753 : vector<1x1xf32> to vector<2x1xf32>
    %755 = arith.addf %752, %754 : vector<2x1xf32>
    %756 = tpu.concatenate %743, %755 in 1 : vector<2x1xf32>, vector<2x1xf32> -> vector<2x2xf32>
    %c0_312 = arith.constant 0 : index
    %c0_313 = arith.constant 0 : index
    %757 = vector.load %arg25[%c0_312, %c0_313] : memref<2x2xf32, #tpu.memory_space<vmem>>, vector<2x2xf32>
    tpu.vector_store %arg25[%c0_312, %c0_313], %756 {strides = array<i32>} : memref<2x2xf32, #tpu.memory_space<vmem>>, vector<2x2xf32>,
    return
  }
  func.func @transform_0(%arg0: i32) -> (i32, i32) {
    %c0_i32 = arith.constant 0 : i32
    %c0_i32_0 = arith.constant 0 : i32
    %c0_i32_1 = arith.constant 0 : i32
    return %c0_i32, %c0_i32_0 : i32, i32
  }
  func.func @transform_1(%arg0: i32) -> (i32, i32, i32) {
    %c0_i32 = arith.constant 0 : i32
    %c0_i32_0 = arith.constant 0 : i32
    %c0_i32_1 = arith.constant 0 : i32
    %c0_i32_2 = arith.constant 0 : i32
    return %c0_i32, %c0_i32_0, %c0_i32_1 : i32, i32, i32
  }
  func.func @transform_2(%arg0: i32) -> (i32, i32) {
    %c0_i32 = arith.constant 0 : i32
    %c0_i32_0 = arith.constant 0 : i32
    %c0_i32_1 = arith.constant 0 : i32
    return %c0_i32, %c0_i32_0 : i32, i32
  }
  func.func @transform_3(%arg0: i32) -> (i32, i32) {
    %c0_i32 = arith.constant 0 : i32
    %c0_i32_0 = arith.constant 0 : i32
    %c0_i32_1 = arith.constant 0 : i32
    return %c0_i32, %c0_i32_0 : i32, i32
  }
  func.func @transform_4(%arg0: i32) -> (i32, i32, i32) {
    %c0_i32 = arith.constant 0 : i32
    %c0_i32_0 = arith.constant 0 : i32
    %c0_i32_1 = arith.constant 0 : i32
    %c0_i32_2 = arith.constant 0 : i32
    return %c0_i32, %c0_i32_0, %c0_i32_1 : i32, i32, i32
  }
  func.func @transform_5(%arg0: i32) -> (i32, i32, i32) {
    %c0_i32 = arith.constant 0 : i32
    %c0_i32_0 = arith.constant 0 : i32
    %c0_i32_1 = arith.constant 0 : i32
    %c0_i32_2 = arith.constant 0 : i32
    return %c0_i32, %c0_i32_0, %c0_i32_1 : i32, i32, i32
  }
  func.func @transform_6(%arg0: i32) -> (i32, i32, i32) {
    %c0_i32 = arith.constant 0 : i32
    %c0_i32_0 = arith.constant 0 : i32
    %c0_i32_1 = arith.constant 0 : i32
    %c0_i32_2 = arith.constant 0 : i32
    return %c0_i32, %c0_i32_0, %c0_i32_1 : i32, i32, i32
  }
  func.func @transform_7(%arg0: i32) -> (i32, i32, i32) {
    %c0_i32 = arith.constant 0 : i32
    %c0_i32_0 = arith.constant 0 : i32
    %c0_i32_1 = arith.constant 0 : i32
    %c0_i32_2 = arith.constant 0 : i32
    return %c0_i32, %c0_i32_0, %c0_i32_1 : i32, i32, i32
  }
  func.func @transform_8(%arg0: i32) -> (i32, i32, i32) {
    %c0_i32 = arith.constant 0 : i32
    %c0_i32_0 = arith.constant 0 : i32
    %c0_i32_1 = arith.constant 0 : i32
    %c0_i32_2 = arith.constant 0 : i32
    return %c0_i32, %c0_i32_0, %c0_i32_1 : i32, i32, i32
  }
  func.func @transform_9(%arg0: i32) -> (i32, i32, i32) {
    %c0_i32 = arith.constant 0 : i32
    %c0_i32_0 = arith.constant 0 : i32
    %c0_i32_1 = arith.constant 0 : i32
    %c0_i32_2 = arith.constant 0 : i32
    return %c0_i32, %c0_i32_0, %c0_i32_1 : i32, i32, i32
  }
  func.func @transform_10(%arg0: i32) -> (i32, i32, i32) {
    %c0_i32 = arith.constant 0 : i32
    %c0_i32_0 = arith.constant 0 : i32
    %c0_i32_1 = arith.constant 0 : i32
    %c0_i32_2 = arith.constant 0 : i32
    return %c0_i32, %c0_i32_0, %c0_i32_1 : i32, i32, i32
  }
  func.func @transform_11(%arg0: i32) -> (i32, i32, i32) {
    %c0_i32 = arith.constant 0 : i32
    %c0_i32_0 = arith.constant 0 : i32
    %c0_i32_1 = arith.constant 0 : i32
    %c0_i32_2 = arith.constant 0 : i32
    return %c0_i32, %c0_i32_0, %c0_i32_1 : i32, i32, i32
  }
  func.func @transform_12(%arg0: i32) -> (i32, i32, i32) {
    %c0_i32 = arith.constant 0 : i32
    %c0_i32_0 = arith.constant 0 : i32
    %c0_i32_1 = arith.constant 0 : i32
    %c0_i32_2 = arith.constant 0 : i32
    return %c0_i32, %c0_i32_0, %c0_i32_1 : i32, i32, i32
  }
  func.func @transform_13(%arg0: i32) -> (i32, i32, i32) {
    %c0_i32 = arith.constant 0 : i32
    %c0_i32_0 = arith.constant 0 : i32
    %c0_i32_1 = arith.constant 0 : i32
    %c0_i32_2 = arith.constant 0 : i32
    return %c0_i32, %c0_i32_0, %c0_i32_1 : i32, i32, i32
  }
  func.func @transform_14(%arg0: i32) -> (i32, i32, i32) {
    %c0_i32 = arith.constant 0 : i32
    %c0_i32_0 = arith.constant 0 : i32
    %c0_i32_1 = arith.constant 0 : i32
    %c0_i32_2 = arith.constant 0 : i32
    return %c0_i32, %c0_i32_0, %c0_i32_1 : i32, i32, i32
  }
  func.func @transform_15(%arg0: i32) -> (i32, i32, i32) {
    %c0_i32 = arith.constant 0 : i32
    %c0_i32_0 = arith.constant 0 : i32
    %c0_i32_1 = arith.constant 0 : i32
    %c0_i32_2 = arith.constant 0 : i32
    return %c0_i32, %c0_i32_0, %c0_i32_1 : i32, i32, i32
  }
  func.func @transform_16(%arg0: i32) -> (i32, i32) {
    %c0_i32 = arith.constant 0 : i32
    %c0_i32_0 = arith.constant 0 : i32
    %c0_i32_1 = arith.constant 0 : i32
    return %c0_i32, %c0_i32_0 : i32, i32
  }
  func.func @transform_17(%arg0: i32) -> (i32, i32) {
    %c0_i32 = arith.constant 0 : i32
    %c0_i32_0 = arith.constant 0 : i32
    %c0_i32_1 = arith.constant 0 : i32
    return %c0_i32, %c0_i32_0 : i32, i32
  }
  func.func @transform_18(%arg0: i32) -> (i32, i32) {
    %c0_i32 = arith.constant 0 : i32
    %c0_i32_0 = arith.constant 0 : i32
    %c0_i32_1 = arith.constant 0 : i32
    return %c0_i32, %c0_i32_0 : i32, i32
  }
  func.func @transform_19(%arg0: i32) -> (i32, i32) {
    %c0_i32 = arith.constant 0 : i32
    %c0_i32_0 = arith.constant 0 : i32
    %c0_i32_1 = arith.constant 0 : i32
    return %c0_i32, %c0_i32_0 : i32, i32
  }
  func.func @transform_20(%arg0: i32) -> (i32, i32) {
    %c0_i32 = arith.constant 0 : i32
    %c0_i32_0 = arith.constant 0 : i32
    %c0_i32_1 = arith.constant 0 : i32
    return %c0_i32, %c0_i32_0 : i32, i32
  }
  func.func @transform_21(%arg0: i32) -> (i32, i32) {
    %c0_i32 = arith.constant 0 : i32
    %c0_i32_0 = arith.constant 0 : i32
    %c0_i32_1 = arith.constant 0 : i32
    return %c0_i32, %c0_i32_0 : i32, i32
  }
  func.func @transform_22(%arg0: i32) -> (i32, i32) {
    %c0_i32 = arith.constant 0 : i32
    %c0_i32_0 = arith.constant 0 : i32
    %c0_i32_1 = arith.constant 0 : i32
    return %c0_i32, %c0_i32_0 : i32, i32
  }
  func.func @transform_23(%arg0: i32) -> (i32, i32) {
    %c0_i32 = arith.constant 0 : i32
    %c0_i32_0 = arith.constant 0 : i32
    %c0_i32_1 = arith.constant 0 : i32
    return %c0_i32, %c0_i32_0 : i32, i32
  }
  func.func @transform_24(%arg0: i32) -> (i32, i32) {
    %c0_i32 = arith.constant 0 : i32
    %c0_i32_0 = arith.constant 0 : i32
    %c0_i32_1 = arith.constant 0 : i32
    return %c0_i32, %c0_i32_0 : i32, i32
  }
}

</mosaic_0001>

<bundles_post_ra>
// kernel: forward.1
= control target key start
LH: loop header
LB: loop body
LE: loop exit
PB: predicated region body
PF: predicated region fallthrough
CT: control target
= control target key end

     0   :  { %vm6284_vm0 = vcmask 261120   ;;  %v4893_v4 = vmov 32.0   ;;  %s6273_s26 = smov 64   ;;  %s6274_s28 = smov 96   ;;  %vm212_vm8 = vcmask 392192   ;;  %vm342_vm9 = vcmask 64512   ;;  %s6233_s0 = inlined_call_operand.vmem [shape: f32[16,32], index: 0, kind: input, shape index: {}]   ;;  %s6234_s4 = inlined_call_operand.vmem [shape: f32[2,1,32], index: 4, kind: input, shape index: {}]   ;;  %s6235_s5 = inlined_call_operand.vmem [shape: f32[2,1,32], index: 5, kind: input, shape index: {}]   ;;  %s6236_s8 = inlined_call_operand.vmem [shape: bf16[2,32,96], index: 8, kind: input, shape index: {}]   ;;  %s6237_s2 = inlined_call_operand.vmem [shape: f32[48,48], index: 2, kind: input, shape index: {}]   ;;  %s6238_s3 = inlined_call_operand.vmem [shape: f32[64,64], index: 3, kind: input, shape index: {}]   ;;  %s6239_s9 = inlined_call_operand.vmem [shape: bf16[8,8,32], index: 9, kind: input, shape index: {}]   ;;  %s6240_s6 = inlined_call_operand.vmem [shape: f32[2,1,32], index: 6, kind: input, shape index: {}]   ;;  %s6241_s7 = inlined_call_operand.vmem [shape: f32[2,1,32], index: 7, kind: input, shape index: {}]   ;;  %s6242_s11 = inlined_call_operand.vmem [shape: f32[2,1,8], index: 11, kind: input, shape index: {}]   ;;  %s6243_s10 = inlined_call_operand.vmem [shape: f32[2,32,8], index: 10, kind: input, shape index: {}]   ;;  %s6244_s12 = inlined_call_operand.vmem [shape: bf16[8,32,128], index: 12, kind: input, shape index: {}]   ;;  %s6245_s14 = inlined_call_operand.vmem [shape: bf16[8,128,32], index: 14, kind: input, shape index: {}]   ;;  %s6246_s13 = inlined_call_operand.vmem [shape: f32[8,1,128], index: 13, kind: input, shape index: {}]   ;;  %s6247_s15 = inlined_call_operand.vmem [shape: f32[8,1,32], index: 15, kind: input, shape index: {}]   ;;  %s6248_s1 = inlined_call_operand.vmem [shape: f32[2,16,4], index: 1, kind: input, shape index: {}]   ;;  %s6249_s16 = inlined_call_operand.vmem [shape: f32[1,32], index: 16, kind: input, shape index: {}]   ;;  %s6250_s17 = inlined_call_operand.vmem [shape: f32[1,32], index: 17, kind: input, shape index: {}]   ;;  %s6251_s22 = inlined_call_operand.vmem [shape: f32[32,1], index: 22, kind: input, shape index: {}]   ;;  %s6252_s18 = inlined_call_operand.vmem [shape: f32[32,32], index: 18, kind: input, shape index: {}]   ;;  %s6253_s23 = inlined_call_operand.<no memory space> [shape: f32[1,1], index: 23, kind: input, shape index: {}]   ;;  %s6254_s19 = inlined_call_operand.vmem [shape: f32[1,32], index: 19, kind: input, shape index: {}]   ;;  %s6255_s20 = inlined_call_operand.vmem [shape: f32[32,1], index: 20, kind: input, shape index: {}]   ;;  %s6256_s21 = inlined_call_operand.<no memory space> [shape: f32[1,1], index: 21, kind: input, shape index: {}]   ;;  %s6257_s24 = inlined_call_operand.vmem [shape: f32[2,2], index: 24, kind: output, shape index: {}]  }
   0x1   :  { %6286 = sst [smem:[#allocation4_spill]] %s6233_s0  ;;  %4757 = vrcp.f32 %v4893_v4  ;;  %vm6285_vm10 = vcmask 1043456  }
   0x2   :  { %6287 = sst [smem:[#allocation5_spill]] %s6234_s4  ;;  %s6308_s4 = smov 64  }
   0x3   :  { %6288 = sst [smem:[#allocation6_spill]] %s6235_s5  ;;  %s6267_s5 = smov 120  }
   0x4   :  { %6289 = sst [smem:[#allocation7_spill]] %s6236_s8 }
   0x5   :  { %6290 = sst [smem:[#allocation8_spill]] %s6237_s2 }
   0x6   :  { %6291 = sst [smem:[#allocation9_spill]] %s6238_s3 }
   0x7   :  { %6292 = sst [smem:[#allocation10_spill]] %s6239_s9  ;;  %v4758_v5 = vpop.eup %4757  ;;  %s6269_s9 = smov 112  }
   0x8   :  { %6293 = sst [smem:[#allocation11_spill]] %s6240_s6  ;;  %v110_v6 = vmul.f32 32.0, %v4758_v5  ;;  %vm114_vm1 = vweird.f32 %v4758_v5  ;;  %s6271_s6 = smov 104  }
   0x9   :  { %6294 = sst [smem:[#allocation12_spill]] %s6241_s7 }
   0xa   :  { %6295 = sst [smem:[#allocation13_spill]] %s6254_s19  ;;  %v111_v7 = vsub.f32 1.0, %v110_v6 }
   0xb   :  { %6296 = sst [smem:[#allocation14_spill]] %s6256_s21 }
   0xc   :  { %6297 = sst [smem:[#allocation15_spill]] %s6257_s24  ;;  %v112_v8 = vmul.f32 %v4758_v5, %v111_v7  ;;  %s6275_s24 = smov 124  }
   0xd   :  { %s6298_s27 = sld [smem:[#allocation4_spill]] }
   0xe   :  { %v113_v9 = vadd.f32 %v4758_v5, %v112_v8  ;;  %s6299_s0 = sld [smem:[#allocation7_spill]] }
   0xf   :  { %s6300_s25 = sld [smem:[#allocation5_spill]] }
  0x10   :  { %v5040_v10 = vsel %vm114_vm1, %v4758_v5, %v113_v9  ;;  %s6301_s3 = sld [smem:[#allocation6_spill]] }
  0x11   :  { %s6302_s29 = sld [smem:[#allocation8_spill]] }
  0x12   :  { %s6303_s7 = sld [smem:[#allocation9_spill]] }
  0x13   :  { %v98_v0 = vld [vmem:[%s6298_s27] sm:$0xff]  ;;  %v99_v2 = vld [vmem:[%s6298_s27 + $0x8] sm:$0xff]  ;;  %s6305_s8 = sld [smem:[#allocation11_spill]] }
  0x14   :  { %v103_v1 = vsel %vm6284_vm0, %v98_v0, 0.0  ;;  %v106_v3 = vsel %vm6284_vm0, %v99_v2, 0.0  ;;  %v4537_v21 = vld [vmem:[%s6299_s0 + $0x8] sm:$0xff]  ;;  %v4536_v23 = vld [vmem:[%s6299_s0] sm:$0xff]  ;;  %s6344_s21 = sld [smem:[#allocation13_spill]] }
  0x15   :  { %104 = vadd.xlane.f32.xlu0 %v103_v1  ;;  %190 = vmatpush.bf16.msra.mxu0 %v4537_v21  ;;  %v4726_v42 = vld [vmem:[%s6300_s25] ss:$0 sm:$0xff] }
  0x16   :  { %v4727_v47 = vld [vmem:[%s6301_s3] ss:$0 sm:$0xff] }
  0x17   :  { %v82_v61 = vld [vmem:[%s6302_s29] sm:$0xff]  ;;  %v83_v62 = vld [vmem:[%s6302_s29 + $0x8] sm:$0xff]  ;;  %v84_v63 = vld [vmem:[%s6302_s29 + $0x10] sm:$0xff] }
  0x19   :  { %191 = vmatpush.bf16.msra.mxu0 %v4536_v23 }
  0x1d   :  { %107 = vadd.xlane.f32.xlu0 %v106_v3 }
  0x88   :  { %v105_v11 = vpop.xlane.xlu0 %104 }
  0x89   :  { %v116_v12 = vmul.f32 %v5040_v10, %v105_v11 }
  0x8b   :  { %v118_v13 = vsub.f32 %v98_v0, %v116_v12  ;;  %v85_v0 = vld [vmem:[%s6302_s29 + $0x18] sm:$0xff] }
  0x8d   :  { %v120_v14 = vmul.f32 %v118_v13, %v118_v13 }
  0x8f   :  { %v122_v15 = vsel %vm6284_vm0, %v120_v14, 0.0 }
  0x90   :  { %123 = vadd.xlane.f32.xlu1 %v122_v15  ;;  %v108_v16 = vpop.xlane.xlu0 %107 }
  0x91   :  { %v117_v17 = vmul.f32 %v5040_v10, %v108_v16 }
  0x93   :  { %v119_v18 = vsub.f32 %v99_v2, %v117_v17 }
  0x95   :  { %v121_v19 = vmul.f32 %v119_v18, %v119_v18 }
  0x97   :  { %v125_v20 = vsel %vm6284_vm0, %v121_v19, 0.0 }
  0x98   :  { %126 = vadd.xlane.f32.xlu1 %v125_v20 }
 0x103   :  { %v124_v22 = vpop.xlane.xlu1 %123 }
 0x104   :  { %v128_v24 = vmul.f32 %v124_v22, %v5040_v10 }
 0x106   :  { %v130_v25 = vadd.f32 1e-05, %v128_v24 }
 0x108   :  { %4759 = vrsqrt.f32 %v130_v25  ;;  %vm138_vm3 = vweird.f32 %v130_v25 }
 0x10b   :  { %v127_v26 = vpop.xlane.xlu1 %126 }
 0x10c   :  { %v129_v27 = vmul.f32 %v127_v26, %v5040_v10 }
 0x10e   :  { %v4760_v28 = vpop.eup %4759  ;;  %v131_v29 = vadd.f32 1e-05, %v129_v27 }
 0x10f   :  { %v133_v30 = vmul.f32 %v4760_v28, %v130_v25  ;;  %vm139_vm2 = vweird.f32 %v4760_v28 }
 0x110   :  { %4761 = vrsqrt.f32 %v131_v29  ;;  %vm140_vm4 = vmor %vm138_vm3, %vm139_vm2  ;;  %vm148_vm6 = vweird.f32 %v131_v29 }
 0x111   :  { %v134_v31 = vmul.f32 %v4760_v28, %v133_v30 }
 0x113   :  { %v135_v32 = vmul.f32 0.5, %v134_v31 }
 0x115   :  { %v136_v33 = vsub.f32 1.5, %v135_v32  ;;  %v86_v32 = vld [vmem:[%s6302_s29 + $0x20] sm:$0xff] }
 0x116   :  { %v4762_v34 = vpop.eup %4761 }
 0x117   :  { %v137_v35 = vmul.f32 %v4760_v28, %v136_v33  ;;  %v143_v36 = vmul.f32 %v4762_v34, %v131_v29  ;;  %vm149_vm5 = vweird.f32 %v4762_v34 }
 0x118   :  { %vm150_vm7 = vmor %vm148_vm6, %vm149_vm5 }
 0x119   :  { %v144_v37 = vmul.f32 %v4762_v34, %v143_v36  ;;  %v141_v38 = vsel %vm140_vm4, %v4760_v28, %v137_v35 }
 0x11a   :  { %v152_v41 = vmul.f32 %v141_v38, %v118_v13 }
 0x11b   :  { %v145_v39 = vmul.f32 0.5, %v144_v37 }
 0x11c   :  { %v157_v46 = vmul.f32 %v4726_v42, %v152_v41 }
 0x11d   :  { %v146_v40 = vsub.f32 1.5, %v145_v39 }
 0x11e   :  { %v162_v49 = vadd.f32 %v4727_v47, %v157_v46 }
 0x11f   :  { %v147_v43 = vmul.f32 %v4762_v34, %v146_v40 }
 0x121   :  { %v151_v44 = vsel %vm150_vm7, %v4762_v34, %v147_v43 }
 0x122   :  { %v153_v45 = vmul.f32 %v151_v44, %v119_v18 }
 0x124   :  { %v158_v48 = vmul.f32 %v4726_v42, %v153_v45 }
 0x126   :  { %v163_v50 = vadd.f32 %v4727_v47, %v158_v48 }
 0x128   :  { %v164_v51 = vpack.c.bf16 %v163_v50, %v162_v49 }
 0x12a   :  { %3911 = vmatmul.msk.bf16.vlgmr.msra.gmra.mxu0 %vm6284_vm0, %v164_v51 }
 0x1a7   :  { %v193_v52 = vpop.f32.mrf.mxu0 }
 0x1af   :  { %v195_v53 = vpop.f32.mrf.mxu0 }
 0x1b0   :  { %v4634_v54 = vpack.i.bf16 %v193_v52, %v195_v53 }
 0x1b2   :  { %4635 = vrot.lane.b32.xlu2 %v4634_v54, %s6273_s26 }
 0x1ba   :  { %4640 = vrot.lane.b32.xlu2 %v4634_v54, %s6274_s28  ;;  %s6304_s28 = sld [smem:[#allocation10_spill]] }
 0x20c   :  { %v4636_v55 = vpop.permute.xlu2 %4635 }
 0x20d   :  { %v4637_v56 = vunpack.i.l.bf16 %v4636_v55  ;;  %v4638_v57 = vunpack.i.h.bf16 %v4636_v55 }
 0x20f   :  { %241 = vmatpush.msra.mxu1 %v4637_v56 }
 0x211   :  { %242 = vmatpush.msra.mxu1 %v4638_v57 }
 0x214   :  { %v4641_v58 = vpop.permute.xlu2 %4640 }
 0x215   :  { %v4642_v59 = vunpack.i.l.bf16 %v4641_v58  ;;  %v4643_v60 = vunpack.i.h.bf16 %v4641_v58 }
 0x217   :  { %243 = vmatpush.msra.mxu1 %v4642_v59 }
 0x219   :  { %244 = vmatpush.msra.mxu1 %v4643_v60 }
 0x21b   :  { %245 = vmatpush.msra.mxu1 %v195_v53  ;;  %v87_v53 = vld [vmem:[%s6302_s29 + $0x28] sm:$0xff] }
 0x21d   :  { %246 = vmatpush.msra.mxu1 %v193_v52 }
 0x21e   :  { %3912 = vmatmul.msk.f32.vlgmr.msra.gmra.mxu1 %vm212_vm8, %v82_v61 }
 0x226   :  { %3913 = vmatmul.msk.f32.gmra.mxu1 %vm212_vm8, %v83_v62 }
 0x22e   :  { %3914 = vmatmul.msk.f32.gmra.mxu1 %vm212_vm8, %v84_v63 }
 0x236   :  { %3915 = vmatmul.msk.f32.gmra.mxu1 %vm212_vm8, %v85_v0 }
 0x23e   :  { %3916 = vmatmul.msk.f32.gmra.mxu1 %vm212_vm8, %v86_v32 }
 0x246   :  { %3917 = vmatmul.msk.f32.gmra.mxu1 %vm212_vm8, %v87_v53 }
 0x29b   :  { %v248_v1 = vpop.f32.mrf.mxu1 }
 0x29c   :  { %v326_v8 = vpack.c.bf16 %v248_v1, %v248_v1 }
 0x2a3   :  { %v251_v2 = vpop.f32.mrf.mxu1 }
 0x2a4   :  { %v327_v13 = vpack.c.bf16 %v251_v2, %v251_v2 }
 0x2ab   :  { %v254_v3 = vpop.f32.mrf.mxu1 }
 0x2ac   :  { %294 = vrot.lane.b32.xlu1 %v254_v3, %s6269_s9  ;;  %v4644_v4 = vpack.i.bf16 %v251_v2, %v254_v3  ;;  %v334_v5 = vpack.c.bf16 %v254_v3, %v254_v3 }
 0x2ae   :  { %4645 = vrot.lane.b32.xlu2 %v4644_v4, %s6267_s5  ;;  %v347_v6 = vsel %vm342_vm9, %v334_v5, 0 }
 0x2af   :  { %356 = vmatpush.bf16.xpose.msra.mxu2 %v347_v6 }
 0x2b3   :  { %v257_v7 = vpop.f32.mrf.mxu1 }
 0x2b4   :  { %296 = vrot.lane.b32.xlu1 %v257_v7, %s6269_s9  ;;  %290 = vrot.lane.b32.xlu0 %v257_v7, %s6267_s5  ;;  %v335_v9 = vpack.c.bf16 %v257_v7, %v257_v7  ;;  %v4649_v12 = vpack.i.bf16 %v257_v7, %v254_v3 }
 0x2b6   :  { %274 = vrot.lane.b32.xlu2 %v248_v1, %s6269_s9  ;;  %3918 = vmatmul.msk.bf16.vlgmr.msra.gmra.mxu2 %vm342_vm9, %v326_v8  ;;  %v366_v11 = vsel %vm342_vm9, %v335_v9, 0 }
 0x2b7   :  { %375 = vmatpush.bf16.xpose.msra.mxu3 %v366_v11 }
 0x2bc   :  { %4650 = vrot.lane.b32.xlu0 %v4649_v12, %s6271_s6 }
 0x2be   :  { %268 = vrot.lane.b32.xlu2 %v248_v1, %s6267_s5  ;;  %3919 = vmatmul.msk.bf16.vlgmr.msra.gmra.mxu3 %vm342_vm9, %v327_v13 }
 0x2c4   :  { %282 = vrot.lane.b32.xlu0 %v251_v2, %s6271_s6 }
 0x2c6   :  { %280 = vrot.lane.b32.xlu2 %v248_v1, %s6271_s6 }
 0x2ce   :  { %276 = vrot.lane.b32.xlu2 %v251_v2, %s6269_s9 }
 0x308   :  { %v4646_v14 = vpop.permute.xlu2 %4645 }
 0x309   :  { %v4647_v15 = vunpack.i.l.bf16 %v4646_v14  ;;  %v4648_v33 = vunpack.i.h.bf16 %v4646_v14 }
 0x30b   :  { %v336_v16 = vpack.c.bf16 %v4647_v15, %v4647_v15  ;;  %v329_v36 = vpack.c.bf16 %v4648_v33, %v4648_v33 }
 0x30d   :  { %v385_v17 = vsel %vm342_vm9, %v336_v16, 0 }
 0x30e   :  { %394 = vmatpush.bf16.xpose.msrb.mxu0 %v385_v17 }
 0x310   :  { %v275_v18 = vpop.permute.xlu2 %274 }
 0x311   :  { %v330_v27 = vpack.c.bf16 %v275_v18, %v275_v18 }
 0x318   :  { %v269_v19 = vpop.permute.xlu2 %268 }
 0x319   :  { %v328_v20 = vpack.c.bf16 %v269_v19, %v269_v19 }
 0x31b   :  { %3920 = vmatmul.msk.bf16.vlgmr.msrb.gmra.mxu0 %vm342_vm9, %v328_v20 }
 0x31e   :  { %v295_v21 = vpop.permute.xlu1 %294 }
 0x31f   :  { %v338_v22 = vpack.c.bf16 %v295_v21, %v295_v21 }
 0x320   :  { %v281_v24 = vpop.permute.xlu2 %280 }
 0x321   :  { %v423_v23 = vsel %vm342_vm9, %v338_v22, 0  ;;  %v332_v47 = vpack.c.bf16 %v281_v24, %v281_v24  ;;  %v5128_v22 = vpop.f32.mrf.mxu1 }
 0x322   :  { %432 = vmatpush.bf16.xpose.msrb.mxu3 %v423_v23 }
 0x326   :  { %v297_v25 = vpop.permute.xlu1 %296  ;;  %v291_v26 = vpop.permute.xlu0 %290 }
 0x327   :  { %v339_v28 = vpack.c.bf16 %v297_v25, %v297_v25  ;;  %v337_v29 = vpack.c.bf16 %v291_v26, %v291_v26  ;;  %v703_v26 = vpack.c.bf16 %v5128_v22, %v5128_v22 }
 0x328   :  { %v277_v34 = vpop.permute.xlu2 %276 }
 0x329   :  { %v442_v30 = vsel %vm342_vm9, %v339_v28, 0  ;;  %3922 = vmatmul.msk.bf16.vlgmr.msrb.gmra.mxu3 %vm342_vm9, %v330_v27  ;;  %v404_v31 = vsel %vm342_vm9, %v337_v29, 0  ;;  %v331_v37 = vpack.c.bf16 %v277_v34, %v277_v34  ;;  %v5130_v23 = vpop.f32.mrf.mxu1  ;;  %v716_v27 = vsel %vm6285_vm10, %v703_v26, 0 }
 0x32a   :  { %413 = vmatpush.bf16.xpose.msrb.mxu2 %v404_v31  ;;  %451 = vmatpush.bf16.xpose.msra.mxu0 %v442_v30  ;;  %v4654_v24 = vpack.i.bf16 %v5130_v23, %v5128_v22  ;;  %v704_v32 = vpack.c.bf16 %v5130_v23, %v5130_v23 }
 0x32c   :  { %v735_v33 = vsel %vm6285_vm10, %v704_v32, 0 }
 0x32e   :  { %v4651_v35 = vpop.permute.xlu0 %4650 }
 0x32f   :  { %v4653_v38 = vunpack.i.h.bf16 %v4651_v35  ;;  %v4652_v39 = vunpack.i.l.bf16 %v4651_v35 }
 0x331   :  { %v341_v40 = vpack.c.bf16 %v4653_v38, %v4653_v38  ;;  %v340_v41 = vpack.c.bf16 %v4652_v39, %v4652_v39  ;;  %3921 = vmatmul.msk.bf16.vlgmr.msrb.gmra.mxu2 %vm342_vm9, %v329_v36  ;;  %3923 = vmatmul.msk.bf16.vlgmr.msra.gmra.mxu0 %vm342_vm9, %v331_v37 }
 0x332   :  { %725 = vmatpush.bf16.msrb.mxu0 %v716_v27 }
 0x333   :  { %v461_v42 = vsel %vm342_vm9, %v340_v41, 0  ;;  %v480_v43 = vsel %vm342_vm9, %v341_v40, 0 }
 0x334   :  { %470 = vmatpush.bf16.xpose.msra.mxu2 %v461_v42  ;;  %489 = vmatpush.bf16.xpose.msra.mxu3 %v480_v43 }
 0x336   :  { %v283_v44 = vpop.permute.xlu0 %282 }
 0x337   :  { %v333_v45 = vpack.c.bf16 %v283_v44, %v283_v44 }
 0x339   :  { %v358_v46 = vpop.f32.mrf.mxu2 }
 0x33a   :  { %v495_v57 = vmul.f32 0.35355338, %v358_v46 }
 0x33b   :  { %3925 = vmatmul.msk.bf16.vlgmr.msra.gmra.mxu3 %vm342_vm9, %v333_v45 }
 0x33c   :  { %v503_v59 = vsel %vm342_vm9, %v495_v57, -inf  ;;  %744 = vmatpush.bf16.msrb.mxu2 %v735_v33 }
 0x341   :  { %v360_v48 = vpop.f32.mrf.mxu2  ;;  %v377_v49 = vpop.f32.mrf.mxu3  ;;  %3924 = vmatmul.msk.bf16.vlgmr.msra.gmra.mxu2 %vm342_vm9, %v332_v47 }
 0x342   :  { %v496_v50 = vmul.f32 0.35355338, %v377_v49 }
 0x344   :  { %v506_v51 = vsel %vm342_vm9, %v496_v50, -inf }
 0x345   :  { %507 = vmax.xlane.f32.xlu0 %v506_v51 }
 0x349   :  { %v379_v52 = vpop.f32.mrf.mxu3 }
 0x398   :  { %v396_v54 = vpop.f32.mrf.mxu0 }
 0x399   :  { %v497_v55 = vmul.f32 0.35355338, %v396_v54 }
 0x39b   :  { %v509_v56 = vsel %vm342_vm9, %v497_v55, -inf }
 0x39c   :  { %510 = vmax.xlane.f32.xlu1 %v509_v56 }
 0x3a0   :  { %v398_v58 = vpop.f32.mrf.mxu0 }
 0x3a4   :  { %504 = vmax.xlane.f32.xlu1 %v503_v59 }
 0x3ac   :  { %v434_v60 = vpop.f32.mrf.mxu3 }
 0x3ad   :  { %v499_v19 = vmul.f32 0.35355338, %v434_v60 }
 0x3ae   :  { %v453_v61 = vpop.f32.mrf.mxu0 }
 0x3af   :  { %v5117_v5 = vmul.f32 0.35355338, %v453_v61  ;;  %v515_v21 = vsel %vm342_vm9, %v499_v19, -inf }
 0x3b1   :  { %v518_v11 = vsel %vm342_vm9, %v5117_v5, -inf }
 0x3b4   :  { %v415_v62 = vpop.f32.mrf.mxu2  ;;  %v436_v63 = vpop.f32.mrf.mxu3 }
 0x3b5   :  { %v498_v0 = vmul.f32 0.35355338, %v415_v62 }
 0x3b6   :  { %v455_v1 = vpop.f32.mrf.mxu0 }
 0x3b7   :  { %v512_v2 = vsel %vm342_vm9, %v498_v0, -inf }
 0x3b8   :  { %513 = vmax.xlane.f32.xlu2 %v512_v2  ;;  %v508_v3 = vpop.xlane.xlu0 %507 }
 0x3b9   :  { %v528_v4 = vsub.f32 %v496_v50, %v508_v3 }
 0x3bb   :  { %v537_v6 = vmul.f32 1.442695, %v528_v4 }
 0x3bc   :  { %v417_v7 = vpop.f32.mrf.mxu2 }
 0x3bd   :  { %4763 = vpow2.f32 %v537_v6 }
 0x3be   :  { %v491_v8 = vpop.f32.mrf.mxu3 }
 0x3bf   :  { %v502_v9 = vmul.f32 0.35355338, %v491_v8 }
 0x3c0   :  { %519 = vmax.xlane.f32.xlu2 %v518_v11 }
 0x3c1   :  { %v524_v12 = vsel %vm342_vm9, %v502_v9, -inf }
 0x3c2   :  { %525 = vmax.xlane.f32.xlu1 %v524_v12 }
 0x3c3   :  { %v5122_v15 = vpop.eup %4763 }
 0x3c4   :  { %v472_v13 = vpop.f32.mrf.mxu2  ;;  %v554_v18 = vsel %vm342_vm9, %v5122_v15, 0.0 }
 0x3c5   :  { %v501_v14 = vmul.f32 0.35355338, %v472_v13 }
 0x3c6   :  { %v493_v16 = vpop.f32.mrf.mxu3 }
 0x3c7   :  { %v521_v17 = vsel %vm342_vm9, %v501_v14, -inf }
 0x3c8   :  { %522 = vmax.xlane.f32.xlu0 %v521_v17 }
 0x3ca   :  { %555 = vadd.xlane.f32.xlu1 %v554_v18 }
 0x3cc   :  { %v474_v20 = vpop.f32.mrf.mxu2 }
 0x3d0   :  { %516 = vmax.xlane.f32.xlu0 %v515_v21 }
 0x3e3   :  { %4655 = vrot.lane.b32.xlu1 %v4654_v24, %s6267_s5 }
 0x3eb   :  { %322 = vrot.lane.b32.xlu1 %v5130_v23, %s6271_s6 }
 0x3f3   :  { %314 = vrot.lane.b32.xlu1 %v5128_v22, %s6269_s9 }
 0x40f   :  { %v511_v25 = vpop.xlane.xlu1 %510 }
 0x410   :  { %v529_v30 = vsub.f32 %v497_v55, %v511_v25 }
 0x412   :  { %v539_v34 = vmul.f32 1.442695, %v529_v30 }
 0x417   :  { %v505_v28 = vpop.xlane.xlu1 %504 }
 0x418   :  { %v527_v29 = vsub.f32 %v495_v57, %v505_v28 }
 0x41a   :  { %v535_v31 = vmul.f32 1.442695, %v527_v29 }
 0x41c   :  { %4765 = vpow2.f32 %v535_v31 }
 0x41d   :  { %4767 = vpow2.f32 %v539_v34 }
 0x422   :  { %v5145_v35 = vpop.eup %4765 }
 0x423   :  { %v551_v36 = vsel %vm342_vm9, %v5145_v35, 0.0  ;;  %v5149_v37 = vpop.eup %4767 }
 0x424   :  { %552 = vadd.xlane.f32.xlu2 %v551_v36  ;;  %v557_v39 = vsel %vm342_vm9, %v5149_v37, 0.0 }
 0x42b   :  { %v514_v38 = vpop.xlane.xlu2 %513 }
 0x42c   :  { %v530_v40 = vsub.f32 %v498_v0, %v514_v38  ;;  %558 = vadd.xlane.f32.xlu2 %v557_v39 }
 0x42e   :  { %v541_v41 = vmul.f32 1.442695, %v530_v40 }
 0x430   :  { %4769 = vpow2.f32 %v541_v41 }
 0x433   :  { %v520_v53 = vpop.xlane.xlu2 %519 }
 0x434   :  { %v532_v59 = vsub.f32 %v5117_v5, %v520_v53 }
 0x435   :  { %v526_v42 = vpop.xlane.xlu1 %525 }
 0x436   :  { %v5153_v43 = vpop.eup %4769  ;;  %v534_v44 = vsub.f32 %v502_v9, %v526_v42  ;;  %v545_v2 = vmul.f32 1.442695, %v532_v59 }
 0x437   :  { %v560_v45 = vsel %vm342_vm9, %v5153_v43, 0.0 }
 0x438   :  { %v549_v46 = vmul.f32 1.442695, %v534_v44  ;;  %561 = vadd.xlane.f32.xlu0 %v560_v45 }
 0x43a   :  { %4771 = vpow2.f32 %v549_v46 }
 0x43b   :  { %v523_v47 = vpop.xlane.xlu0 %522 }
 0x43c   :  { %v533_v48 = vsub.f32 %v501_v14, %v523_v47 }
 0x43d   :  { %v556_v49 = vpop.xlane.xlu1 %555 }
 0x43e   :  { %v547_v50 = vmul.f32 1.442695, %v533_v48  ;;  %4773 = vrcp.f32 %v556_v49  ;;  %v601_v62 = vand.u32 2147483648, %v556_v49  ;;  %v599_v0 = vand.u32 2147483647, %v556_v49 }
 0x43f   :  { %vm595_vm12 = vweird.f32 %v556_v49 }
 0x440   :  { %v5157_v51 = vpop.eup %4771  ;;  %4775 = vpow2.f32 %v547_v50  ;;  %v602_v4 = vor.u32 1.1754944e-38, %v601_v62  ;;  %vm600_vm14 = vcmp.eq.f32.partialorder %v599_v0, 8.507059e+37 }
 0x441   :  { %v572_v52 = vsel %vm342_vm9, %v5157_v51, 0.0 }
 0x442   :  { %573 = vadd.xlane.f32.xlu0 %v572_v52 }
 0x443   :  { %v517_v54 = vpop.xlane.xlu0 %516 }
 0x444   :  { %v4774_v55 = vpop.eup %4773  ;;  %v531_v56 = vsub.f32 %v499_v19, %v517_v54 }
 0x445   :  { %v591_v57 = vmul.f32 %v4774_v55, %v556_v49  ;;  %vm596_vm11 = vweird.f32 %v4774_v55 }
 0x446   :  { %v5161_v58 = vpop.eup %4775  ;;  %v543_v60 = vmul.f32 1.442695, %v531_v56  ;;  %vm597_vm13 = vmor %vm595_vm12, %vm596_vm11 }
 0x447   :  { %v592_v61 = vsub.f32 1.0, %v591_v57  ;;  %v569_v1 = vsel %vm342_vm9, %v5161_v58, 0.0 }
 0x448   :  { %4777 = vpow2.f32 %v543_v60 }
 0x449   :  { %v593_v63 = vmul.f32 %v4774_v55, %v592_v61  ;;  %4779 = vpow2.f32 %v545_v2 }
 0x44a   :  { %570 = vadd.xlane.f32.xlu0 %v569_v1 }
 0x44b   :  { %v594_v3 = vadd.f32 %v4774_v55, %v593_v63 }
 0x44d   :  { %v598_v6 = vsel %vm597_vm13, %v4774_v55, %v594_v3 }
 0x44e   :  { %v5166_v7 = vpop.eup %4777  ;;  %v603_v5 = vsel %vm600_vm14, %v602_v4, %v598_v6 }
 0x44f   :  { %v604_v8 = vmul.f32 %v5122_v15, %v603_v5  ;;  %v563_v9 = vsel %vm342_vm9, %v5166_v7, 0.0  ;;  %v5172_v12 = vpop.eup %4779 }
 0x450   :  { %564 = vadd.xlane.f32.xlu2 %v563_v9  ;;  %v566_v13 = vsel %vm342_vm9, %v5172_v12, 0.0 }
 0x451   :  { %v696_v11 = vpack.c.bf16 %v604_v8, %v604_v8 }
 0x453   :  { %3927 = vmatmul.msk.bf16.vlgmr.msrb.gmra.mxu2 %vm342_vm9, %v696_v11 }
 0x455   :  { %v4656_v14 = vpop.permute.xlu1 %4655 }
 0x456   :  { %v4658_v16 = vunpack.i.h.bf16 %v4656_v14  ;;  %v4657_v17 = vunpack.i.l.bf16 %v4656_v14 }
 0x458   :  { %567 = vadd.xlane.f32.xlu2 %v566_v13  ;;  %v706_v24 = vpack.c.bf16 %v4658_v16, %v4658_v16  ;;  %v705_v25 = vpack.c.bf16 %v4657_v17, %v4657_v17 }
 0x45a   :  { %v754_v27 = vsel %vm6285_vm10, %v705_v25, 0 }
 0x45b   :  { %763 = vmatpush.bf16.msrb.mxu3 %v754_v27 }
 0x45d   :  { %v323_v15 = vpop.permute.xlu1 %322 }
 0x45e   :  { %320 = vrot.lane.b32.xlu0 %v5128_v22, %s6271_s6  ;;  %v710_v20 = vpack.c.bf16 %v323_v15, %v323_v15  ;;  %v773_v22 = vsel %vm6285_vm10, %v706_v24, 0  ;;  %s6345_s6 = sld [smem:[#allocation15_spill]] }
 0x45f   :  { %782 = vmatpush.bf16.msrb.mxu1 %v773_v22 }
 0x460   :  { %v849_v26 = vsel %vm6285_vm10, %v710_v20, 0 }
 0x463   :  { %858 = vmatpush.bf16.msra.mxu1 %v849_v26 }
 0x465   :  { %v315_v18 = vpop.permute.xlu1 %314 }
 0x466   :  { %v707_v19 = vpack.c.bf16 %v315_v18, %v315_v18 }
 0x468   :  { %v792_v21 = vsel %vm6285_vm10, %v707_v19, 0 }
 0x469   :  { %801 = vmatpush.bf16.msra.mxu0 %v792_v21 }
 0x470   :  { %316 = vrot.lane.b32.xlu2 %v5130_v23, %s6269_s9  ;;  %s6306_s9 = sld [smem:[#allocation12_spill]] }
 0x497   :  { %v553_v23 = vpop.xlane.xlu2 %552 }
 0x498   :  { %4781 = vrcp.f32 %v553_v23  ;;  %v586_v32 = vand.u32 2147483648, %v553_v23  ;;  %v584_v34 = vand.u32 2147483647, %v553_v23  ;;  %vm580_vm1 = vweird.f32 %v553_v23 }
 0x49a   :  { %v587_v39 = vor.u32 1.1754944e-38, %v586_v32  ;;  %vm585_vm3 = vcmp.eq.f32.partialorder %v584_v34, 8.507059e+37 }
 0x49e   :  { %v4782_v28 = vpop.eup %4781 }
 0x49f   :  { %v576_v29 = vmul.f32 %v4782_v28, %v553_v23  ;;  %v559_v30 = vpop.xlane.xlu2 %558  ;;  %vm581_vm15 = vweird.f32 %v4782_v28 }
 0x4a0   :  { %4783 = vrcp.f32 %v559_v30  ;;  %vm582_vm2 = vmor %vm580_vm1, %vm581_vm15  ;;  %v616_v46 = vand.u32 2147483648, %v559_v30  ;;  %v614_v48 = vand.u32 2147483647, %v559_v30  ;;  %vm610_vm5 = vweird.f32 %v559_v30 }
 0x4a1   :  { %v577_v31 = vsub.f32 1.0, %v576_v29 }
 0x4a2   :  { %v617_v53 = vor.u32 1.1754944e-38, %v616_v46  ;;  %vm615_vm7 = vcmp.eq.f32.partialorder %v614_v48, 8.507059e+37 }
 0x4a3   :  { %v578_v33 = vmul.f32 %v4782_v28, %v577_v31 }
 0x4a5   :  { %v579_v36 = vadd.f32 %v4782_v28, %v578_v33 }
 0x4a6   :  { %v4784_v38 = vpop.eup %4783 }
 0x4a7   :  { %v583_v40 = vsel %vm582_vm2, %v4782_v28, %v579_v36  ;;  %v606_v41 = vmul.f32 %v4784_v38, %v559_v30  ;;  %vm611_vm4 = vweird.f32 %v4784_v38 }
 0x4a8   :  { %v588_v42 = vsel %vm585_vm3, %v587_v39, %v583_v40  ;;  %vm612_vm6 = vmor %vm610_vm5, %vm611_vm4 }
 0x4a9   :  { %v589_v44 = vmul.f32 %v5145_v35, %v588_v42  ;;  %v607_v45 = vsub.f32 1.0, %v606_v41 }
 0x4ab   :  { %v608_v47 = vmul.f32 %v4784_v38, %v607_v45  ;;  %v562_v49 = vpop.xlane.xlu0 %561  ;;  %v695_v50 = vpack.c.bf16 %v589_v44, %v589_v44 }
 0x4ac   :  { %4785 = vrcp.f32 %v562_v49  ;;  %v631_v62 = vand.u32 2147483648, %v562_v49  ;;  %v629_v0 = vand.u32 2147483647, %v562_v49  ;;  %vm625_vm12 = vweird.f32 %v562_v49 }
 0x4ad   :  { %v609_v52 = vadd.f32 %v4784_v38, %v608_v47  ;;  %3926 = vmatmul.msk.bf16.vlgmr.msrb.gmra.mxu0 %vm342_vm9, %v695_v50 }
 0x4ae   :  { %v632_v2 = vor.u32 1.1754944e-38, %v631_v62  ;;  %vm630_vm14 = vcmp.eq.f32.partialorder %v629_v0, 8.507059e+37 }
 0x4af   :  { %v613_v54 = vsel %vm612_vm6, %v4784_v38, %v609_v52 }
 0x4b0   :  { %v618_v55 = vsel %vm615_vm7, %v617_v53, %v613_v54 }
 0x4b1   :  { %v619_v56 = vmul.f32 %v5149_v37, %v618_v55 }
 0x4b2   :  { %v4786_v35 = vpop.eup %4785 }
 0x4b3   :  { %v621_v57 = vmul.f32 %v4786_v35, %v562_v49  ;;  %v697_v59 = vpack.c.bf16 %v619_v56, %v619_v56  ;;  %vm626_vm11 = vweird.f32 %v4786_v35 }
 0x4b4   :  { %vm627_vm13 = vmor %vm625_vm12, %vm626_vm11 }
 0x4b5   :  { %v622_v60 = vsub.f32 1.0, %v621_v57  ;;  %v574_v61 = vpop.xlane.xlu0 %573  ;;  %3928 = vmatmul.msk.bf16.vlgmr.msrb.gmra.mxu3 %vm342_vm9, %v697_v59 }
 0x4b6   :  { %4787 = vrcp.f32 %v574_v61  ;;  %v691_v14 = vand.u32 2147483648, %v574_v61  ;;  %vm685_vm1 = vweird.f32 %v574_v61  ;;  %v689_v16 = vand.u32 2147483647, %v574_v61 }
 0x4b7   :  { %v623_v63 = vmul.f32 %v4786_v35, %v622_v60 }
 0x4b8   :  { %v692_v21 = vor.u32 1.1754944e-38, %v691_v14  ;;  %vm690_vm3 = vcmp.eq.f32.partialorder %v689_v16, 8.507059e+37 }
 0x4b9   :  { %v624_v1 = vadd.f32 %v4786_v35, %v623_v63 }
 0x4bb   :  { %v628_v3 = vsel %vm627_vm13, %v4786_v35, %v624_v1 }
 0x4bc   :  { %v4788_v4 = vpop.eup %4787  ;;  %v633_v37 = vsel %vm630_vm14, %v632_v2, %v628_v3 }
 0x4bd   :  { %v681_v6 = vmul.f32 %v4788_v4, %v574_v61  ;;  %v571_v5 = vpop.xlane.xlu0 %570  ;;  %v634_v8 = vmul.f32 %v5153_v43, %v633_v37  ;;  %vm686_vm15 = vweird.f32 %v4788_v4 }
 0x4be   :  { %4789 = vrcp.f32 %v571_v5  ;;  %vm687_vm2 = vmor %vm685_vm1, %vm686_vm15  ;;  %v676_v25 = vand.u32 2147483648, %v571_v5  ;;  %v674_v27 = vand.u32 2147483647, %v571_v5  ;;  %vm670_vm5 = vweird.f32 %v571_v5 }
 0x4bf   :  { %v682_v9 = vsub.f32 1.0, %v681_v6  ;;  %v698_v11 = vpack.c.bf16 %v634_v8, %v634_v8 }
 0x4c0   :  { %v677_v31 = vor.u32 1.1754944e-38, %v676_v25  ;;  %vm675_vm7 = vcmp.eq.f32.partialorder %v674_v27, 8.507059e+37  ;;  %v93_v25 = vld [vmem:[%s6303_s7 + $0x28] sm:$0xff]  ;;  %v95_v27 = vld [vmem:[%s6303_s7 + $0x38] sm:$0xff] }
 0x4c1   :  { %v683_v13 = vmul.f32 %v4788_v4, %v682_v9  ;;  %3929 = vmatmul.msk.bf16.vlgmr.msrb.gmra.mxu1 %vm342_vm9, %v698_v11 }
 0x4c3   :  { %v684_v15 = vadd.f32 %v4788_v4, %v683_v13  ;;  %v565_v17 = vpop.xlane.xlu2 %564 }
 0x4c4   :  { %v4790_v18 = vpop.eup %4789  ;;  %4791 = vrcp.f32 %v565_v17  ;;  %v646_v36 = vand.u32 2147483648, %v565_v17  ;;  %v644_v39 = vand.u32 2147483647, %v565_v17  ;;  %vm640_vm12 = vweird.f32 %v565_v17 }
 0x4c5   :  { %v688_v19 = vsel %vm687_vm2, %v4788_v4, %v684_v15  ;;  %v666_v20 = vmul.f32 %v4790_v18, %v571_v5  ;;  %vm671_vm4 = vweird.f32 %v4790_v18 }
 0x4c6   :  { %v693_v24 = vsel %vm690_vm3, %v692_v21, %v688_v19  ;;  %vm672_vm6 = vmor %vm670_vm5, %vm671_vm4  ;;  %v647_v46 = vor.u32 1.1754944e-38, %v646_v36  ;;  %vm645_vm14 = vcmp.eq.f32.partialorder %v644_v39, 8.507059e+37  ;;  %v88_v19 = vld [vmem:[%s6303_s7] sm:$0xff]  ;;  %vm6277_vm4 = vcmask 523264   ;;  %v90_v21 = vld [vmem:[%s6303_s7 + $0x10] sm:$0xff] }
 0x4c7   :  { %v667_v43 = vsub.f32 1.0, %v666_v20  ;;  %v694_v23 = vmul.f32 %v5157_v51, %v693_v24  ;;  %v89_v20 = vld [vmem:[%s6303_s7 + $0x8] sm:$0xff]  ;;  %v92_v24 = vld [vmem:[%s6303_s7 + $0x20] sm:$0xff] }
 0x4c9   :  { %v668_v26 = vmul.f32 %v4790_v18, %v667_v43  ;;  %v702_v40 = vpack.c.bf16 %v694_v23, %v694_v23  ;;  %v91_v43 = vld [vmem:[%s6303_s7 + $0x18] sm:$0xff] }
 0x4ca   :  { %v4792_v22 = vpop.eup %4791 }
 0x4cb   :  { %v669_v28 = vadd.f32 %v4790_v18, %v668_v26  ;;  %v636_v29 = vmul.f32 %v4792_v22, %v565_v17  ;;  %v568_v30 = vpop.xlane.xlu2 %567  ;;  %vm641_vm11 = vweird.f32 %v4792_v22  ;;  %v94_v26 = vld [vmem:[%s6303_s7 + $0x30] sm:$0xff] }
 0x4cc   :  { %4793 = vrcp.f32 %v568_v30  ;;  %vm642_vm13 = vmor %vm640_vm12, %vm641_vm11  ;;  %v661_v56 = vand.u32 2147483648, %v568_v30  ;;  %v659_v60 = vand.u32 2147483647, %v568_v30  ;;  %vm655_vm1 = vweird.f32 %v568_v30 }
 0x4cd   :  { %v673_v32 = vsel %vm672_vm6, %v4790_v18, %v669_v28  ;;  %v637_v33 = vsub.f32 1.0, %v636_v29  ;;  %v3942_v28 = vld [vmem:[%s6304_s28 + $0x4] sm:$0xf] }
 0x4ce   :  { %v678_v34 = vsel %vm675_vm7, %v677_v31, %v673_v32  ;;  %v662_v63 = vor.u32 1.1754944e-38, %v661_v56  ;;  %vm660_vm3 = vcmp.eq.f32.partialorder %v659_v60, 8.507059e+37  ;;  %v939_v29 = vsel %vm6285_vm10, %v3942_v28, 0  ;;  %v3945_v31 = vld [vmem:[%s6304_s28 + $0x8] sm:$0xf]  ;;  %v4877_v56 = vld [vmem:[%s6298_s27] sm:$0xff] }
 0x4cf   :  { %v638_v38 = vmul.f32 %v4792_v22, %v637_v33  ;;  %v679_v42 = vmul.f32 %v5161_v58, %v678_v34  ;;  %v982_v33 = vsel %vm6285_vm10, %v3945_v31, 0 }
 0x4d0   :  { %v321_v41 = vpop.permute.xlu0 %320  ;;  %991 = vmatpush.bf16.msrb.mxu1 %v982_v33 }
 0x4d1   :  { %v639_v51 = vadd.f32 %v4792_v22, %v638_v38  ;;  %v709_v44 = vpack.c.bf16 %v321_v41, %v321_v41  ;;  %3933 = vmatmul.msk.bf16.vlgmr.msra.gmra.mxu1 %vm342_vm9, %v702_v40  ;;  %v701_v55 = vpack.c.bf16 %v679_v42, %v679_v42  ;;  %v3947_v38 = vld [vmem:[%s6304_s28 + $0xc] sm:$0xf] }
 0x4d2   :  { %v4794_v45 = vpop.eup %4793  ;;  %v1007_v39 = vsel %vm6285_vm10, %v3947_v38, 0 }
 0x4d3   :  { %v643_v47 = vsel %vm642_vm13, %v4792_v22, %v639_v51  ;;  %v651_v48 = vmul.f32 %v4794_v45, %v568_v30  ;;  %v830_v49 = vsel %vm6285_vm10, %v709_v44, 0  ;;  %v317_v50 = vpop.permute.xlu2 %316  ;;  %vm656_vm15 = vweird.f32 %v4794_v45  ;;  %v931_v22 = vld [vmem:[%s6304_s28] sm:$0xf] }
 0x4d4   :  { %v648_v52 = vsel %vm645_vm14, %v647_v46, %v643_v47  ;;  %v708_v53 = vpack.c.bf16 %v317_v50, %v317_v50  ;;  %839 = vmatpush.bf16.msra.mxu3 %v830_v49  ;;  %vm657_vm2 = vmor %vm655_vm1, %vm656_vm15  ;;  %v959_v23 = vsel %vm6285_vm10, %v931_v22, 0 }
 0x4d5   :  { %v649_v54 = vmul.f32 %v5166_v7, %v648_v52  ;;  %v652_v58 = vsub.f32 1.0, %v651_v48 }
 0x4d6   :  { %v811_v35 = vsel %vm6285_vm10, %v708_v53, 0  ;;  %v746_v57 = vpop.f32.mrf.mxu2 }
 0x4d7   :  { %v653_v59 = vmul.f32 %v4794_v45, %v652_v58  ;;  %820 = vmatpush.bf16.msra.mxu2 %v811_v35  ;;  %3932 = vmatmul.msk.bf16.vlgmr.msra.gmra.mxu3 %vm342_vm9, %v701_v55  ;;  %v699_v61 = vpack.c.bf16 %v649_v54, %v649_v54 }
 0x4d8   :  { %968 = vmatpush.bf16.msrb.mxu3 %v959_v23 }
 0x4d9   :  { %v654_v62 = vadd.f32 %v4794_v45, %v653_v59  ;;  %3930 = vmatmul.msk.bf16.vlgmr.msra.gmra.mxu0 %vm342_vm9, %v699_v61 }
 0x4db   :  { %v658_v7 = vsel %vm657_vm2, %v4794_v45, %v654_v62  ;;  %948 = vmatpush.bf16.msrb.mxu2 %v939_v29 }
 0x4dc   :  { %v663_v0 = vsel %vm660_vm3, %v662_v63, %v658_v7  ;;  %vm1175_vm3 = vcmask 31744  }
 0x4dd   :  { %v664_v1 = vmul.f32 %v5172_v12, %v663_v0  ;;  %v4878_v0 = vld [vmem:[%s6298_s27 + $0x8] sm:$0xff] }
 0x4de   :  { %v748_v2 = vpop.f32.mrf.mxu2 }
 0x4df   :  { %v700_v3 = vpack.c.bf16 %v664_v1, %v664_v1 }
 0x4e1   :  { %3931 = vmatmul.msk.bf16.vlgmr.msra.gmra.mxu2 %vm342_vm9, %v700_v3 }
 0x4e2   :  { %1016 = vmatpush.bf16.msra.mxu2 %v1007_v39 }
 0x52a   :  { %v727_v4 = vpop.f32.mrf.mxu0 }
 0x532   :  { %v729_v37 = vpop.f32.mrf.mxu0 }
 0x538   :  { %v765_v6 = vpop.f32.mrf.mxu3 }
 0x53e   :  { %v784_v5 = vpop.f32.mrf.mxu1 }
 0x540   :  { %v767_v8 = vpop.f32.mrf.mxu3 }
 0x546   :  { %v786_v9 = vpop.f32.mrf.mxu1 }
 0x54e   :  { %v860_v11 = vpop.f32.mrf.mxu1 }
 0x54f   :  { %897 = vmatpush.msrb.mxu0 %v860_v11 }
 0x556   :  { %v803_v13 = vpop.f32.mrf.mxu0  ;;  %v862_v14 = vpop.f32.mrf.mxu1 }
 0x55a   :  { %v841_v15 = vpop.f32.mrf.mxu3 }
 0x55b   :  { %898 = vmatpush.msrb.mxu0 %v841_v15  ;;  %v1086_v15 = vld [vmem:[%s6243_s10 + $0x18] sm:$0xff] }
 0x55c   :  { %1109 = vmatpush.msra.mxu3 %v1086_v15  ;;  %v4563_v15 = vld [vmem:[%s6245_s14 + $0x98] sm:$0xff] }
 0x55e   :  { %v805_v16 = vpop.f32.mrf.mxu0 }
 0x55f   :  { %v1085_v16 = vld [vmem:[%s6243_s10 + $0x10] sm:$0xff] }
 0x560   :  { %1110 = vmatpush.msra.mxu3 %v1085_v16  ;;  %v4568_v16 = vld [vmem:[%s6244_s12 + $0x30] sm:$0xff] }
 0x562   :  { %v843_v17 = vpop.f32.mrf.mxu3 }
 0x563   :  { %v1084_v17 = vld [vmem:[%s6243_s10 + $0x8] sm:$0xff] }
 0x564   :  { %v822_v18 = vpop.f32.mrf.mxu2  ;;  %1111 = vmatpush.msra.mxu3 %v1084_v17 }
 0x565   :  { %899 = vmatpush.msrb.mxu0 %v822_v18  ;;  %v1083_v18 = vld [vmem:[%s6243_s10] sm:$0xff] }
 0x566   :  { %1112 = vmatpush.msra.mxu3 %v1083_v18 }
 0x567   :  { %900 = vmatpush.msrb.mxu0 %v803_v13 }
 0x569   :  { %901 = vmatpush.msrb.mxu0 %v784_v5 }
 0x56b   :  { %902 = vmatpush.msrb.mxu0 %v765_v6 }
 0x56c   :  { %v824_v12 = vpop.f32.mrf.mxu2 }
 0x56d   :  { %903 = vmatpush.msrb.mxu0 %v746_v57  ;;  %v4539_v12 = vld [vmem:[%s6244_s12 + $0x8] sm:$0xff] }
 0x56e   :  { %1422 = vmatpush.bf16.msra.mxu1 %v4539_v12 }
 0x56f   :  { %904 = vmatpush.msrb.mxu0 %v727_v4 }
 0x570   :  { %3934 = vmatmul.msk.f32.vlgmr.msrb.gmra.mxu0 %vm6277_vm4, %v88_v19 }
 0x578   :  { %3935 = vmatmul.msk.f32.gmra.mxu0 %vm6277_vm4, %v89_v20  ;;  %v4538_v20 = vld [vmem:[%s6244_s12] sm:$0xff] }
 0x579   :  { %1423 = vmatpush.bf16.msra.mxu1 %v4538_v20 }
 0x580   :  { %3936 = vmatmul.msk.f32.gmra.mxu0 %vm6277_vm4, %v90_v21 }
 0x588   :  { %3937 = vmatmul.msk.f32.gmra.mxu0 %vm6277_vm4, %v91_v43 }
 0x590   :  { %3938 = vmatmul.msk.f32.gmra.mxu0 %vm6277_vm4, %v92_v24  ;;  %v4549_v24 = vld [vmem:[%s6244_s12 + $0x18] sm:$0xff] }
 0x598   :  { %3939 = vmatmul.msk.f32.gmra.mxu0 %vm6277_vm4, %v93_v25  ;;  %v4548_v25 = vld [vmem:[%s6244_s12 + $0x10] sm:$0xff] }
 0x5a0   :  { %3940 = vmatmul.msk.f32.gmra.mxu0 %vm6277_vm4, %v94_v26 }
 0x5a8   :  { %3941 = vmatmul.msk.f32.gmra.mxu0 %vm6277_vm4, %v95_v27 }
 0x5ed   :  { %v906_v30 = vpop.f32.mrf.mxu0 }
 0x5f5   :  { %v909_v32 = vpop.f32.mrf.mxu0 }
 0x5f6   :  { %v930_v34 = vpack.c.bf16 %v909_v32, %v906_v30 }
 0x5f8   :  { %3944 = vmatmul.msk.bf16.vlgmr.msrb.gmra.mxu3 %vm342_vm9, %v930_v34 }
 0x5f9   :  { %1557 = vmatpush.bf16.msrb.mxu3 %v4549_v24  ;;  %v4733_v24 = vld [vmem:[%s6246_s13] ss:$0 sm:$0xff] }
 0x5fd   :  { %v912_v36 = vpop.f32.mrf.mxu0  ;;  %1558 = vmatpush.bf16.msrb.mxu3 %v4548_v25  ;;  %v4561_v25 = vld [vmem:[%s6245_s14 + $0x88] sm:$0xff] }
 0x605   :  { %v915_v40 = vpop.f32.mrf.mxu0 }
 0x606   :  { %v932_v41 = vpack.c.bf16 %v915_v40, %v912_v36  ;;  %v4730_v36 = vld [vmem:[%s6305_s8] ss:$0 sm:$0xff] }
 0x608   :  { %3943 = vmatmul.msk.bf16.vlgmr.msrb.gmra.mxu2 %vm342_vm9, %v932_v41  ;;  %v4731_v41 = vld [vmem:[%s6306_s9] ss:$0 sm:$0xff] }
 0x60d   :  { %v918_v42 = vpop.f32.mrf.mxu0 }
 0x615   :  { %v921_v51 = vpop.f32.mrf.mxu0 }
 0x616   :  { %v975_v44 = vpack.c.bf16 %v921_v51, %v918_v42 }
 0x618   :  { %3946 = vmatmul.msk.bf16.vlgmr.msrb.gmra.mxu1 %vm342_vm9, %v975_v44 }
 0x61d   :  { %v924_v45 = vpop.f32.mrf.mxu0 }
 0x625   :  { %v927_v46 = vpop.f32.mrf.mxu0 }
 0x626   :  { %v1000_v47 = vpack.c.bf16 %v927_v46, %v924_v45  ;;  %v4559_v45 = vld [vmem:[%s6244_s12 + $0x28] sm:$0xff] }
 0x628   :  { %3948 = vmatmul.msk.bf16.vlgmr.msra.gmra.mxu2 %vm342_vm9, %v1000_v47 }
 0x67b   :  { %v970_v50 = vpop.f32.mrf.mxu3 }
 0x683   :  { %v972_v57 = vpop.f32.mrf.mxu3 }
 0x68b   :  { %v950_v48 = vpop.f32.mrf.mxu2 }
 0x68c   :  { %v971_v53 = vadd.f32 %v970_v50, %v950_v48  ;;  %v4547_v48 = vld [vmem:[%s6245_s14 + $0x38] sm:$0xff]  ;;  %v4558_v50 = vld [vmem:[%s6244_s12 + $0x20] sm:$0xff] }
 0x68d   :  { %1501 = vmatpush.bf16.msrb.mxu2 %v4547_v48 }
 0x693   :  { %v952_v49 = vpop.f32.mrf.mxu2 }
 0x694   :  { %v973_v60 = vadd.f32 %v972_v57, %v952_v49  ;;  %v4544_v57 = vld [vmem:[%s6245_s14 + $0x20] sm:$0xff] }
 0x695   :  { %v993_v52 = vpop.f32.mrf.mxu1 }
 0x696   :  { %v998_v54 = vadd.f32 %v993_v52, %v971_v53  ;;  %v4546_v53 = vld [vmem:[%s6245_s14 + $0x30] sm:$0xff] }
 0x697   :  { %1502 = vmatpush.bf16.msrb.mxu2 %v4546_v53 }
 0x69d   :  { %v995_v59 = vpop.f32.mrf.mxu1 }
 0x69e   :  { %v999_v62 = vadd.f32 %v995_v59, %v973_v60  ;;  %v4557_v59 = vld [vmem:[%s6245_s14 + $0x78] sm:$0xff] }
 0x69f   :  { %1638 = vmatpush.bf16.msrb.mxu1 %v4557_v59  ;;  %v4543_v60 = vld [vmem:[%s6245_s14 + $0x18] sm:$0xff] }
 0x6ab   :  { %v1018_v58 = vpop.f32.mrf.mxu2 }
 0x6ac   :  { %v1023_v55 = vadd.f32 %v1018_v58, %v998_v54 }
 0x6ae   :  { %v5255_v35 = vadd.f32 %v4877_v56, %v1023_v55  ;;  %v4545_v55 = vld [vmem:[%s6245_s14 + $0x28] sm:$0xff] }
 0x6af   :  { %1503 = vmatpush.bf16.msrb.mxu2 %v4545_v55 }
 0x6b0   :  { %v1029_v61 = vsel %vm6284_vm0, %v5255_v35, 0.0 }
 0x6b1   :  { %1030 = vadd.xlane.f32.xlu0 %v1029_v61  ;;  %v4556_v61 = vld [vmem:[%s6245_s14 + $0x70] sm:$0xff] }
 0x6b2   :  { %1639 = vmatpush.bf16.msrb.mxu1 %v4556_v61 }
 0x6b3   :  { %v1020_v63 = vpop.f32.mrf.mxu2  ;;  %1504 = vmatpush.bf16.msrb.mxu2 %v4544_v57 }
 0x6b4   :  { %v1024_v7 = vadd.f32 %v1020_v63, %v999_v62  ;;  %v4542_v62 = vld [vmem:[%s6245_s14 + $0x10] sm:$0xff]  ;;  %v4555_v63 = vld [vmem:[%s6245_s14 + $0x68] sm:$0xff] }
 0x6b6   :  { %v5262_v1 = vadd.f32 %v4878_v0, %v1024_v7  ;;  %1640 = vmatpush.bf16.msrb.mxu1 %v4555_v63  ;;  %v4541_v7 = vld [vmem:[%s6245_s14 + $0x8] sm:$0xff]  ;;  %v4554_v0 = vld [vmem:[%s6245_s14 + $0x60] sm:$0xff] }
 0x6b7   :  { %1505 = vmatpush.bf16.msrb.mxu2 %v4543_v60  ;;  %v4735_v60 = vld [vmem:[%s6246_s13 + $0x2] ss:$0 sm:$0xff] }
 0x6b8   :  { %v1032_v2 = vsel %vm6284_vm0, %v5262_v1, 0.0 }
 0x6b9   :  { %1033 = vadd.xlane.f32.xlu1 %v1032_v2  ;;  %v4540_v2 = vld [vmem:[%s6245_s14] sm:$0xff] }
 0x6ba   :  { %1641 = vmatpush.bf16.msrb.mxu1 %v4554_v0 }
 0x6bb   :  { %1506 = vmatpush.bf16.msrb.mxu2 %v4542_v62 }
 0x6bf   :  { %1507 = vmatpush.bf16.msrb.mxu2 %v4541_v7 }
 0x6c3   :  { %1508 = vmatpush.bf16.msrb.mxu2 %v4540_v2 }
 0x724   :  { %v1031_v3 = vpop.xlane.xlu0 %1030 }
 0x725   :  { %v1035_v4 = vmul.f32 %v1031_v3, %v5040_v10  ;;  %v4553_v3 = vld [vmem:[%s6245_s14 + $0x58] sm:$0xff] }
 0x726   :  { %1642 = vmatpush.bf16.msrb.mxu1 %v4553_v3 }
 0x727   :  { %v1037_v37 = vsub.f32 %v5255_v35, %v1035_v4  ;;  %v4567_v4 = vld [vmem:[%s6245_s14 + $0xb8] sm:$0xff] }
 0x728   :  { %1773 = vmatpush.bf16.msra.mxu0 %v4567_v4  ;;  %v4900_v4 = vmov 1  }
 0x729   :  { %v1039_v6 = vmul.f32 %v1037_v37, %v1037_v37  ;;  %4662 = vset.pattern.permute.xlu1 %v4900_v4  ;;  %4659 = vset.pattern.permute.xlu0 %v4900_v4 }
 0x72b   :  { %v1041_v5 = vsel %vm6284_vm0, %v1039_v6, 0.0  ;;  %v4566_v6 = vld [vmem:[%s6245_s14 + $0xb0] sm:$0xff] }
 0x72c   :  { %1042 = vadd.xlane.f32.xlu2 %v1041_v5  ;;  %v1034_v8 = vpop.xlane.xlu1 %1033  ;;  %1774 = vmatpush.bf16.msra.mxu0 %v4566_v6  ;;  %v4551_v5 = vld [vmem:[%s6245_s14 + $0x48] sm:$0xff]  ;;  %v4576_v6 = vld [vmem:[%s6245_s14 + $0xf0] sm:$0xff] }
 0x72d   :  { %v1036_v9 = vmul.f32 %v1034_v8, %v5040_v10  ;;  %v4565_v8 = vld [vmem:[%s6245_s14 + $0xa8] sm:$0xff] }
 0x72f   :  { %v5271_v11 = vsub.f32 %v5262_v1, %v1036_v9  ;;  %v4550_v9 = vld [vmem:[%s6245_s14 + $0x40] sm:$0xff] }
 0x730   :  { %1775 = vmatpush.bf16.msra.mxu0 %v4565_v8  ;;  %v4575_v8 = vld [vmem:[%s6245_s14 + $0xe8] sm:$0xff] }
 0x731   :  { %v1040_v13 = vmul.f32 %v5271_v11, %v5271_v11 }
 0x733   :  { %v1044_v14 = vsel %vm6284_vm0, %v1040_v13, 0.0  ;;  %v4569_v13 = vld [vmem:[%s6244_s12 + $0x38] sm:$0xff] }
 0x734   :  { %1045 = vadd.xlane.f32.xlu0 %v1044_v14  ;;  %v4732_v14 = vld [vmem:[%s6242_s11] ss:$0 sm:$0xff]  ;;  %1827 = vmatpush.bf16.msra.mxu2 %v4569_v13 }
 0x738   :  { %1828 = vmatpush.bf16.msra.mxu2 %v4568_v16  ;;  %v4572_v16 = vld [vmem:[%s6245_s14 + $0xd0] sm:$0xff] }
 0x79f   :  { %v1043_v19 = vpop.xlane.xlu2 %1042 }
 0x7a0   :  { %v1047_v21 = vmul.f32 %v1043_v19, %v5040_v10  ;;  %v4562_v19 = vld [vmem:[%s6245_s14 + $0x90] sm:$0xff] }
 0x7a2   :  { %v1049_v43 = vadd.f32 1e-05, %v1047_v21 }
 0x7a4   :  { %4795 = vrsqrt.f32 %v1049_v43  ;;  %vm1057_vm6 = vweird.f32 %v1049_v43 }
 0x7a7   :  { %v1046_v26 = vpop.xlane.xlu0 %1045 }
 0x7a8   :  { %v1048_v27 = vmul.f32 %v1046_v26, %v5040_v10 }
 0x7aa   :  { %v4796_v22 = vpop.eup %4795  ;;  %v1050_v23 = vadd.f32 1e-05, %v1048_v27 }
 0x7ab   :  { %v1052_v28 = vmul.f32 %v4796_v22, %v1049_v43  ;;  %vm1058_vm5 = vweird.f32 %v4796_v22 }
 0x7ac   :  { %4797 = vrsqrt.f32 %v1050_v23  ;;  %vm1059_vm7 = vmor %vm1057_vm6, %vm1058_vm5  ;;  %vm1067_vm12 = vweird.f32 %v1050_v23 }
 0x7ad   :  { %v1053_v29 = vmul.f32 %v4796_v22, %v1052_v28  ;;  %v4560_v28 = vld [vmem:[%s6245_s14 + $0x80] sm:$0xff] }
 0x7af   :  { %v1054_v30 = vmul.f32 0.5, %v1053_v29 }
 0x7b1   :  { %v1055_v31 = vsub.f32 1.5, %v1054_v30 }
 0x7b2   :  { %v4798_v32 = vpop.eup %4797 }
 0x7b3   :  { %v1056_v33 = vmul.f32 %v4796_v22, %v1055_v31  ;;  %v1062_v34 = vmul.f32 %v4798_v32, %v1050_v23  ;;  %vm1068_vm11 = vweird.f32 %v4798_v32 }
 0x7b4   :  { %vm1069_vm13 = vmor %vm1067_vm12, %vm1068_vm11 }
 0x7b5   :  { %v1060_v38 = vsel %vm1059_vm7, %v4796_v22, %v1056_v33  ;;  %v1063_v39 = vmul.f32 %v4798_v32, %v1062_v34 }
 0x7b6   :  { %v1071_v40 = vmul.f32 %v1060_v38, %v1037_v37  ;;  %v4552_v37 = vld [vmem:[%s6245_s14 + $0x50] sm:$0xff] }
 0x7b7   :  { %v1064_v42 = vmul.f32 0.5, %v1063_v39  ;;  %1643 = vmatpush.bf16.msrb.mxu1 %v4552_v37  ;;  %v4901_v37 = vmov 2  }
 0x7b8   :  { %v1076_v51 = vmul.f32 %v4730_v36, %v1071_v40  ;;  %4660 = vset.pattern.permute.xlu2 %v4901_v37 }
 0x7b9   :  { %v1065_v44 = vsub.f32 1.5, %v1064_v42 }
 0x7ba   :  { %v1081_v46 = vadd.f32 %v4731_v41, %v1076_v51 }
 0x7bb   :  { %v1066_v47 = vmul.f32 %v4798_v32, %v1065_v44  ;;  %1644 = vmatpush.bf16.msrb.mxu1 %v4551_v5  ;;  %v1121_v5 = vld [vmem:[%s6248_s1 + $0x8] sm:$0xff] }
 0x7bc   :  { %3949 = vmatmul.msk.f32.vlgmr.msra.gmra.mxu3 %vm6284_vm0, %v1081_v46 }
 0x7bd   :  { %v1070_v49 = vsel %vm1069_vm13, %v4798_v32, %v1066_v47  ;;  %1692 = vmatpush.bf16.msra.mxu3 %v4559_v45 }
 0x7be   :  { %v1072_v52 = vmul.f32 %v1070_v49, %v5271_v11  ;;  %v4564_v11 = vld [vmem:[%s6245_s14 + $0xa0] sm:$0xff] }
 0x7bf   :  { %1645 = vmatpush.bf16.msrb.mxu1 %v4550_v9  ;;  %1776 = vmatpush.bf16.msra.mxu0 %v4564_v11  ;;  %v4574_v11 = vld [vmem:[%s6245_s14 + $0xe0] sm:$0xff] }
 0x7c0   :  { %v1077_v54 = vmul.f32 %v4730_v36, %v1072_v52 }
 0x7c1   :  { %1693 = vmatpush.bf16.msra.mxu3 %v4558_v50 }
 0x7c2   :  { %v1082_v58 = vadd.f32 %v4731_v41, %v1077_v54  ;;  %v4734_v41 = vld [vmem:[%s6246_s13 + $0x1] ss:$0 sm:$0xff] }
 0x7c3   :  { %1777 = vmatpush.bf16.msra.mxu0 %v4563_v15  ;;  %v4573_v15 = vld [vmem:[%s6245_s14 + $0xd8] sm:$0xff] }
 0x7c4   :  { %3950 = vmatmul.msk.f32.gmra.mxu3 %vm6284_vm0, %v1082_v58  ;;  %v5326_v56 = vpack.c.bf16 %v1082_v58, %v1081_v46 }
 0x7c6   :  { %3977 = vmatmul.msk.bf16.vlgmr.msra.gmra.mxu1 %vm6284_vm0, %v5326_v56 }
 0x7c7   :  { %1778 = vmatpush.bf16.msra.mxu0 %v4562_v19 }
 0x7cb   :  { %1779 = vmatpush.bf16.msra.mxu0 %v4561_v25 }
 0x7cc   :  { %4023 = vmatmul.msk.bf16.vlgmr.msrb.gmra.mxu3 %vm6284_vm0, %v5326_v56 }
 0x7cf   :  { %1780 = vmatpush.bf16.msra.mxu0 %v4560_v28 }
 0x7dc   :  { %4086 = vmatmul.msk.bf16.vlgmr.msra.gmra.mxu3 %vm6284_vm0, %v5326_v56 }
 0x83f   :  { %v1114_v17 = vpop.f32.mrf.mxu3 }
 0x840   :  { %v5397_v18 = vadd.f32 %v4732_v14, %v1114_v17  ;;  %v1120_v17 = vld [vmem:[%s6248_s1] sm:$0xff] }
 0x842   :  { %v1124_v12 = vand.u32 2147483647, %v5397_v18  ;;  %v1122_v47 = vmax.f32 %v5397_v18, 0.0 }
 0x843   :  { %v1425_v20 = vpop.f32.mrf.mxu1 }
 0x844   :  { %v1126_v21 = vsub.f32 0.0, %v1124_v12  ;;  %v1426_v22 = vadd.f32 %v4733_v24, %v1425_v20  ;;  %v4571_v12 = vld [vmem:[%s6245_s14 + $0xc8] sm:$0xff] }
 0x846   :  { %v1128_v43 = vmul.f32 1.442695, %v1126_v21  ;;  %v1430_v33 = vmax.f32 %v1426_v22, 0.0  ;;  %v4570_v21 = vld [vmem:[%s6245_s14 + $0xc0] sm:$0xff] }
 0x847   :  { %v1117_v26 = vpop.f32.mrf.mxu3  ;;  %v4738_v22 = vld [vmem:[%s6246_s13 + $0x3] ss:$0 sm:$0xff] }
 0x848   :  { %4799 = vpow2.f32 %v1128_v43  ;;  %v5409_v27 = vadd.f32 %v4732_v14, %v1117_v26  ;;  %v4903_v26 = vmov 3  }
 0x84a   :  { %v1125_v23 = vand.u32 2147483647, %v5409_v27  ;;  %v1123_v57 = vmax.f32 %v5409_v27, 0.0 }
 0x84b   :  { %v1427_v29 = vpop.f32.mrf.mxu1 }
 0x84c   :  { %v1127_v30 = vsub.f32 0.0, %v1125_v23  ;;  %v1428_v31 = vadd.f32 %v4733_v24, %v1427_v29  ;;  %v4902_v24 = vmov 0  }
 0x84e   :  { %v4800_v32 = vpop.eup %4799  ;;  %v1130_v34 = vmul.f32 1.442695, %v1127_v30  ;;  %v1431_v36 = vmax.f32 %v1428_v31, 0.0 }
 0x84f   :  { %v1560_v38 = vpop.f32.mrf.mxu3  ;;  %v1132_v39 = vadd.f32 1.0, %v4800_v32 }
 0x850   :  { %4801 = vpow2.f32 %v1130_v34  ;;  %v1432_v40 = vpack.c.bf16 %v1431_v36, %v1430_v33  ;;  %v1561_v51 = vadd.f32 %v4734_v41, %v1560_v38  ;;  %v96_v33 = vlaneseq }
 0x851   :  { %4803 = vlog2.f32 %v1132_v39  ;;  %v4904_v38 = vmov 0.0  }
 0x852   :  { %1509 = vmatmul.bf16.vlgmr.msrb.gmra.mxu2 %v1432_v40  ;;  %v1565_v50 = vmax.f32 %v1561_v51, 0.0  ;;  %v5489_v34 = vand.u32 127, %v96_v33 }
 0x854   :  { %vm6278_vm14 = vcmp.lt.s32.totalorder %v5489_v34, 2  ;;  %vm1200_vm6 = vcmp.lt.s32.totalorder %v5489_v34, 1 }
 0x856   :  { %v4802_v42 = vpop.eup %4801 }
 0x857   :  { %v4804_v44 = vpop.eup %4803  ;;  %v1562_v45 = vpop.f32.mrf.mxu3  ;;  %v1133_v46 = vadd.f32 1.0, %v4802_v42 }
 0x858   :  { %v1563_v48 = vadd.f32 %v4734_v41, %v1562_v45  ;;  %v1135_v49 = vmul.f32 0.6931472, %v4804_v44 }
 0x859   :  { %4805 = vlog2.f32 %v1133_v46 }
 0x85a   :  { %v1566_v52 = vmax.f32 %v1563_v48, 0.0  ;;  %v1138_v53 = vadd.f32 %v1135_v49, %v1122_v47 }
 0x85c   :  { %v1567_v54 = vpack.c.bf16 %v1566_v52, %v1565_v50  ;;  %1142 = vrot.lane.b32.xlu1 %v1138_v53, %s6275_s24 }
 0x85e   :  { %1646 = vmatmul.bf16.vlgmr.msrb.gmra.mxu1 %v1567_v54 }
 0x85f   :  { %v4806_v58 = vpop.eup %4805  ;;  %v1695_v55 = vpop.f32.mrf.mxu3 }
 0x860   :  { %v1137_v59 = vmul.f32 0.6931472, %v4806_v58  ;;  %v1696_v62 = vadd.f32 %v4735_v60, %v1695_v55 }
 0x862   :  { %4149 = vmatmul.msk.bf16.vlgmr.msra.gmra.mxu2 %vm6284_vm0, %v5326_v56  ;;  %v1139_v61 = vadd.f32 %v1137_v59, %v1123_v57  ;;  %v1700_v0 = vmax.f32 %v1696_v62, 0.0  ;;  %v4577_v56 = vld [vmem:[%s6245_s14 + $0xf8] sm:$0xff] }
 0x863   :  { %1908 = vmatpush.bf16.msrb.mxu3 %v4577_v56 }
 0x864   :  { %1144 = vrot.lane.b32.xlu2 %v1139_v61, %s6275_s24 }
 0x867   :  { %v1697_v63 = vpop.f32.mrf.mxu3  ;;  %1909 = vmatpush.bf16.msrb.mxu3 %v4576_v6 }
 0x868   :  { %v1698_v7 = vadd.f32 %v4735_v60, %v1697_v63 }
 0x86a   :  { %v1701_v2 = vmax.f32 %v1698_v7, 0.0 }
 0x86b   :  { %1910 = vmatpush.bf16.msrb.mxu3 %v4575_v8 }
 0x86c   :  { %v1702_v3 = vpack.c.bf16 %v1701_v2, %v1700_v0 }
 0x86e   :  { %1781 = vmatmul.bf16.vlgmr.msra.gmra.mxu0 %v1702_v3 }
 0x86f   :  { %1911 = vmatpush.bf16.msrb.mxu3 %v4574_v11 }
 0x873   :  { %1912 = vmatpush.bf16.msrb.mxu3 %v4573_v15 }
 0x877   :  { %1913 = vmatpush.bf16.msrb.mxu3 %v4572_v16 }
 0x87b   :  { %1914 = vmatpush.bf16.msrb.mxu3 %v4571_v12 }
 0x87f   :  { %1915 = vmatpush.bf16.msrb.mxu3 %v4570_v21 }
 0x8be   :  { %v1145_v9 = vpop.permute.xlu2 %1144 }
 0x8bf   :  { %v1149_v13 = vmul.f32 %v1145_v9, %v1121_v5 }
 0x8c1   :  { %v5446_v14 = vadd.f32 %v1149_v13, %v5409_v27 }
 0x8c3   :  { %1193 = vperm.xlu1 %4662, %v5446_v14  }
 0x8cb   :  { %4663 = vset.pattern.permute.xlu1 %v4901_v37 }
 0x8cc   :  { %1226 = vperm.xlu1 %4663, %v5446_v14  }
 0x8ce   :  { %v1143_v19 = vpop.permute.xlu1 %1142 }
 0x8cf   :  { %v1148_v20 = vmul.f32 %v1143_v19, %v1120_v17 }
 0x8d1   :  { %v5467_v43 = vadd.f32 %v1148_v20, %v5397_v18 }
 0x8d3   :  { %1222 = vperm.xlu2 %4660, %v5467_v43   ;;  %1189 = vperm.xlu0 %4659, %v5467_v43  }
 0x8d4   :  { %4664 = vset.pattern.permute.xlu1 %v4902_v24 }
 0x8d5   :  { %v5472_v25 = vpop.f32.mrf.mxu2  ;;  %1159 = vperm.xlu1 %4664, %v5446_v14  }
 0x8db   :  { %4661 = vset.pattern.permute.xlu2 %v4902_v24  ;;  %4666 = vset.pattern.permute.xlu0 %v4903_v26 }
 0x8dc   :  { %1154 = vperm.xlu2 %4661, %v5467_v43   ;;  %1259 = vperm.xlu0 %4666, %v5446_v14  }
 0x8dd   :  { %v5479_v18 = vpop.f32.mrf.mxu2  ;;  %4669 = vset.pattern.permute.xlu1 %v4900_v4 }
 0x8e4   :  { %4665 = vset.pattern.permute.xlu2 %v4903_v26  ;;  %4668 = vset.pattern.permute.xlu0 %v4902_v24 }
 0x8e5   :  { %v1830_v27 = vpop.f32.mrf.mxu2  ;;  %1255 = vperm.xlu2 %4665, %v5467_v43  }
 0x8e6   :  { %v1831_v23 = vadd.f32 %v4738_v22, %v1830_v27 }
 0x8e8   :  { %v1835_v30 = vmax.f32 %v1831_v23, 0.0 }
 0x8ed   :  { %v1832_v28 = vpop.f32.mrf.mxu2  ;;  %4667 = vset.pattern.permute.xlu2 %v4902_v24 }
 0x8ee   :  { %v1833_v29 = vadd.f32 %v4738_v22, %v1832_v28 }
 0x8f0   :  { %v1836_v31 = vmax.f32 %v1833_v29, 0.0 }
 0x8f2   :  { %v1837_v32 = vpack.c.bf16 %v1836_v31, %v1835_v30 }
 0x8f4   :  { %1916 = vmatmul.bf16.vlgmr.msrb.gmra.mxu3 %v1837_v32 }
 0x92d   :  { %v1223_v36 = vpop.permute.xlu2 %1222 }
 0x92e   :  { %vm1229_vm15 = vcmp.gt.f32.partialorder %v5467_v43, %v1223_v36  ;;  %vm1231_vm1 = vcmp.eq.f32.partialorder %v5467_v43, %v1223_v36 }
 0x92f   :  { %vm1234_vm2 = vmand %vm1231_vm1, %vm6278_vm14 }
 0x930   :  { %vm1236_vm5 = vmor %vm1229_vm15, %vm1234_vm2 }
 0x931   :  { %v3959_v39 = vsel %vm1236_vm5, 1.0, %v4904_v38 }
 0x932   :  { %v1242_v40 = vsel %vm1175_vm3, %v3959_v39, 0.0 }
 0x933   :  { %1243 = vadd.xlane.f32.xlu2 %v1242_v40 }
 0x935   :  { %v1194_v41 = vpop.permute.xlu1 %1193 }
 0x936   :  { %vm1199_vm7 = vcmp.eq.f32.partialorder %v5446_v14, %v1194_v41  ;;  %v1155_v42 = vpop.permute.xlu2 %1154  ;;  %vm1197_vm12 = vcmp.gt.f32.partialorder %v5446_v14, %v1194_v41 }
 0x937   :  { %vm1162_vm11 = vcmp.gt.f32.partialorder %v5467_v43, %v1155_v42  ;;  %vm1202_vm13 = vmand %vm1199_vm7, %vm1200_vm6 }
 0x938   :  { %v3951_v51 = vsel %vm1162_vm11, 1.0, %v4904_v38  ;;  %vm1204_vm15 = vmor %vm1197_vm12, %vm1202_vm13  ;;  %vm6279_vm11 = vcmp.lt.s32.totalorder %v5489_v34, 3 }
 0x939   :  { %v1176_v44 = vsel %vm1175_vm3, %v3951_v51, 0.0  ;;  %v3956_v46 = vsel %vm1204_vm15, 1.0, %v4904_v38 }
 0x93a   :  { %1177 = vadd.xlane.f32.xlu1 %v1176_v44  ;;  %v1212_v47 = vsel %vm1175_vm3, %v3956_v46, 0.0 }
 0x93e   :  { %v1227_v45 = vpop.permute.xlu1 %1226 }
 0x93f   :  { %vm1232_vm1 = vcmp.eq.f32.partialorder %v5446_v14, %v1227_v45  ;;  %vm1230_vm2 = vcmp.gt.f32.partialorder %v5446_v14, %v1227_v45  ;;  %v1256_v48 = vpop.permute.xlu2 %1255 }
 0x940   :  { %vm1235_vm5 = vmand %vm1232_vm1, %vm6278_vm14  ;;  %vm1264_vm12 = vcmp.eq.f32.partialorder %v5467_v43, %v1256_v48 }
 0x941   :  { %vm1237_vm7 = vmor %vm1230_vm2, %vm1235_vm5  ;;  %vm1262_vm2 = vcmp.gt.f32.partialorder %v5467_v43, %v1256_v48 }
 0x942   :  { %1213 = vadd.xlane.f32.xlu1 %v1212_v47  ;;  %v3960_v50 = vsel %vm1237_vm7, 1.0, %v4904_v38  ;;  %vm1267_vm5 = vmand %vm1264_vm12, %vm6279_vm11 }
 0x943   :  { %v1245_v53 = vsel %vm1175_vm3, %v3960_v50, 0.0  ;;  %vm1269_vm7 = vmor %vm1262_vm2, %vm1267_vm5 }
 0x944   :  { %v3963_v60 = vsel %vm1269_vm7, 1.0, %v4904_v38  ;;  %vm1287_vm7 = vcmask 7168  }
 0x945   :  { %v1190_v49 = vpop.permute.xlu0 %1189  ;;  %v1275_v61 = vsel %vm1175_vm3, %v3963_v60, 0.0 }
 0x946   :  { %vm1196_vm13 = vcmp.gt.f32.partialorder %v5467_v43, %v1190_v49  ;;  %vm1198_vm15 = vcmp.eq.f32.partialorder %v5467_v43, %v1190_v49 }
 0x947   :  { %vm1201_vm4 = vmand %vm1198_vm15, %vm1200_vm6  ;;  %v1160_v52 = vpop.permute.xlu1 %1159 }
 0x948   :  { %vm1163_vm1 = vcmp.gt.f32.partialorder %v5446_v14, %v1160_v52  ;;  %vm1203_vm14 = vmor %vm1196_vm13, %vm1201_vm4 }
 0x949   :  { %v3955_v54 = vsel %vm1203_vm14, 1.0, %v4904_v38  ;;  %v3952_v58 = vsel %vm1163_vm1, 1.0, %v4904_v38 }
 0x94a   :  { %1246 = vadd.xlane.f32.xlu1 %v1245_v53  ;;  %v1209_v55 = vsel %vm1175_vm3, %v3955_v54, 0.0  ;;  %v1179_v57 = vsel %vm1175_vm3, %v3952_v58, 0.0 }
 0x94b   :  { %1210 = vadd.xlane.f32.xlu0 %v1209_v55  ;;  %1180 = vadd.xlane.f32.xlu2 %v1179_v57 }
 0x94e   :  { %v1260_v59 = vpop.permute.xlu0 %1259 }
 0x94f   :  { %vm1263_vm4 = vcmp.gt.f32.partialorder %v5446_v14, %v1260_v59  ;;  %vm1265_vm13 = vcmp.eq.f32.partialorder %v5446_v14, %v1260_v59 }
 0x950   :  { %vm1268_vm14 = vmand %vm1265_vm13, %vm6279_vm11 }
 0x951   :  { %vm1270_vm12 = vmor %vm1263_vm4, %vm1268_vm14  ;;  %vm6283_vm14 = vcmask 15360  }
 0x952   :  { %v3964_v62 = vsel %vm1270_vm12, 1.0, %v4904_v38  ;;  %vm6282_vm12 = vcmask 23552  }
 0x953   :  { %1276 = vadd.xlane.f32.xlu2 %v1275_v61  ;;  %v1278_v63 = vsel %vm1175_vm3, %v3964_v62, 0.0 }
 0x954   :  { %1279 = vadd.xlane.f32.xlu0 %v1278_v63 }
 0x9a6   :  { %v1244_v0 = vpop.xlane.xlu2 %1243 }
 0x9a7   :  { %vm1248_vm4 = vcmp.lt.f32.partialorder %v1244_v0, 2.0 }
 0x9a8   :  { %v3961_v17 = vsel %vm1248_vm4, 1.0, %v4904_v38 }
 0x9ad   :  { %v1178_v7 = vpop.xlane.xlu1 %1177 }
 0x9ae   :  { %vm1182_vm2 = vcmp.lt.f32.partialorder %v1178_v7, 2.0 }
 0x9af   :  { %v3953_v9 = vsel %vm1182_vm2, 1.0, %v4904_v38 }
 0x9b5   :  { %v1214_v2 = vpop.xlane.xlu1 %1213 }
 0x9b6   :  { %vm1216_vm5 = vcmp.lt.f32.partialorder %v1214_v2, 2.0 }
 0x9b7   :  { %v3958_v11 = vsel %vm1216_vm5, 1.0, %v4904_v38  ;;  %vm6280_vm5 = vcmask 1041408  }
 0x9bd   :  { %v1247_v6 = vpop.xlane.xlu1 %1246 }
 0x9be   :  { %v1211_v3 = vpop.xlane.xlu0 %1210  ;;  %v1181_v56 = vpop.xlane.xlu2 %1180  ;;  %vm1249_vm13 = vcmp.lt.f32.partialorder %v1247_v6, 2.0 }
 0x9bf   :  { %vm1215_vm15 = vcmp.lt.f32.partialorder %v1211_v3, 2.0  ;;  %vm1183_vm1 = vcmp.lt.f32.partialorder %v1181_v56, 2.0  ;;  %v3962_v19 = vsel %vm1249_vm13, 1.0, %v4904_v38 }
 0x9c0   :  { %v3957_v5 = vsel %vm1215_vm15, 1.0, %v4904_v38  ;;  %v3954_v8 = vsel %vm1183_vm1, 1.0, %v4904_v38  ;;  %vm6281_vm1 = vcmask 1040384  }
 0x9c1   :  { %v1288_v13 = vsel %vm1287_vm7, %v3953_v9, %v3957_v5  ;;  %v1289_v15 = vsel %vm1287_vm7, %v3954_v8, %v3958_v11 }
 0x9c2   :  { %v1291_v21 = vsel %vm6283_vm14, %v1288_v13, %v3961_v17  ;;  %v1292_v23 = vsel %vm6283_vm14, %v1289_v15, %v3962_v19 }
 0x9c6   :  { %v1277_v16 = vpop.xlane.xlu2 %1276 }
 0x9c7   :  { %vm1281_vm11 = vcmp.lt.f32.partialorder %v1277_v16, 2.0  ;;  %v1280_v12 = vpop.xlane.xlu0 %1279 }
 0x9c8   :  { %v3965_v20 = vsel %vm1281_vm11, 1.0, %v4904_v38  ;;  %vm1282_vm15 = vcmp.lt.f32.partialorder %v1280_v12, 2.0 }
 0x9c9   :  { %v5547_v27 = vsel %vm6282_vm12, %v1291_v21, %v3965_v20  ;;  %v3966_v22 = vsel %vm1282_vm15, 1.0, %v4904_v38 }
 0x9ca   :  { %v1351_v28 = vrot.slane %v5547_v27, 7  ;;  %v1295_v29 = vsel %vm6282_vm12, %v1292_v23, %v3966_v22  ;;  %vm1296_vm2 = vcmp.gt.f32.partialorder %v5547_v27, 0.0 }
 0x9cb   :  { %v1352_v30 = vrot.slane %v1295_v29, 7  ;;  %v1298_v31 = vsel %vm1296_vm2, %v5467_v43, -1e+30  ;;  %vm1297_vm11 = vcmp.gt.f32.partialorder %v1295_v29, 0.0 }
 0x9cc   :  { %v1356_v32 = vsel %vm6281_vm1, 0.0, %v1351_v28  ;;  %v1300_v33 = vsel %vm1175_vm3, %v1298_v31, -inf  ;;  %v1299_v36 = vsel %vm1297_vm11, %v5446_v14, -1e+30 }
 0x9cd   :  { %v1357_v39 = vadd.f32 %v1356_v32, %v5547_v27  ;;  %v1353_v40 = vsel %vm6281_vm1, %v1351_v28, %v1352_v30  ;;  %1301 = vmax.xlane.f32.xlu1 %v1300_v33  ;;  %v1303_v41 = vsel %vm1175_vm3, %v1299_v36, -inf }
 0x9ce   :  { %v1358_v42 = vadd.f32 %v1353_v40, %v1295_v29  ;;  %1304 = vmax.xlane.f32.xlu2 %v1303_v41 }
 0x9cf   :  { %v1362_v51 = vrot.slane %v1357_v39, 6 }
 0x9d0   :  { %v1363_v44 = vrot.slane %v1358_v42, 6 }
 0x9d1   :  { %v1367_v43 = vsel %vm6280_vm5, 0.0, %v1362_v51 }
 0x9d2   :  { %v1368_v45 = vadd.f32 %v1367_v43, %v1357_v39  ;;  %v1364_v46 = vsel %vm6280_vm5, %v1362_v51, %v1363_v44  ;;  %v1647_v43 = vpop.f32.mrf.mxu1 }
 0x9d3   :  { %v1369_v47 = vadd.f32 %v1364_v46, %v1358_v42  ;;  %v1917_v46 = vpop.f32.mrf.mxu3 }
 0x9d4   :  { %v1372_v48 = vrot.slane %v1368_v45, 4 }
 0x9d5   :  { %v1373_v14 = vrot.slane %v1369_v47, 4 }
 0x9d6   :  { %v1377_v49 = vsel %vm6285_vm10, 0.0, %v1372_v48 }
 0x9d7   :  { %v1378_v50 = vadd.f32 %v1377_v49, %v1368_v45  ;;  %v1374_v52 = vsel %vm6285_vm10, %v1372_v48, %v1373_v14  ;;  %v1782_v45 = vpop.f32.mrf.mxu0  ;;  %v4736_v14 = vld [vmem:[%s6247_s15] ss:$0 sm:$0xff]  ;;  %v4737_v49 = vld [vmem:[%s6247_s15 + $0x1] ss:$0 sm:$0xff] }
 0x9d8   :  { %v1379_v53 = vadd.f32 %v1374_v52, %v1369_v47  ;;  %v1513_v52 = vadd.f32 %v4736_v14, %v5479_v18 }
 0x9d9   :  { %vm1382_vm13 = vcmp.le.f32.partialorder %v1378_v50, 8.0 }
 0x9da   :  { %v1381_v54 = vadd.f32 %v1379_v53, %v1378_v50  ;;  %v3967_v23 = vsel %vm1382_vm13, 1.0, %v4904_v38  ;;  %v1649_v48 = vpop.f32.mrf.mxu1 }
 0x9db   :  { %v1650_v53 = vadd.f32 %v4737_v49, %v1649_v48 }
 0x9dc   :  { %vm1383_vm4 = vcmp.le.f32.partialorder %v1381_v54, 8.0  ;;  %v4739_v54 = vld [vmem:[%s6247_s15 + $0x2] ss:$0 sm:$0xff] }
 0x9dd   :  { %v3968_v58 = vsel %vm1383_vm4, 1.0, %v4904_v38 }
 0x9de   :  { %v1389_v55 = vmul.f32 %v3968_v58, %v1295_v29 }
 0x9df   :  { %v1784_v50 = vpop.f32.mrf.mxu0 }
 0xa40   :  { %v1302_v57 = vpop.xlane.xlu1 %1301 }
 0xa41   :  { %v1306_v59 = vsub.f32 %v1298_v31, %v1302_v57  ;;  %v1305_v60 = vpop.xlane.xlu2 %1304 }
 0xa42   :  { %v1307_v61 = vsub.f32 %v1299_v36, %v1305_v60  ;;  %v1388_v36 = vmul.f32 %v3967_v23, %v5547_v27  ;;  %v4740_v60 = vld [vmem:[%s6247_s15 + $0x3] ss:$0 sm:$0xff] }
 0xa43   :  { %v1308_v62 = vmul.f32 1.442695, %v1306_v59  ;;  %v1785_v59 = vadd.f32 %v4739_v54, %v1784_v50 }
 0xa44   :  { %v1310_v63 = vmul.f32 1.442695, %v1307_v61 }
 0xa45   :  { %4807 = vpow2.f32 %v1308_v62 }
 0xa46   :  { %4809 = vpow2.f32 %v1310_v63 }
 0xa4b   :  { %v4808_v7 = vpop.eup %4807 }
 0xa4c   :  { %v4810_v0 = vpop.eup %4809  ;;  %v1312_v2 = vsel %vm1175_vm3, %v4808_v7, 0.0 }
 0xa4d   :  { %1313 = vadd.xlane.f32.xlu0 %v1312_v2  ;;  %v1315_v3 = vsel %vm1175_vm3, %v4810_v0, 0.0 }
 0xa4e   :  { %1316 = vadd.xlane.f32.xlu1 %v1315_v3 }
 0xac0   :  { %v1314_v56 = vpop.xlane.xlu0 %1313 }
 0xac1   :  { %4811 = vrcp.f32 %v1314_v56  ;;  %v1317_v6 = vpop.xlane.xlu1 %1316  ;;  %v1329_v15 = vand.u32 2147483648, %v1314_v56  ;;  %v1327_v12 = vand.u32 2147483647, %v1314_v56  ;;  %vm1323_vm11 = vweird.f32 %v1314_v56 }
 0xac2   :  { %4813 = vrcp.f32 %v1317_v6  ;;  %v1344_v19 = vand.u32 2147483648, %v1317_v6  ;;  %v1342_v21 = vand.u32 2147483647, %v1317_v6  ;;  %vm1338_vm5 = vweird.f32 %v1317_v6 }
 0xac3   :  { %v1330_v28 = vor.u32 1.1754944e-38, %v1329_v15  ;;  %vm1328_vm1 = vcmp.eq.f32.partialorder %v1327_v12, 8.507059e+37  ;;  %v1918_v12 = vadd.f32 %v4740_v60, %v1917_v46 }
 0xac4   :  { %v1345_v31 = vor.u32 1.1754944e-38, %v1344_v19  ;;  %vm1343_vm14 = vcmp.eq.f32.partialorder %v1342_v21, 8.507059e+37 }
 0xac7   :  { %v4812_v5 = vpop.eup %4811 }
 0xac8   :  { %v4814_v8 = vpop.eup %4813  ;;  %v1319_v9 = vmul.f32 %v4812_v5, %v1314_v56  ;;  %vm1324_vm15 = vweird.f32 %v4812_v5 }
 0xac9   :  { %v1334_v11 = vmul.f32 %v4814_v8, %v1317_v6  ;;  %vm1339_vm2 = vweird.f32 %v4814_v8  ;;  %vm1325_vm4 = vmor %vm1323_vm11, %vm1324_vm15 }
 0xaca   :  { %v1320_v13 = vsub.f32 1.0, %v1319_v9  ;;  %vm1340_vm12 = vmor %vm1338_vm5, %vm1339_vm2 }
 0xacb   :  { %v1335_v16 = vsub.f32 1.0, %v1334_v11  ;;  %v1511_v11 = vadd.f32 %v4736_v14, %v5472_v25 }
 0xacc   :  { %v1321_v17 = vmul.f32 %v4812_v5, %v1320_v13  ;;  %v1783_v13 = vadd.f32 %v4739_v54, %v1782_v45 }
 0xacd   :  { %v1336_v20 = vmul.f32 %v4814_v8, %v1335_v16 }
 0xace   :  { %v1322_v22 = vadd.f32 %v4812_v5, %v1321_v17 }
 0xacf   :  { %v1337_v29 = vadd.f32 %v4814_v8, %v1336_v20 }
 0xad0   :  { %v1326_v30 = vsel %vm1325_vm4, %v4812_v5, %v1322_v22 }
 0xad1   :  { %v1341_v32 = vsel %vm1340_vm12, %v4814_v8, %v1337_v29  ;;  %v1331_v33 = vsel %vm1328_vm1, %v1330_v28, %v1326_v30  ;;  %v1648_v8 = vadd.f32 %v4737_v49, %v1647_v43 }
 0xad2   :  { %v1332_v39 = vmul.f32 %v4808_v7, %v1331_v33  ;;  %v1346_v40 = vsel %vm1343_vm14, %v1345_v31, %v1341_v32 }
 0xad3   :  { %v1347_v41 = vmul.f32 %v4810_v0, %v1346_v40 }
 0xad4   :  { %v1390_v42 = vmul.f32 %v1388_v36, %v1332_v39 }
 0xad5   :  { %v1391_v51 = vmul.f32 %v1389_v55, %v1347_v41  ;;  %v1919_v55 = vpop.f32.mrf.mxu3 }
 0xad6   :  { %1653 = vperm.xlu1 %4669, %v1390_v42   ;;  %1517 = vperm.xlu2 %4667, %v1390_v42   ;;  %v1920_v7 = vadd.f32 %v4740_v60, %v1919_v55  ;;  %v4728_v60 = vld [vmem:[%s6300_s25 + $0x1] ss:$0 sm:$0xff]  ;;  %s6307_s25 = smov 96  }
 0xad7   :  { %1522 = vperm.xlu0 %4668, %v1391_v51  }
 0xade   :  { %4670 = vset.pattern.permute.xlu1 %v4901_v37  ;;  %4672 = vset.pattern.permute.xlu2 %v4900_v4 }
 0xadf   :  { %1788 = vperm.xlu1 %4670, %v1390_v42   ;;  %1657 = vperm.xlu2 %4672, %v1391_v51  }
 0xae0   :  { %4713 = vset.pattern.permute.xlu0 %v4900_v4 }
 0xae7   :  { %4671 = vset.pattern.permute.xlu1 %v4903_v26  ;;  %4673 = vset.pattern.permute.xlu2 %v4901_v37 }
 0xae8   :  { %1923 = vperm.xlu1 %4671, %v1390_v42   ;;  %1792 = vperm.xlu2 %4673, %v1391_v51  }
 0xaf0   :  { %4674 = vset.pattern.permute.xlu2 %v4903_v26  ;;  %4711 = vset.pattern.permute.xlu1 %v4901_v37 }
 0xaf1   :  { %1927 = vperm.xlu2 %4674, %v1391_v51  }
 0xaf9   :  { %4710 = vset.pattern.permute.xlu2 %v4900_v4 }
 0xb30   :  { %v1518_v27 = vpop.permute.xlu2 %1517 }
 0xb31   :  { %v1525_v16 = vmul.f32 %v1518_v27, %v1511_v11  ;;  %v4579_v27 = vld [vmem:[%s6299_s0 + $0x18] sm:$0xff] }
 0xb32   :  { %2021 = vmatpush.bf16.msra.mxu1 %v4579_v27 }
 0xb39   :  { %v1658_v44 = vpop.permute.xlu2 %1657 }
 0xb3a   :  { %v1661_v61 = vmul.f32 %v1658_v44, %v1650_v53  ;;  %v4578_v44 = vld [vmem:[%s6299_s0 + $0x10] sm:$0xff] }
 0xb3b   :  { %2022 = vmatpush.bf16.msra.mxu1 %v4578_v44 }
 0xb42   :  { %v1793_v47 = vpop.permute.xlu2 %1792 }
 0xb43   :  { %v1796_v0 = vmul.f32 %v1793_v47, %v1785_v59 }
 0xb48   :  { %v1654_v58 = vpop.permute.xlu1 %1653 }
 0xb49   :  { %v1523_v57 = vpop.permute.xlu0 %1522  ;;  %v1660_v15 = vmul.f32 %v1654_v58, %v1648_v8 }
 0xb4a   :  { %v1526_v62 = vmul.f32 %v1523_v57, %v1513_v52 }
 0xb4b   :  { %v1928_v63 = vpop.permute.xlu2 %1927  ;;  %v1662_v19 = vadd.f32 %v1660_v15, %v1525_v16 }
 0xb4c   :  { %v1663_v2 = vadd.f32 %v1661_v61, %v1526_v62  ;;  %v1931_v3 = vmul.f32 %v1928_v63, %v1920_v7  ;;  %v4729_v7 = vld [vmem:[%s6301_s3 + $0x1] ss:$0 sm:$0xff]  ;;  %s6310_s3 = smov 112  }
 0xb4e   :  { %v1798_v18 = vadd.f32 %v1796_v0, %v1663_v2 }
 0xb50   :  { %v1933_v56 = vadd.f32 %v1931_v3, %v1798_v18 }
 0xb51   :  { %v1789_v6 = vpop.permute.xlu1 %1788 }
 0xb52   :  { %v5592_v5 = vadd.f32 %v1933_v56, %v5262_v1  ;;  %v1795_v17 = vmul.f32 %v1789_v6, %v1783_v13 }
 0xb54   :  { %v1943_v9 = vsel %vm6284_vm0, %v5592_v5, 0.0  ;;  %v1797_v21 = vadd.f32 %v1795_v17, %v1662_v19 }
 0xb55   :  { %1944 = vadd.xlane.f32.xlu1 %v1943_v9 }
 0xb5a   :  { %v1924_v20 = vpop.permute.xlu1 %1923 }
 0xb5b   :  { %v1930_v22 = vmul.f32 %v1924_v20, %v1918_v12  ;;  %v4879_v20 = vld [vmem:[%s6302_s29] sm:$0xff] }
 0xb5d   :  { %v1932_v23 = vadd.f32 %v1930_v22, %v1797_v21  ;;  %v4880_v21 = vld [vmem:[%s6302_s29 + $0x8] sm:$0xff]  ;;  %v4881_v22 = vld [vmem:[%s6302_s29 + $0x10] sm:$0xff] }
 0xb5f   :  { %v5598_v1 = vadd.f32 %v1932_v23, %v5255_v35  ;;  %v4882_v23 = vld [vmem:[%s6302_s29 + $0x18] sm:$0xff] }
 0xb61   :  { %v1940_v28 = vsel %vm6284_vm0, %v5598_v1, 0.0 }
 0xb62   :  { %1941 = vadd.xlane.f32.xlu0 %v1940_v28  ;;  %v4883_v28 = vld [vmem:[%s6302_s29 + $0x20] sm:$0xff] }
 0xbc8   :  { %v1945_v29 = vpop.xlane.xlu1 %1944 }
 0xbc9   :  { %v1947_v25 = vmul.f32 %v1945_v29, %v5040_v10  ;;  %v4884_v29 = vld [vmem:[%s6302_s29 + $0x28] sm:$0xff]  ;;  %s6311_s29 = smov 120  }
 0xbcb   :  { %v1949_v30 = vsub.f32 %v5592_v5, %v1947_v25 }
 0xbcd   :  { %v1951_v31 = vmul.f32 %v1949_v30, %v1949_v30 }
 0xbcf   :  { %v1955_v32 = vsel %vm6284_vm0, %v1951_v31, 0.0 }
 0xbd0   :  { %1956 = vadd.xlane.f32.xlu0 %v1955_v32 }
 0xbd5   :  { %v1942_v33 = vpop.xlane.xlu0 %1941 }
 0xbd6   :  { %v1946_v36 = vmul.f32 %v1942_v33, %v5040_v10 }
 0xbd8   :  { %v1948_v39 = vsub.f32 %v5598_v1, %v1946_v36 }
 0xbda   :  { %v1950_v35 = vmul.f32 %v1948_v39, %v1948_v39 }
 0xbdc   :  { %v1952_v40 = vsel %vm6284_vm0, %v1950_v35, 0.0 }
 0xbdd   :  { %1953 = vadd.xlane.f32.xlu2 %v1952_v40 }
 0xc43   :  { %v1957_v41 = vpop.xlane.xlu0 %1956 }
 0xc44   :  { %v1959_v42 = vmul.f32 %v1957_v41, %v5040_v10 }
 0xc46   :  { %v1961_v51 = vadd.f32 1e-05, %v1959_v42 }
 0xc48   :  { %4815 = vrsqrt.f32 %v1961_v51  ;;  %vm1978_vm12 = vweird.f32 %v1961_v51 }
 0xc4e   :  { %v4816_v43 = vpop.eup %4815 }
 0xc4f   :  { %v1973_v45 = vmul.f32 %v4816_v43, %v1961_v51  ;;  %vm1979_vm14 = vweird.f32 %v4816_v43 }
 0xc50   :  { %v1954_v46 = vpop.xlane.xlu2 %1953  ;;  %vm1980_vm1 = vmor %vm1978_vm12, %vm1979_vm14 }
 0xc51   :  { %v1974_v47 = vmul.f32 %v4816_v43, %v1973_v45  ;;  %v1958_v48 = vmul.f32 %v1954_v46, %v5040_v10 }
 0xc53   :  { %v1960_v14 = vadd.f32 1e-05, %v1958_v48  ;;  %v1975_v49 = vmul.f32 0.5, %v1974_v47 }
 0xc55   :  { %4817 = vrsqrt.f32 %v1960_v14  ;;  %v1976_v50 = vsub.f32 1.5, %v1975_v49  ;;  %vm1968_vm13 = vweird.f32 %v1960_v14 }
 0xc57   :  { %v1977_v53 = vmul.f32 %v4816_v43, %v1976_v50 }
 0xc59   :  { %v1981_v55 = vsel %vm1980_vm1, %v4816_v43, %v1977_v53 }
 0xc5a   :  { %v1983_v61 = vmul.f32 %v1981_v55, %v1949_v30 }
 0xc5b   :  { %v4818_v52 = vpop.eup %4817 }
 0xc5c   :  { %v1963_v54 = vmul.f32 %v4818_v52, %v1960_v14  ;;  %vm1969_vm5 = vweird.f32 %v4818_v52  ;;  %v1988_v0 = vmul.f32 %v4728_v60, %v1983_v61 }
 0xc5d   :  { %vm1970_vm15 = vmor %vm1968_vm13, %vm1969_vm5 }
 0xc5e   :  { %v1964_v58 = vmul.f32 %v4818_v52, %v1963_v54  ;;  %v1993_v3 = vadd.f32 %v4729_v7, %v1988_v0 }
 0xc60   :  { %v1965_v57 = vmul.f32 0.5, %v1964_v58 }
 0xc62   :  { %v1966_v59 = vsub.f32 1.5, %v1965_v57 }
 0xc64   :  { %v1967_v62 = vmul.f32 %v4818_v52, %v1966_v59 }
 0xc66   :  { %v1971_v63 = vsel %vm1970_vm15, %v4818_v52, %v1967_v62 }
 0xc67   :  { %v1982_v2 = vmul.f32 %v1971_v63, %v1948_v39 }
 0xc69   :  { %v1987_v18 = vmul.f32 %v4728_v60, %v1982_v2 }
 0xc6b   :  { %v1992_v56 = vadd.f32 %v4729_v7, %v1987_v18 }
 0xc6d   :  { %v1994_v6 = vpack.c.bf16 %v1993_v3, %v1992_v56 }
 0xc6f   :  { %4213 = vmatmul.msk.bf16.vlgmr.msra.gmra.mxu1 %vm6284_vm0, %v1994_v6 }
 0xcec   :  { %v2024_v8 = vpop.f32.mrf.mxu1 }
 0xcf4   :  { %v2026_v9 = vpop.f32.mrf.mxu1 }
 0xcf5   :  { %v4680_v11 = vpack.i.bf16 %v2024_v8, %v2026_v9 }
 0xcf7   :  { %4681 = vrot.lane.b32.xlu2 %v4680_v11, %s6307_s25  ;;  %4676 = vrot.lane.b32.xlu1 %v4680_v11, %s6308_s4  ;;  %s6309_s4 = smov 104  }
 0xd51   :  { %v4682_v16 = vpop.permute.xlu2 %4681 }
 0xd52   :  { %v4683_v12 = vunpack.i.l.bf16 %v4682_v16  ;;  %v4684_v19 = vunpack.i.h.bf16 %v4682_v16 }
 0xd69   :  { %v4677_v13 = vpop.permute.xlu1 %4676 }
 0xd6a   :  { %v4678_v15 = vunpack.i.l.bf16 %v4677_v13  ;;  %v4679_v17 = vunpack.i.h.bf16 %v4677_v13 }
 0xd6c   :  { %2053 = vmatpush.msrb.mxu0 %v4678_v15 }
 0xd6e   :  { %2054 = vmatpush.msrb.mxu0 %v4679_v17 }
 0xd70   :  { %2055 = vmatpush.msrb.mxu0 %v4683_v12 }
 0xd72   :  { %2056 = vmatpush.msrb.mxu0 %v4684_v19 }
 0xd74   :  { %2057 = vmatpush.msrb.mxu0 %v2026_v9 }
 0xd76   :  { %2058 = vmatpush.msrb.mxu0 %v2024_v8 }
 0xd77   :  { %4214 = vmatmul.msk.f32.vlgmr.msrb.gmra.mxu0 %vm212_vm8, %v4879_v20 }
 0xd7f   :  { %4215 = vmatmul.msk.f32.gmra.mxu0 %vm212_vm8, %v4880_v21 }
 0xd87   :  { %4216 = vmatmul.msk.f32.gmra.mxu0 %vm212_vm8, %v4881_v22 }
 0xd8f   :  { %4217 = vmatmul.msk.f32.gmra.mxu0 %vm212_vm8, %v4882_v23 }
 0xd97   :  { %4218 = vmatmul.msk.f32.gmra.mxu0 %vm212_vm8, %v4883_v28 }
 0xd9f   :  { %4219 = vmatmul.msk.f32.gmra.mxu0 %vm212_vm8, %v4884_v29 }
 0xdf4   :  { %v2060_v25 = vpop.f32.mrf.mxu0 }
 0xdf5   :  { %v2138_v39 = vpack.c.bf16 %v2060_v25, %v2060_v25 }
 0xdfc   :  { %v2063_v30 = vpop.f32.mrf.mxu0 }
 0xdfd   :  { %v2139_v51 = vpack.c.bf16 %v2063_v30, %v2063_v30  ;;  %v4690_v27 = vpack.i.bf16 %v2063_v30, %v2060_v25 }
 0xe04   :  { %v2066_v31 = vpop.f32.mrf.mxu0 }
 0xe05   :  { %2112 = vrot.lane.b32.xlu1 %v2066_v31, %s6309_s4  ;;  %2106 = vrot.lane.b32.xlu2 %v2066_v31, %s6310_s3  ;;  %v2146_v32 = vpack.c.bf16 %v2066_v31, %v2066_v31 }
 0xe07   :  { %v2158_v33 = vsel %vm342_vm9, %v2146_v32, 0 }
 0xe08   :  { %2167 = vmatpush.bf16.xpose.msrb.mxu2 %v2158_v33 }
 0xe0c   :  { %v2069_v36 = vpop.f32.mrf.mxu0 }
 0xe0d   :  { %2088 = vrot.lane.b32.xlu1 %v2063_v30, %s6310_s3  ;;  %v4700_v35 = vpack.i.bf16 %v2069_v36, %v2060_v25  ;;  %v4685_v40 = vpack.i.bf16 %v2069_v36, %v2066_v31  ;;  %v2147_v41 = vpack.c.bf16 %v2069_v36, %v2069_v36 }
 0xe0f   :  { %4220 = vmatmul.msk.bf16.vlgmr.msrb.gmra.mxu2 %vm342_vm9, %v2138_v39  ;;  %4701 = vrot.lane.b32.xlu2 %v4700_v35, %s6309_s4  ;;  %v2177_v42 = vsel %vm342_vm9, %v2147_v41, 0 }
 0xe10   :  { %4686 = vrot.lane.b32.xlu0 %v4685_v40, %s6311_s29  ;;  %2186 = vmatpush.bf16.xpose.msrb.mxu1 %v2177_v42 }
 0xe17   :  { %4221 = vmatmul.msk.bf16.vlgmr.msrb.gmra.mxu1 %vm342_vm9, %v2139_v51 }
 0xe18   :  { %4691 = vrot.lane.b32.xlu0 %v4690_v27, %s6311_s29 }
 0xe20   :  { %4696 = vrot.lane.b32.xlu0 %v4700_v35, %s6310_s3 }
 0xe28   :  { %2094 = vrot.lane.b32.xlu0 %v2063_v30, %s6309_s4 }
 0xe5f   :  { %v2107_v44 = vpop.permute.xlu2 %2106 }
 0xe60   :  { %v2150_v43 = vpack.c.bf16 %v2107_v44, %v2107_v44 }
 0xe62   :  { %v2234_v45 = vsel %vm342_vm9, %v2150_v43, 0 }
 0xe63   :  { %2243 = vmatpush.bf16.xpose.msra.mxu1 %v2234_v45 }
 0xe69   :  { %v4702_v46 = vpop.permute.xlu2 %4701 }
 0xe6a   :  { %v4704_v47 = vunpack.i.h.bf16 %v4702_v46  ;;  %v4703_v16 = vunpack.i.l.bf16 %v4702_v46 }
 0xe6c   :  { %v2153_v48 = vpack.c.bf16 %v4704_v47, %v4704_v47  ;;  %v2144_v20 = vpack.c.bf16 %v4703_v16, %v4703_v16 }
 0xe6e   :  { %v2291_v14 = vsel %vm342_vm9, %v2153_v48, 0 }
 0xe6f   :  { %2300 = vmatpush.bf16.xpose.msrb.mxu1 %v2291_v14 }
 0xe77   :  { %v2113_v49 = vpop.permute.xlu1 %2112 }
 0xe78   :  { %v2152_v54 = vpack.c.bf16 %v2113_v49, %v2113_v49 }
 0xe7a   :  { %v2272_v60 = vsel %vm342_vm9, %v2152_v54, 0 }
 0xe7f   :  { %v2089_v17 = vpop.permute.xlu1 %2088 }
 0xe80   :  { %v2143_v21 = vpack.c.bf16 %v2089_v17, %v2089_v17 }
 0xe82   :  { %v4687_v50 = vpop.permute.xlu0 %4686 }
 0xe83   :  { %v4689_v52 = vunpack.i.h.bf16 %v4687_v50  ;;  %v4688_v53 = vunpack.i.l.bf16 %v4687_v50 }
 0xe85   :  { %v2149_v58 = vpack.c.bf16 %v4689_v52, %v4689_v52  ;;  %v2148_v55 = vpack.c.bf16 %v4688_v53, %v4688_v53 }
 0xe87   :  { %v2196_v57 = vsel %vm342_vm9, %v2148_v55, 0  ;;  %v2215_v59 = vsel %vm342_vm9, %v2149_v58, 0 }
 0xe88   :  { %2205 = vmatpush.bf16.xpose.msra.mxu2 %v2196_v57  ;;  %2224 = vmatpush.bf16.xpose.msra.mxu3 %v2215_v59 }
 0xe8a   :  { %v4692_v61 = vpop.permute.xlu0 %4691 }
 0xe8b   :  { %v4694_v62 = vunpack.i.h.bf16 %v4692_v61  ;;  %v4693_v63 = vunpack.i.l.bf16 %v4692_v61 }
 0xe8d   :  { %v2141_v7 = vpack.c.bf16 %v4694_v62, %v4694_v62  ;;  %v2140_v0 = vpack.c.bf16 %v4693_v63, %v4693_v63 }
 0xe8f   :  { %4222 = vmatmul.msk.bf16.vlgmr.msra.gmra.mxu2 %vm342_vm9, %v2140_v0  ;;  %4223 = vmatmul.msk.bf16.vlgmr.msra.gmra.mxu3 %vm342_vm9, %v2141_v7 }
 0xe90   :  { %2281 = vmatpush.bf16.xpose.msrb.mxu3 %v2272_v60  ;;  %v5691_v60 = vpop.f32.mrf.mxu0 }
 0xe92   :  { %v4697_v2 = vpop.permute.xlu0 %4696  ;;  %v2169_v18 = vpop.f32.mrf.mxu2 }
 0xe93   :  { %v4699_v3 = vunpack.i.h.bf16 %v4697_v2  ;;  %v4698_v56 = vunpack.i.l.bf16 %v4697_v2  ;;  %v2306_v36 = vmul.f32 0.35355338, %v2169_v18 }
 0xe94   :  { %v2188_v6 = vpop.f32.mrf.mxu1 }
 0xe95   :  { %v2151_v8 = vpack.c.bf16 %v4699_v3, %v4699_v3  ;;  %v2142_v9 = vpack.c.bf16 %v4698_v56, %v4698_v56  ;;  %v2307_v11 = vmul.f32 0.35355338, %v2188_v6  ;;  %v2314_v42 = vsel %vm342_vm9, %v2306_v36, -inf }
 0xe97   :  { %4224 = vmatmul.msk.bf16.vlgmr.msra.gmra.mxu1 %vm342_vm9, %v2142_v9  ;;  %v2253_v13 = vsel %vm342_vm9, %v2151_v8, 0  ;;  %v2317_v15 = vsel %vm342_vm9, %v2307_v11, -inf }
 0xe98   :  { %2262 = vmatpush.bf16.xpose.msrb.mxu2 %v2253_v13  ;;  %2318 = vmax.xlane.f32.xlu1 %v2317_v15  ;;  %v5693_v61 = vpop.f32.mrf.mxu0  ;;  %v2514_v13 = vpack.c.bf16 %v5691_v60, %v5691_v60 }
 0xe99   :  { %v4705_v62 = vpack.i.bf16 %v5693_v61, %v5691_v60  ;;  %v2515_v8 = vpack.c.bf16 %v5693_v61, %v5693_v61 }
 0xe9a   :  { %v2171_v12 = vpop.f32.mrf.mxu2  ;;  %v2095_v22 = vpop.permute.xlu0 %2094  ;;  %v2526_v16 = vsel %vm6285_vm10, %v2514_v13, 0 }
 0xe9b   :  { %v2145_v23 = vpack.c.bf16 %v2095_v22, %v2095_v22  ;;  %2535 = vmatpush.bf16.msra.mxu0 %v2526_v16 }
 0xe9c   :  { %v2190_v19 = vpop.f32.mrf.mxu1 }
 0xe9f   :  { %4225 = vmatmul.msk.bf16.vlgmr.msrb.gmra.mxu2 %vm342_vm9, %v2143_v21  ;;  %4226 = vmatmul.msk.bf16.vlgmr.msrb.gmra.mxu3 %vm342_vm9, %v2144_v20 }
 0xea7   :  { %4227 = vmatmul.msk.bf16.vlgmr.msrb.gmra.mxu1 %vm342_vm9, %v2145_v23 }
 0xf0b   :  { %v2319_v40 = vpop.xlane.xlu1 %2318 }
 0xf0c   :  { %v2339_v51 = vsub.f32 %v2307_v11, %v2319_v40  ;;  %v2545_v11 = vsel %vm6285_vm10, %v2515_v8, 0 }
 0xf0d   :  { %2554 = vmatpush.bf16.msra.mxu2 %v2545_v11 }
 0xf0e   :  { %v2348_v27 = vmul.f32 1.442695, %v2339_v51 }
 0xf10   :  { %4819 = vpow2.f32 %v2348_v27 }
 0xf12   :  { %v2207_v28 = vpop.f32.mrf.mxu2  ;;  %v2226_v29 = vpop.f32.mrf.mxu3 }
 0xf13   :  { %v5674_v25 = vmul.f32 0.35355338, %v2207_v28  ;;  %v2309_v30 = vmul.f32 0.35355338, %v2226_v29 }
 0xf14   :  { %v2245_v31 = vpop.f32.mrf.mxu1 }
 0xf15   :  { %v2323_v32 = vsel %vm342_vm9, %v2309_v30, -inf  ;;  %v2320_v33 = vsel %vm342_vm9, %v5674_v25, -inf  ;;  %v2310_v52 = vmul.f32 0.35355338, %v2245_v31 }
 0xf16   :  { %2324 = vmax.xlane.f32.xlu0 %v2323_v32  ;;  %2321 = vmax.xlane.f32.xlu2 %v2320_v33  ;;  %v5686_v58 = vpop.eup %4819 }
 0xf17   :  { %v2326_v57 = vsel %vm342_vm9, %v2310_v52, -inf  ;;  %v2365_v59 = vsel %vm342_vm9, %v5686_v58, 0.0 }
 0xf1a   :  { %v2209_v39 = vpop.f32.mrf.mxu2  ;;  %v2228_v35 = vpop.f32.mrf.mxu3 }
 0xf1c   :  { %v2247_v41 = vpop.f32.mrf.mxu1 }
 0xf1e   :  { %2315 = vmax.xlane.f32.xlu2 %v2314_v42 }
 0xf22   :  { %v2264_v44 = vpop.f32.mrf.mxu2  ;;  %v2283_v43 = vpop.f32.mrf.mxu3 }
 0xf23   :  { %v5680_v45 = vmul.f32 0.35355338, %v2264_v44  ;;  %v2312_v46 = vmul.f32 0.35355338, %v2283_v43 }
 0xf24   :  { %v2302_v47 = vpop.f32.mrf.mxu1 }
 0xf25   :  { %v2313_v48 = vmul.f32 0.35355338, %v2302_v47  ;;  %v2329_v14 = vsel %vm342_vm9, %v5680_v45, -inf  ;;  %v2332_v49 = vsel %vm342_vm9, %v2312_v46, -inf }
 0xf26   :  { %2330 = vmax.xlane.f32.xlu2 %v2329_v14  ;;  %2333 = vmax.xlane.f32.xlu1 %v2332_v49 }
 0xf27   :  { %v2335_v50 = vsel %vm342_vm9, %v2313_v48, -inf }
 0xf28   :  { %2336 = vmax.xlane.f32.xlu0 %v2335_v50 }
 0xf2a   :  { %v2266_v53 = vpop.f32.mrf.mxu2  ;;  %v2285_v54 = vpop.f32.mrf.mxu3 }
 0xf2c   :  { %v2304_v55 = vpop.f32.mrf.mxu1 }
 0xf2e   :  { %2327 = vmax.xlane.f32.xlu1 %v2326_v57 }
 0xf30   :  { %2366 = vadd.xlane.f32.xlu0 %v2365_v59 }
 0xf44   :  { %4706 = vrot.lane.b32.xlu0 %v4705_v62, %s6311_s29  ;;  %s6320_s29 = smov 124  }
 0xf4c   :  { %2128 = vrot.lane.b32.xlu0 %v5693_v61, %s6310_s3 }
 0xf54   :  { %2126 = vrot.lane.b32.xlu0 %v5691_v60, %s6310_s3 }
 0xf89   :  { %v2325_v63 = vpop.xlane.xlu0 %2324  ;;  %v2322_v7 = vpop.xlane.xlu2 %2321 }
 0xf8a   :  { %v2341_v0 = vsub.f32 %v2309_v30, %v2325_v63  ;;  %v2340_v31 = vsub.f32 %v5674_v25, %v2322_v7 }
 0xf8c   :  { %v2352_v2 = vmul.f32 1.442695, %v2341_v0  ;;  %v2350_v39 = vmul.f32 1.442695, %v2340_v31 }
 0xf8e   :  { %4821 = vpow2.f32 %v2352_v2 }
 0xf91   :  { %v2316_v18 = vpop.xlane.xlu2 %2315 }
 0xf92   :  { %v2338_v3 = vsub.f32 %v2306_v36, %v2316_v18 }
 0xf94   :  { %v5700_v56 = vpop.eup %4821  ;;  %v2346_v6 = vmul.f32 1.442695, %v2338_v3 }
 0xf95   :  { %v2371_v9 = vsel %vm342_vm9, %v5700_v56, 0.0 }
 0xf96   :  { %4823 = vpow2.f32 %v2346_v6  ;;  %2372 = vadd.xlane.f32.xlu1 %v2371_v9 }
 0xf99   :  { %v2334_v15 = vpop.xlane.xlu1 %2333  ;;  %v2331_v35 = vpop.xlane.xlu2 %2330 }
 0xf9a   :  { %v2344_v20 = vsub.f32 %v2312_v46, %v2334_v15  ;;  %v2343_v25 = vsub.f32 %v5680_v45, %v2331_v35 }
 0xf9b   :  { %v2337_v17 = vpop.xlane.xlu0 %2336 }
 0xf9c   :  { %v5712_v12 = vpop.eup %4823  ;;  %v2345_v19 = vsub.f32 %v2313_v48, %v2337_v17  ;;  %v2358_v23 = vmul.f32 1.442695, %v2344_v20  ;;  %v2356_v14 = vmul.f32 1.442695, %v2343_v25 }
 0xf9d   :  { %v2362_v21 = vsel %vm342_vm9, %v5712_v12, 0.0 }
 0xf9e   :  { %v2360_v22 = vmul.f32 1.442695, %v2345_v19  ;;  %2363 = vadd.xlane.f32.xlu2 %v2362_v21 }
 0xfa0   :  { %4825 = vpow2.f32 %v2360_v22 }
 0xfa1   :  { %v2328_v28 = vpop.xlane.xlu1 %2327 }
 0xfa2   :  { %v2342_v29 = vsub.f32 %v2310_v52, %v2328_v28 }
 0xfa3   :  { %v2367_v30 = vpop.xlane.xlu0 %2366 }
 0xfa4   :  { %v2354_v32 = vmul.f32 1.442695, %v2342_v29  ;;  %4827 = vrcp.f32 %v2367_v30  ;;  %v2412_v43 = vand.u32 2147483648, %v2367_v30  ;;  %v2410_v47 = vand.u32 2147483647, %v2367_v30 }
 0xfa5   :  { %4829 = vpow2.f32 %v2358_v23  ;;  %vm2406_vm2 = vweird.f32 %v2367_v30 }
 0xfa6   :  { %v5717_v33 = vpop.eup %4825  ;;  %4831 = vpow2.f32 %v2354_v32  ;;  %v2413_v45 = vor.u32 1.1754944e-38, %v2412_v43  ;;  %vm2411_vm4 = vcmp.eq.f32.partialorder %v2410_v47, 8.507059e+37 }
 0xfa7   :  { %v2383_v36 = vsel %vm342_vm9, %v5717_v33, 0.0  ;;  %4833 = vpow2.f32 %v2350_v39 }
 0xfa8   :  { %2384 = vadd.xlane.f32.xlu1 %v2383_v36  ;;  %4835 = vpow2.f32 %v2356_v14 }
 0xfaa   :  { %v4828_v40 = vpop.eup %4827 }
 0xfab   :  { %v5721_v41 = vpop.eup %4829  ;;  %v2402_v42 = vmul.f32 %v4828_v40, %v2367_v30  ;;  %vm2407_vm8 = vweird.f32 %v4828_v40 }
 0xfac   :  { %v5723_v51 = vpop.eup %4831  ;;  %v2380_v48 = vsel %vm342_vm9, %v5721_v41, 0.0  ;;  %vm2408_vm11 = vmor %vm2406_vm2, %vm2407_vm8 }
 0xfad   :  { %v2403_v27 = vsub.f32 1.0, %v2402_v42  ;;  %v2374_v44 = vsel %vm342_vm9, %v5723_v51, 0.0  ;;  %v5730_v50 = vpop.eup %4833 }
 0xfae   :  { %2375 = vadd.xlane.f32.xlu2 %v2374_v44  ;;  %v2368_v55 = vsel %vm342_vm9, %v5730_v50, 0.0  ;;  %v5736_v59 = vpop.eup %4835 }
 0xfaf   :  { %v2404_v46 = vmul.f32 %v4828_v40, %v2403_v27  ;;  %v2377_v62 = vsel %vm342_vm9, %v5736_v59, 0.0 }
 0xfb0   :  { %2381 = vadd.xlane.f32.xlu1 %v2380_v48 }
 0xfb1   :  { %v2405_v49 = vadd.f32 %v4828_v40, %v2404_v46 }
 0xfb3   :  { %v2409_v52 = vsel %vm2408_vm11, %v4828_v40, %v2405_v49 }
 0xfb4   :  { %v2414_v53 = vsel %vm2411_vm4, %v2413_v45, %v2409_v52 }
 0xfb5   :  { %v2415_v54 = vmul.f32 %v5686_v58, %v2414_v53 }
 0xfb6   :  { %2369 = vadd.xlane.f32.xlu2 %v2368_v55  ;;  %v4707_v58 = vpop.permute.xlu0 %4706 }
 0xfb7   :  { %v2507_v57 = vpack.c.bf16 %v2415_v54, %v2415_v54  ;;  %v4709_v63 = vunpack.i.h.bf16 %v4707_v58  ;;  %v4708_v3 = vunpack.i.l.bf16 %v4707_v58 }
 0xfb9   :  { %4229 = vmatmul.msk.bf16.vlgmr.msra.gmra.mxu2 %vm342_vm9, %v2507_v57  ;;  %v2517_v7 = vpack.c.bf16 %v4709_v63, %v4709_v63  ;;  %v2516_v13 = vpack.c.bf16 %v4708_v3, %v4708_v3 }
 0xfbb   :  { %v2583_v0 = vsel %vm6285_vm10, %v2517_v7, 0  ;;  %v2564_v20 = vsel %vm6285_vm10, %v2516_v13, 0 }
 0xfbc   :  { %2592 = vmatpush.bf16.msra.mxu1 %v2583_v0  ;;  %2573 = vmatpush.bf16.msra.mxu3 %v2564_v20 }
 0xfbe   :  { %2378 = vadd.xlane.f32.xlu2 %v2377_v62  ;;  %v2129_v2 = vpop.permute.xlu0 %2128 }
 0xfbf   :  { %v2519_v9 = vpack.c.bf16 %v2129_v2, %v2129_v2 }
 0xfc6   :  { %v2127_v6 = vpop.permute.xlu0 %2126 }
 0xfc7   :  { %v2518_v8 = vpack.c.bf16 %v2127_v6, %v2127_v6 }
 0xfc9   :  { %2132 = vrot.lane.b32.xlu1 %v5691_v60, %s6309_s4  ;;  %v2602_v60 = vsel %vm6285_vm10, %v2518_v8, 0 }
 0xfca   :  { %2611 = vmatpush.bf16.msrb.mxu0 %v2602_v60 }
 0xfd6   :  { %2134 = vrot.lane.b32.xlu2 %v5693_v61, %s6309_s4  ;;  %v2621_v61 = vsel %vm6285_vm10, %v2519_v9, 0 }
 0xfd7   :  { %2630 = vmatpush.bf16.msrb.mxu2 %v2621_v61 }
0x1009   :  { %v2373_v18 = vpop.xlane.xlu1 %2372 }
0x100a   :  { %4837 = vrcp.f32 %v2373_v18  ;;  %v2442_v19 = vand.u32 2147483648, %v2373_v18  ;;  %v2440_v22 = vand.u32 2147483647, %v2373_v18  ;;  %vm2436_vm12 = vweird.f32 %v2373_v18 }
0x100c   :  { %v2443_v29 = vor.u32 1.1754944e-38, %v2442_v19  ;;  %vm2441_vm5 = vcmp.eq.f32.partialorder %v2440_v22, 8.507059e+37 }
0x1010   :  { %v4838_v11 = vpop.eup %4837 }
0x1011   :  { %v2432_v15 = vmul.f32 %v4838_v11, %v2373_v18  ;;  %v2364_v16 = vpop.xlane.xlu2 %2363  ;;  %vm2437_vm14 = vweird.f32 %v4838_v11 }
0x1012   :  { %4839 = vrcp.f32 %v2364_v16  ;;  %vm2438_vm1 = vmor %vm2436_vm12, %vm2437_vm14  ;;  %v2397_v40 = vand.u32 2147483648, %v2364_v16  ;;  %v2395_v27 = vand.u32 2147483647, %v2364_v16  ;;  %vm2391_vm15 = vweird.f32 %v2364_v16 }
0x1013   :  { %v2433_v17 = vsub.f32 1.0, %v2432_v15 }
0x1014   :  { %v2398_v43 = vor.u32 1.1754944e-38, %v2397_v40  ;;  %vm2396_vm2 = vcmp.eq.f32.partialorder %v2395_v27, 8.507059e+37 }
0x1015   :  { %v2434_v21 = vmul.f32 %v4838_v11, %v2433_v17 }
0x1017   :  { %v2435_v23 = vadd.f32 %v4838_v11, %v2434_v21 }
0x1018   :  { %v4840_v28 = vpop.eup %4839 }
0x1019   :  { %v2439_v30 = vsel %vm2438_vm1, %v4838_v11, %v2435_v23  ;;  %v2387_v31 = vmul.f32 %v4840_v28, %v2364_v16  ;;  %vm2392_vm13 = vweird.f32 %v4840_v28 }
0x101a   :  { %v2444_v32 = vsel %vm2441_vm5, %v2443_v29, %v2439_v30  ;;  %vm2393_vm8 = vmor %vm2391_vm15, %vm2392_vm13 }
0x101b   :  { %v2445_v36 = vmul.f32 %v5700_v56, %v2444_v32  ;;  %v2388_v39 = vsub.f32 1.0, %v2387_v31  ;;  %v5749_v35 = vpop.xlane.xlu1 %2384 }
0x101c   :  { %4841 = vrcp.f32 %v5749_v35  ;;  %v2502_v6 = vand.u32 2147483648, %v5749_v35  ;;  %vm2496_vm5 = vweird.f32 %v5749_v35  ;;  %v2500_v60 = vand.u32 2147483647, %v5749_v35 }
0x101d   :  { %v2509_v42 = vpack.c.bf16 %v2445_v36, %v2445_v36  ;;  %v2389_v25 = vmul.f32 %v4840_v28, %v2388_v39 }
0x101e   :  { %v2503_v20 = vor.u32 1.1754944e-38, %v2502_v6 }
0x101f   :  { %v2390_v44 = vadd.f32 %v4840_v28, %v2389_v25  ;;  %4231 = vmatmul.msk.bf16.vlgmr.msra.gmra.mxu1 %vm342_vm9, %v2509_v42 }
0x1021   :  { %v2394_v46 = vsel %vm2393_vm8, %v4840_v28, %v2390_v44  ;;  %v2376_v47 = vpop.xlane.xlu2 %2375  ;;  %vm2501_vm8 = vcmp.eq.f32.partialorder %v2500_v60, 8.507059e+37 }
0x1022   :  { %v4842_v56 = vpop.eup %4841  ;;  %v2399_v48 = vsel %vm2396_vm2, %v2398_v43, %v2394_v46  ;;  %4843 = vrcp.f32 %v2376_v47  ;;  %v2457_v63 = vand.u32 2147483648, %v2376_v47  ;;  %vm2451_vm4 = vweird.f32 %v2376_v47 }
0x1023   :  { %v2400_v14 = vmul.f32 %v5712_v12, %v2399_v48  ;;  %v2492_v49 = vmul.f32 %v4842_v56, %v5749_v35  ;;  %v5755_v52 = vpop.xlane.xlu1 %2381  ;;  %v2455_v12 = vand.u32 2147483647, %v2376_v47  ;;  %vm2497_vm14 = vweird.f32 %v4842_v56 }
0x1024   :  { %4845 = vrcp.f32 %v5755_v52  ;;  %v2458_v8 = vor.u32 1.1754944e-38, %v2457_v63  ;;  %vm2498_vm13 = vmor %vm2496_vm5, %vm2497_vm14 }
0x1025   :  { %v2506_v45 = vpack.c.bf16 %v2400_v14, %v2400_v14  ;;  %v2493_v54 = vsub.f32 1.0, %v2492_v49  ;;  %vm2456_vm1 = vcmp.eq.f32.partialorder %v2455_v12, 8.507059e+37 }
0x1027   :  { %4228 = vmatmul.msk.bf16.vlgmr.msra.gmra.mxu0 %vm342_vm9, %v2506_v45  ;;  %v2494_v58 = vmul.f32 %v4842_v56, %v2493_v54 }
0x1028   :  { %v4844_v53 = vpop.eup %4843 }
0x1029   :  { %v2447_v55 = vmul.f32 %v4844_v53, %v2376_v47  ;;  %v2370_v57 = vpop.xlane.xlu2 %2369  ;;  %vm2452_vm11 = vweird.f32 %v4844_v53  ;;  %v2495_v3 = vadd.f32 %v4842_v56, %v2494_v58  ;;  %v2485_v58 = vand.u32 2147483647, %v5755_v52 }
0x102a   :  { %4847 = vrcp.f32 %v2370_v57  ;;  %v5759_v0 = vpop.eup %4845  ;;  %vm2453_vm12 = vmor %vm2451_vm4, %vm2452_vm11  ;;  %v2427_v21 = vand.u32 2147483648, %v2370_v57  ;;  %v2425_v28 = vand.u32 2147483647, %v2370_v57  ;;  %vm2421_vm2 = vweird.f32 %v2370_v57 }
0x102b   :  { %v2448_v62 = vsub.f32 1.0, %v2447_v55  ;;  %v2477_v61 = vmul.f32 %v5759_v0, %v5755_v52  ;;  %v2499_v19 = vsel %vm2498_vm13, %v4842_v56, %v2495_v3  ;;  %vm2481_vm13 = vweird.f32 %v5755_v52 }
0x102c   :  { %v2504_v29 = vsel %vm2501_vm8, %v2503_v20, %v2499_v19  ;;  %vm2426_vm4 = vcmp.eq.f32.partialorder %v2425_v28, 8.507059e+37  ;;  %v4886_v28 = vld [vmem:[%s6303_s7 + $0x8] sm:$0xff] }
0x102d   :  { %v2449_v7 = vmul.f32 %v4844_v53, %v2448_v62  ;;  %v2478_v30 = vsub.f32 1.0, %v2477_v61  ;;  %v2505_v40 = vmul.f32 %v5717_v33, %v2504_v29  ;;  %v4887_v29 = vld [vmem:[%s6303_s7 + $0x10] sm:$0xff] }
0x102f   :  { %v2450_v2 = vadd.f32 %v4844_v53, %v2449_v7  ;;  %v2479_v27 = vmul.f32 %v5759_v0, %v2478_v30  ;;  %v2513_v54 = vpack.c.bf16 %v2505_v40, %v2505_v40  ;;  %v4888_v30 = vld [vmem:[%s6303_s7 + $0x18] sm:$0xff]  ;;  %v4245_v40 = vld [vmem:[%s6304_s28 + $0x14] sm:$0xf] }
0x1030   :  { %v4848_v18 = vpop.eup %4847 }
0x1031   :  { %v2454_v9 = vsel %vm2453_vm12, %v4844_v53, %v2450_v2  ;;  %v2417_v11 = vmul.f32 %v4848_v18, %v2370_v57  ;;  %v2379_v13 = vpop.xlane.xlu2 %2378  ;;  %vm2422_vm15 = vweird.f32 %v4848_v18  ;;  %v2480_v55 = vadd.f32 %v5759_v0, %v2479_v27  ;;  %v4248_v27 = vld [vmem:[%s6304_s28 + $0x18] sm:$0xf] }
0x1032   :  { %v2459_v15 = vsel %vm2456_vm1, %v2458_v8, %v2454_v9  ;;  %4849 = vrcp.f32 %v2379_v13  ;;  %vm2423_vm11 = vmor %vm2421_vm2, %vm2422_vm15  ;;  %v2472_v47 = vand.u32 2147483648, %v2379_v13  ;;  %v2470_v53 = vand.u32 2147483647, %v2379_v13 }
0x1033   :  { %v2460_v16 = vmul.f32 %v5723_v51, %v2459_v15  ;;  %v2418_v17 = vsub.f32 1.0, %v2417_v11  ;;  %v2428_v51 = vor.u32 1.1754944e-38, %v2427_v21  ;;  %vm2482_vm12 = vweird.f32 %v5759_v0 }
0x1034   :  { %vm2466_vm1 = vweird.f32 %v2379_v13  ;;  %v2487_v57 = vand.u32 2147483648, %v5755_v52  ;;  %v2473_v62 = vor.u32 1.1754944e-38, %v2472_v47  ;;  %vm2471_vm15 = vcmp.eq.f32.partialorder %v2470_v53, 8.507059e+37  ;;  %vm2483_vm8 = vmor %vm2481_vm13, %vm2482_vm12 }
0x1035   :  { %v2510_v22 = vpack.c.bf16 %v2460_v16, %v2460_v16  ;;  %v2419_v23 = vmul.f32 %v4848_v18, %v2418_v17  ;;  %v2484_v12 = vsel %vm2483_vm8, %v5759_v0, %v2480_v55  ;;  %vm2486_vm2 = vcmp.eq.f32.partialorder %v2485_v58, 8.507059e+37 }
0x1037   :  { %v2420_v31 = vadd.f32 %v4848_v18, %v2419_v23  ;;  %4232 = vmatmul.msk.bf16.vlgmr.msrb.gmra.mxu0 %vm342_vm9, %v2510_v22  ;;  %v4885_v23 = vld [vmem:[%s6303_s7] sm:$0xff] }
0x1038   :  { %v4850_v32 = vpop.eup %4849 }
0x1039   :  { %v2424_v36 = vsel %vm2423_vm11, %v4848_v18, %v2420_v31  ;;  %v2462_v39 = vmul.f32 %v4850_v32, %v2379_v13  ;;  %v2135_v35 = vpop.permute.xlu2 %2134  ;;  %vm2467_vm14 = vweird.f32 %v4850_v32  ;;  %v2488_v18 = vor.u32 1.1754944e-38, %v2487_v57  ;;  %v4889_v31 = vld [vmem:[%s6303_s7 + $0x20] sm:$0xff] }
0x103a   :  { %v2429_v42 = vsel %vm2426_vm4, %v2428_v51, %v2424_v36  ;;  %v2521_v25 = vpack.c.bf16 %v2135_v35, %v2135_v35  ;;  %vm2468_vm5 = vmor %vm2466_vm1, %vm2467_vm14  ;;  %vm6312_vm11 = vcmask 523264   ;;  %v4891_v51 = vld [vmem:[%s6303_s7 + $0x30] sm:$0xff]  ;;  %v4892_v36 = vld [vmem:[%s6303_s7 + $0x38] sm:$0xff] }
0x103b   :  { %v2430_v44 = vmul.f32 %v5730_v50, %v2429_v42  ;;  %v2463_v43 = vsub.f32 1.0, %v2462_v39  ;;  %v2133_v46 = vpop.permute.xlu1 %2132  ;;  %v2489_v8 = vsel %vm2486_vm2, %v2488_v18, %v2484_v12  ;;  %vm6313_vm4 = vmmov %vm6312_vm11  ;;  %v4244_v39 = vld [vmem:[%s6304_s28 + $0x10] sm:$0xf]  ;;  %v2725_v42 = vsel %vm6285_vm10, %v4245_v40, 0 }
0x103c   :  { %v2659_v56 = vsel %vm6285_vm10, %v2521_v25, 0  ;;  %v2520_v48 = vpack.c.bf16 %v2133_v46, %v2133_v46  ;;  %v2556_v14 = vpop.f32.mrf.mxu2  ;;  %v2490_v9 = vmul.f32 %v5721_v41, %v2489_v8  ;;  %vm6314_vm14 = vmmov %vm6313_vm4  ;;  %v2745_v35 = vsel %vm6285_vm10, %v4244_v39, 0  ;;  %2734 = vmatpush.bf16.msra.mxu2 %v2725_v42  ;;  %v4591_v39 = vld [vmem:[%s6244_s12 + $0x58] sm:$0xff] }
0x103d   :  { %v2508_v49 = vpack.c.bf16 %v2430_v44, %v2430_v44  ;;  %v2464_v45 = vmul.f32 %v4850_v32, %v2463_v43  ;;  %2668 = vmatpush.bf16.msrb.mxu1 %v2659_v56  ;;  %vm6315_vm12 = vmmov %vm6313_vm4  ;;  %v2768_v43 = vsel %vm6285_vm10, %v4248_v27, 0  ;;  %v4250_v56 = vld [vmem:[%s6304_s28 + $0x1c] sm:$0xf] }
0x103e   :  { %v2640_v33 = vsel %vm6285_vm10, %v2520_v48, 0  ;;  %v2512_v11 = vpack.c.bf16 %v2490_v9, %v2490_v9  ;;  %vm6316_vm1 = vmmov %vm6313_vm4  ;;  %v2793_v48 = vsel %vm6285_vm10, %v4250_v56, 0 }
0x103f   :  { %v2465_v50 = vadd.f32 %v4850_v32, %v2464_v45  ;;  %4230 = vmatmul.msk.bf16.vlgmr.msra.gmra.mxu3 %vm342_vm9, %v2508_v49  ;;  %vm6318_vm13 = vmmov %vm6316_vm1 }
0x1040   :  { %2649 = vmatpush.bf16.msrb.mxu3 %v2640_v33  ;;  %4235 = vmatmul.msk.bf16.vlgmr.msrb.gmra.mxu1 %vm342_vm9, %v2513_v54 }
0x1041   :  { %v2469_v63 = vsel %vm2468_vm5, %v4850_v32, %v2465_v50  ;;  %v4890_v32 = vld [vmem:[%s6303_s7 + $0x28] sm:$0xff]  ;;  %vm6317_vm5 = vmmov %vm6316_vm1  ;;  %2777 = vmatpush.bf16.msra.mxu1 %v2768_v43 }
0x1042   :  { %v2474_v7 = vsel %vm2471_vm15, %v2473_v62, %v2469_v63  ;;  %vm6319_vm15 = vmmov %vm6316_vm1 }
0x1043   :  { %v2475_v2 = vmul.f32 %v5736_v59, %v2474_v7 }
0x1044   :  { %v2558_v3 = vpop.f32.mrf.mxu2  ;;  %2754 = vmatpush.bf16.msra.mxu3 %v2745_v35  ;;  %v4590_v35 = vld [vmem:[%s6244_s12 + $0x50] sm:$0xff] }
0x1045   :  { %v2511_v6 = vpack.c.bf16 %v2475_v2, %v2475_v2 }
0x1047   :  { %4233 = vmatmul.msk.bf16.vlgmr.msrb.gmra.mxu2 %vm342_vm9, %v2511_v6 }
0x1048   :  { %2802 = vmatpush.bf16.msrb.mxu2 %v2793_v48 }
0x104f   :  { %4234 = vmatmul.msk.bf16.vlgmr.msrb.gmra.mxu3 %vm342_vm9, %v2512_v11 }
0x109c   :  { %v2594_v52 = vpop.f32.mrf.mxu1 }
0x10a4   :  { %v2537_v13 = vpop.f32.mrf.mxu0  ;;  %v2596_v60 = vpop.f32.mrf.mxu1 }
0x10ac   :  { %v2539_v15 = vpop.f32.mrf.mxu0 }
0x10b4   :  { %v2613_v16 = vpop.f32.mrf.mxu0 }
0x10bc   :  { %v2615_v0 = vpop.f32.mrf.mxu0 }
0x10bd   :  { %v2670_v61 = vpop.f32.mrf.mxu1 }
0x10be   :  { %2682 = vmatpush.msra.mxu0 %v2670_v61 }
0x10c2   :  { %v2575_v59 = vpop.f32.mrf.mxu3 }
0x10c5   :  { %v2672_v17 = vpop.f32.mrf.mxu1 }
0x10ca   :  { %v2577_v19 = vpop.f32.mrf.mxu3  ;;  %v2632_v20 = vpop.f32.mrf.mxu2 }
0x10d2   :  { %v2634_v21 = vpop.f32.mrf.mxu2  ;;  %v2651_v22 = vpop.f32.mrf.mxu3 }
0x10d3   :  { %2683 = vmatpush.msra.mxu0 %v2651_v22 }
0x10d5   :  { %2684 = vmatpush.msra.mxu0 %v2632_v20 }
0x10d7   :  { %2685 = vmatpush.msra.mxu0 %v2613_v16 }
0x10d9   :  { %2686 = vmatpush.msra.mxu0 %v2594_v52 }
0x10da   :  { %v2653_v41 = vpop.f32.mrf.mxu3 }
0x10db   :  { %2687 = vmatpush.msra.mxu0 %v2575_v59  ;;  %v4257_v41 = vld [vmem:[%s6243_s10 + $0x38] sm:$0xff] }
0x10dc   :  { %2899 = vmatpush.msrb.mxu3 %v4257_v41  ;;  %v4593_v41 = vld [vmem:[%s6245_s14 + $0x148] sm:$0xff] }
0x10dd   :  { %2688 = vmatpush.msra.mxu0 %v2556_v14 }
0x10df   :  { %2689 = vmatpush.msra.mxu0 %v2537_v13 }
0x10e0   :  { %4236 = vmatmul.msk.f32.vlgmr.msra.gmra.mxu0 %vm6312_vm11, %v4885_v23  ;;  %v4256_v23 = vld [vmem:[%s6243_s10 + $0x30] sm:$0xff] }
0x10e1   :  { %2900 = vmatpush.msrb.mxu3 %v4256_v23  ;;  %v4607_v23 = vld [vmem:[%s6245_s14 + $0x1a8] sm:$0xff] }
0x10e8   :  { %4237 = vmatmul.msk.f32.gmra.mxu0 %vm6313_vm4, %v4886_v28  ;;  %v4255_v28 = vld [vmem:[%s6243_s10 + $0x28] sm:$0xff] }
0x10e9   :  { %2901 = vmatpush.msrb.mxu3 %v4255_v28  ;;  %v4592_v28 = vld [vmem:[%s6245_s14 + $0x140] sm:$0xff] }
0x10f0   :  { %4238 = vmatmul.msk.f32.gmra.mxu0 %vm6314_vm14, %v4887_v29  ;;  %v4254_v29 = vld [vmem:[%s6243_s10 + $0x20] sm:$0xff]  ;;  %s6343_s10 = sld [smem:[#allocation14_spill]] }
0x10f1   :  { %2902 = vmatpush.msrb.mxu3 %v4254_v29  ;;  %v4606_v29 = vld [vmem:[%s6245_s14 + $0x1a0] sm:$0xff] }
0x10f8   :  { %4239 = vmatmul.msk.f32.gmra.mxu0 %vm6315_vm12, %v4888_v30  ;;  %v4581_v30 = vld [vmem:[%s6244_s12 + $0x48] sm:$0xff] }
0x10f9   :  { %3205 = vmatpush.bf16.msrb.mxu1 %v4581_v30  ;;  %v4611_v30 = vld [vmem:[%s6244_s12 + $0x78] sm:$0xff] }
0x1100   :  { %4240 = vmatmul.msk.f32.gmra.mxu0 %vm6316_vm1, %v4889_v31 }
0x1108   :  { %4241 = vmatmul.msk.f32.gmra.mxu0 %vm6317_vm5, %v4890_v32 }
0x1110   :  { %4242 = vmatmul.msk.f32.gmra.mxu0 %vm6318_vm13, %v4891_v51  ;;  %v4580_v51 = vld [vmem:[%s6244_s12 + $0x40] sm:$0xff] }
0x1111   :  { %3206 = vmatpush.bf16.msrb.mxu1 %v4580_v51  ;;  %v4610_v51 = vld [vmem:[%s6244_s12 + $0x70] sm:$0xff] }
0x1118   :  { %4243 = vmatmul.msk.f32.gmra.mxu0 %vm6319_vm15, %v4892_v36 }
0x115d   :  { %v2691_v25 = vpop.f32.mrf.mxu0 }
0x1165   :  { %v2694_v44 = vpop.f32.mrf.mxu0 }
0x1166   :  { %v2715_v46 = vpack.c.bf16 %v2694_v44, %v2691_v25 }
0x1168   :  { %4247 = vmatmul.msk.bf16.vlgmr.msra.gmra.mxu3 %vm342_vm9, %v2715_v46 }
0x1169   :  { %3342 = vmatpush.bf16.msra.mxu3 %v4591_v39 }
0x116d   :  { %v2697_v47 = vpop.f32.mrf.mxu0  ;;  %3343 = vmatpush.bf16.msra.mxu3 %v4590_v35 }
0x1175   :  { %v2700_v14 = vpop.f32.mrf.mxu0 }
0x1176   :  { %v2718_v49 = vpack.c.bf16 %v2700_v14, %v2697_v47 }
0x1178   :  { %4246 = vmatmul.msk.bf16.vlgmr.msra.gmra.mxu2 %vm342_vm9, %v2718_v49  ;;  %v4741_v49 = vld [vmem:[%s6305_s8 + $0x1] ss:$0 sm:$0xff] }
0x117d   :  { %v2703_v45 = vpop.f32.mrf.mxu0 }
0x1185   :  { %v2706_v53 = vpop.f32.mrf.mxu0 }
0x1186   :  { %v2761_v54 = vpack.c.bf16 %v2706_v53, %v2703_v45 }
0x1188   :  { %4249 = vmatmul.msk.bf16.vlgmr.msra.gmra.mxu1 %vm342_vm9, %v2761_v54  ;;  %v4742_v54 = vld [vmem:[%s6306_s9 + $0x1] ss:$0 sm:$0xff] }
0x118d   :  { %v2709_v33 = vpop.f32.mrf.mxu0 }
0x1195   :  { %v2712_v55 = vpop.f32.mrf.mxu0 }
0x1196   :  { %v2786_v50 = vpack.c.bf16 %v2712_v55, %v2709_v33 }
0x1198   :  { %4251 = vmatmul.msk.bf16.vlgmr.msrb.gmra.mxu2 %vm342_vm9, %v2786_v50 }
0x11eb   :  { %v2756_v58 = vpop.f32.mrf.mxu3 }
0x11f3   :  { %v2758_v6 = vpop.f32.mrf.mxu3 }
0x11fb   :  { %v2736_v57 = vpop.f32.mrf.mxu2 }
0x11fc   :  { %v2757_v7 = vadd.f32 %v2756_v58, %v2736_v57 }
0x1203   :  { %v2738_v62 = vpop.f32.mrf.mxu2 }
0x1204   :  { %v2759_v9 = vadd.f32 %v2758_v6, %v2738_v62  ;;  %v4601_v62 = vld [vmem:[%s6244_s12 + $0x68] sm:$0xff]  ;;  %v4588_v6 = vld [vmem:[%s6245_s14 + $0x130] sm:$0xff] }
0x1205   :  { %v2779_v63 = vpop.f32.mrf.mxu1 }
0x1206   :  { %v2784_v12 = vadd.f32 %v2779_v63, %v2757_v7  ;;  %v4589_v7 = vld [vmem:[%s6245_s14 + $0x138] sm:$0xff] }
0x1207   :  { %3286 = vmatpush.bf16.msra.mxu2 %v4589_v7 }
0x120b   :  { %3287 = vmatpush.bf16.msra.mxu2 %v4588_v6 }
0x120d   :  { %v2781_v8 = vpop.f32.mrf.mxu1 }
0x120e   :  { %v2785_v52 = vadd.f32 %v2781_v8, %v2759_v9 }
0x121b   :  { %v2804_v2 = vpop.f32.mrf.mxu2 }
0x121c   :  { %v2809_v18 = vadd.f32 %v2804_v2, %v2784_v12  ;;  %v4600_v2 = vld [vmem:[%s6244_s12 + $0x60] sm:$0xff] }
0x121e   :  { %v5838_v3 = vadd.f32 %v2809_v18, %v5598_v1 }
0x1220   :  { %v2817_v11 = vsel %vm6284_vm0, %v5838_v3, 0.0 }
0x1221   :  { %2818 = vadd.xlane.f32.xlu0 %v2817_v11  ;;  %v4587_v11 = vld [vmem:[%s6245_s14 + $0x128] sm:$0xff] }
0x1222   :  { %3288 = vmatpush.bf16.msra.mxu2 %v4587_v11 }
0x1223   :  { %v2806_v13 = vpop.f32.mrf.mxu2 }
0x1224   :  { %v2810_v60 = vadd.f32 %v2806_v13, %v2785_v52  ;;  %v4586_v13 = vld [vmem:[%s6245_s14 + $0x120] sm:$0xff] }
0x1226   :  { %v5843_v15 = vadd.f32 %v2810_v60, %v5592_v5  ;;  %v4599_v60 = vld [vmem:[%s6245_s14 + $0x178] sm:$0xff]  ;;  %3289 = vmatpush.bf16.msra.mxu2 %v4586_v13 }
0x1227   :  { %3423 = vmatpush.bf16.msra.mxu1 %v4599_v60 }
0x1228   :  { %v2820_v16 = vsel %vm6284_vm0, %v5843_v15, 0.0 }
0x1229   :  { %2821 = vadd.xlane.f32.xlu1 %v2820_v16  ;;  %v4585_v16 = vld [vmem:[%s6245_s14 + $0x118] sm:$0xff] }
0x122a   :  { %3290 = vmatpush.bf16.msra.mxu2 %v4585_v16 }
0x1294   :  { %v2819_v0 = vpop.xlane.xlu0 %2818 }
0x1295   :  { %v2823_v1 = vmul.f32 %v2819_v0, %v5040_v10  ;;  %v4598_v0 = vld [vmem:[%s6245_s14 + $0x170] sm:$0xff] }
0x1296   :  { %3424 = vmatpush.bf16.msra.mxu1 %v4598_v0 }
0x1297   :  { %v2825_v61 = vsub.f32 %v5838_v3, %v2823_v1  ;;  %v4584_v1 = vld [vmem:[%s6245_s14 + $0x110] sm:$0xff] }
0x1298   :  { %3291 = vmatpush.bf16.msra.mxu2 %v4584_v1 }
0x1299   :  { %v2827_v59 = vmul.f32 %v2825_v61, %v2825_v61 }
0x129b   :  { %v2829_v17 = vsel %vm6284_vm0, %v2827_v59, 0.0  ;;  %v4583_v59 = vld [vmem:[%s6245_s14 + $0x108] sm:$0xff] }
0x129c   :  { %2830 = vadd.xlane.f32.xlu2 %v2829_v17  ;;  %v2822_v19 = vpop.xlane.xlu1 %2821  ;;  %v4596_v17 = vld [vmem:[%s6245_s14 + $0x160] sm:$0xff]  ;;  %3292 = vmatpush.bf16.msra.mxu2 %v4583_v59 }
0x129d   :  { %v2824_v20 = vmul.f32 %v2822_v19, %v5040_v10  ;;  %v4582_v19 = vld [vmem:[%s6245_s14 + $0x100] sm:$0xff] }
0x129f   :  { %v2826_v21 = vsub.f32 %v5843_v15, %v2824_v20  ;;  %v4595_v20 = vld [vmem:[%s6245_s14 + $0x158] sm:$0xff] }
0x12a0   :  { %3293 = vmatpush.bf16.msra.mxu2 %v4582_v19  ;;  %v4746_v19 = vld [vmem:[%s6246_s13 + $0x6] ss:$0 sm:$0xff] }
0x12a1   :  { %v2828_v5 = vmul.f32 %v2826_v21, %v2826_v21 }
0x12a3   :  { %v2832_v22 = vsel %vm6284_vm0, %v2828_v5, 0.0  ;;  %v4594_v5 = vld [vmem:[%s6245_s14 + $0x150] sm:$0xff] }
0x12a4   :  { %2833 = vadd.xlane.f32.xlu0 %v2832_v22  ;;  %v4608_v22 = vld [vmem:[%s6245_s14 + $0x1b0] sm:$0xff]  ;;  %3612 = vmatpush.bf16.msrb.mxu2 %v4611_v30 }
0x12a5   :  { %v4618_v30 = vld [vmem:[%s6245_s14 + $0x1f0] sm:$0xff] }
0x12a8   :  { %3613 = vmatpush.bf16.msrb.mxu2 %v4610_v51  ;;  %v4614_v51 = vld [vmem:[%s6245_s14 + $0x1d0] sm:$0xff] }
0x130f   :  { %v2831_v31 = vpop.xlane.xlu2 %2830 }
0x1310   :  { %v2835_v32 = vmul.f32 %v2831_v31, %v5040_v10  ;;  %v4743_v31 = vld [vmem:[%s6242_s11 + $0x1] ss:$0 sm:$0xff] }
0x1312   :  { %v2837_v36 = vadd.f32 1e-05, %v2835_v32  ;;  %v4605_v32 = vld [vmem:[%s6245_s14 + $0x198] sm:$0xff] }
0x1314   :  { %4851 = vrsqrt.f32 %v2837_v36  ;;  %vm2845_vm8 = vweird.f32 %v2837_v36 }
0x1317   :  { %v2834_v40 = vpop.xlane.xlu0 %2833 }
0x1318   :  { %v2836_v42 = vmul.f32 %v2834_v40, %v5040_v10  ;;  %v4604_v40 = vld [vmem:[%s6245_s14 + $0x190] sm:$0xff] }
0x131a   :  { %v4852_v25 = vpop.eup %4851  ;;  %v2838_v27 = vadd.f32 1e-05, %v2836_v42 }
0x131b   :  { %v2840_v44 = vmul.f32 %v4852_v25, %v2837_v36  ;;  %vm2846_vm9 = vweird.f32 %v4852_v25 }
0x131c   :  { %4853 = vrsqrt.f32 %v2838_v27  ;;  %vm2847_vm2 = vmor %vm2845_vm8, %vm2846_vm9  ;;  %vm2855_vm4 = vweird.f32 %v2838_v27  ;;  %vm6321_vm8 = vcmp.lt.s32.totalorder %v5489_v34, 2 }
0x131d   :  { %v2841_v43 = vmul.f32 %v4852_v25, %v2840_v44  ;;  %v4744_v44 = vld [vmem:[%s6246_s13 + $0x4] ss:$0 sm:$0xff] }
0x131f   :  { %v2842_v46 = vmul.f32 0.5, %v2841_v43  ;;  %v4603_v43 = vld [vmem:[%s6245_s14 + $0x188] sm:$0xff] }
0x1321   :  { %v2843_v47 = vsub.f32 1.5, %v2842_v46 }
0x1322   :  { %v4854_v56 = vpop.eup %4853 }
0x1323   :  { %v2844_v48 = vmul.f32 %v4852_v25, %v2843_v47  ;;  %v2850_v14 = vmul.f32 %v4854_v56, %v2838_v27  ;;  %vm2856_vm11 = vweird.f32 %v4854_v56 }
0x1324   :  { %vm2857_vm14 = vmor %vm2855_vm4, %vm2856_vm11 }
0x1325   :  { %v2848_v45 = vsel %vm2847_vm2, %v4852_v25, %v2844_v48  ;;  %v2851_v53 = vmul.f32 %v4854_v56, %v2850_v14  ;;  %v4602_v14 = vld [vmem:[%s6245_s14 + $0x180] sm:$0xff] }
0x1326   :  { %v2859_v33 = vmul.f32 %v2848_v45, %v2825_v61  ;;  %v4597_v61 = vld [vmem:[%s6245_s14 + $0x168] sm:$0xff] }
0x1327   :  { %v2852_v55 = vmul.f32 0.5, %v2851_v53  ;;  %3425 = vmatpush.bf16.msra.mxu1 %v4597_v61 }
0x1328   :  { %v2864_v50 = vmul.f32 %v4741_v49, %v2859_v33 }
0x1329   :  { %v2853_v57 = vsub.f32 1.5, %v2852_v55 }
0x132a   :  { %v2869_v58 = vadd.f32 %v4742_v54, %v2864_v50 }
0x132b   :  { %v2854_v63 = vmul.f32 %v4854_v56, %v2853_v57  ;;  %3426 = vmatpush.bf16.msra.mxu1 %v4596_v17 }
0x132c   :  { %4259 = vmatmul.msk.f32.vlgmr.msrb.gmra.mxu3 %vm6284_vm0, %v2869_v58 }
0x132d   :  { %v2858_v12 = vsel %vm2857_vm14, %v4854_v56, %v2854_v63  ;;  %3477 = vmatpush.bf16.msrb.mxu3 %v4601_v62  ;;  %v4745_v63 = vld [vmem:[%s6246_s13 + $0x5] ss:$0 sm:$0xff] }
0x132e   :  { %v2860_v18 = vmul.f32 %v2858_v12, %v2826_v21  ;;  %v4609_v21 = vld [vmem:[%s6245_s14 + $0x1b8] sm:$0xff] }
0x132f   :  { %3427 = vmatpush.bf16.msra.mxu1 %v4595_v20  ;;  %3558 = vmatpush.bf16.msrb.mxu0 %v4609_v21 }
0x1330   :  { %v2865_v8 = vmul.f32 %v4741_v49, %v2860_v18 }
0x1331   :  { %3478 = vmatpush.bf16.msrb.mxu3 %v4600_v2 }
0x1332   :  { %v2870_v9 = vadd.f32 %v4742_v54, %v2865_v8 }
0x1333   :  { %3428 = vmatpush.bf16.msra.mxu1 %v4594_v5  ;;  %3559 = vmatpush.bf16.msrb.mxu0 %v4608_v22 }
0x1334   :  { %4260 = vmatmul.msk.f32.gmra.mxu3 %vm6284_vm0, %v2870_v9  ;;  %v5902_v52 = vpack.c.bf16 %v2870_v9, %v2869_v58 }
0x1336   :  { %4294 = vmatmul.msk.bf16.vlgmr.msrb.gmra.mxu1 %vm6284_vm0, %v5902_v52 }
0x1337   :  { %3429 = vmatpush.bf16.msra.mxu1 %v4593_v41  ;;  %3560 = vmatpush.bf16.msrb.mxu0 %v4607_v23 }
0x133b   :  { %3430 = vmatpush.bf16.msra.mxu1 %v4592_v28  ;;  %3561 = vmatpush.bf16.msrb.mxu0 %v4606_v29  ;;  %v4619_v29 = vld [vmem:[%s6245_s14 + $0x1f8] sm:$0xff] }
0x133c   :  { %4357 = vmatmul.msk.bf16.vlgmr.msra.gmra.mxu3 %vm6284_vm0, %v5902_v52 }
0x133d   :  { %3693 = vmatpush.bf16.msra.mxu3 %v4619_v29 }
0x133f   :  { %3562 = vmatpush.bf16.msrb.mxu0 %v4605_v32  ;;  %v4615_v32 = vld [vmem:[%s6245_s14 + $0x1d8] sm:$0xff] }
0x1341   :  { %3694 = vmatpush.bf16.msra.mxu3 %v4618_v30 }
0x1343   :  { %3563 = vmatpush.bf16.msrb.mxu0 %v4604_v40 }
0x1347   :  { %3564 = vmatpush.bf16.msrb.mxu0 %v4603_v43 }
0x134b   :  { %3565 = vmatpush.bf16.msrb.mxu0 %v4602_v14  ;;  %v4749_v14 = vld [vmem:[%s6246_s13 + $0x7] ss:$0 sm:$0xff] }
0x134c   :  { %4420 = vmatmul.msk.bf16.vlgmr.msrb.gmra.mxu3 %vm6284_vm0, %v5902_v52 }
0x13af   :  { %v2904_v36 = vpop.f32.mrf.mxu3 }
0x13b0   :  { %v5973_v39 = vadd.f32 %v4743_v31, %v2904_v36  ;;  %v4261_v36 = vld [vmem:[%s6248_s1 + $0x10] sm:$0xff] }
0x13b2   :  { %v2915_v35 = vand.u32 2147483647, %v5973_v39  ;;  %v2913_v8 = vmax.f32 %v5973_v39, 0.0 }
0x13b3   :  { %v3208_v42 = vpop.f32.mrf.mxu1 }
0x13b4   :  { %v2917_v25 = vsub.f32 0.0, %v2915_v35  ;;  %v3209_v56 = vadd.f32 %v4744_v44, %v3208_v42  ;;  %v4613_v35 = vld [vmem:[%s6245_s14 + $0x1c8] sm:$0xff] }
0x13b6   :  { %v2919_v27 = vmul.f32 1.442695, %v2917_v25  ;;  %v3213_v33 = vmax.f32 %v3209_v56, 0.0  ;;  %v4612_v25 = vld [vmem:[%s6245_s14 + $0x1c0] sm:$0xff] }
0x13b7   :  { %v2907_v46 = vpop.f32.mrf.mxu3 }
0x13b8   :  { %4855 = vpow2.f32 %v2919_v27  ;;  %v5985_v47 = vadd.f32 %v4743_v31, %v2907_v46  ;;  %v4616_v31 = vld [vmem:[%s6245_s14 + $0x1e0] sm:$0xff] }
0x13ba   :  { %v2916_v48 = vand.u32 2147483647, %v5985_v47  ;;  %v2914_v59 = vmax.f32 %v5985_v47, 0.0 }
0x13bb   :  { %v3210_v49 = vpop.f32.mrf.mxu1 }
0x13bc   :  { %v2918_v45 = vsub.f32 0.0, %v2916_v48  ;;  %v3211_v53 = vadd.f32 %v4744_v44, %v3210_v49  ;;  %v4262_v44 = vld [vmem:[%s6248_s1 + $0x18] sm:$0xff] }
0x13be   :  { %v4856_v54 = vpop.eup %4855  ;;  %v2921_v55 = vmul.f32 1.442695, %v2918_v45  ;;  %v3214_v50 = vmax.f32 %v3211_v53, 0.0 }
0x13bf   :  { %v3345_v57 = vpop.f32.mrf.mxu3  ;;  %v2923_v62 = vadd.f32 1.0, %v4856_v54 }
0x13c0   :  { %4857 = vpow2.f32 %v2921_v55  ;;  %v3215_v58 = vpack.c.bf16 %v3214_v50, %v3213_v33  ;;  %v3346_v12 = vadd.f32 %v4745_v63, %v3345_v57 }
0x13c1   :  { %4859 = vlog2.f32 %v2923_v62 }
0x13c2   :  { %3294 = vmatmul.bf16.vlgmr.msra.gmra.mxu2 %v3215_v58  ;;  %v3350_v13 = vmax.f32 %v3346_v12, 0.0 }
0x13c6   :  { %v4858_v7 = vpop.eup %4857 }
0x13c7   :  { %v4860_v2 = vpop.eup %4859  ;;  %v3347_v18 = vpop.f32.mrf.mxu3  ;;  %v2924_v6 = vadd.f32 1.0, %v4858_v7 }
0x13c8   :  { %v3348_v9 = vadd.f32 %v4745_v63, %v3347_v18  ;;  %v2926_v11 = vmul.f32 0.6931472, %v4860_v2 }
0x13c9   :  { %4861 = vlog2.f32 %v2924_v6 }
0x13ca   :  { %v3351_v60 = vmax.f32 %v3348_v9, 0.0  ;;  %v2929_v16 = vadd.f32 %v2926_v11, %v2913_v8 }
0x13cc   :  { %v3352_v0 = vpack.c.bf16 %v3351_v60, %v3350_v13  ;;  %2933 = vrot.lane.b32.xlu1 %v2929_v16, %s6320_s29 }
0x13ce   :  { %3431 = vmatmul.bf16.vlgmr.msra.gmra.mxu1 %v3352_v0 }
0x13cf   :  { %v4862_v1 = vpop.eup %4861  ;;  %v3480_v61 = vpop.f32.mrf.mxu3 }
0x13d0   :  { %v2928_v17 = vmul.f32 0.6931472, %v4862_v1  ;;  %v3481_v21 = vadd.f32 %v4746_v19, %v3480_v61 }
0x13d2   :  { %4483 = vmatmul.msk.bf16.vlgmr.msrb.gmra.mxu2 %vm6284_vm0, %v5902_v52  ;;  %v2930_v20 = vadd.f32 %v2928_v17, %v2914_v59  ;;  %v3485_v41 = vmax.f32 %v3481_v21, 0.0  ;;  %v4617_v52 = vld [vmem:[%s6245_s14 + $0x1e8] sm:$0xff] }
0x13d3   :  { %3695 = vmatpush.bf16.msra.mxu3 %v4617_v52 }
0x13d4   :  { %2935 = vrot.lane.b32.xlu0 %v2930_v20, %s6320_s29 }
0x13d7   :  { %v3482_v5 = vpop.f32.mrf.mxu3  ;;  %3696 = vmatpush.bf16.msra.mxu3 %v4616_v31 }
0x13d8   :  { %v3483_v22 = vadd.f32 %v4746_v19, %v3482_v5 }
0x13da   :  { %v3486_v23 = vmax.f32 %v3483_v22, 0.0 }
0x13db   :  { %3697 = vmatpush.bf16.msra.mxu3 %v4615_v32 }
0x13dc   :  { %v3487_v28 = vpack.c.bf16 %v3486_v23, %v3485_v41 }
0x13de   :  { %3566 = vmatmul.bf16.vlgmr.msrb.gmra.mxu0 %v3487_v28 }
0x13df   :  { %3698 = vmatpush.bf16.msra.mxu3 %v4614_v51 }
0x13e3   :  { %3699 = vmatpush.bf16.msra.mxu3 %v4613_v35 }
0x13e7   :  { %3700 = vmatpush.bf16.msra.mxu3 %v4612_v25 }
0x143e   :  { %v2934_v40 = vpop.permute.xlu1 %2933 }
0x143f   :  { %v2939_v42 = vmul.f32 %v4261_v36, %v2934_v40 }
0x1441   :  { %v6031_v27 = vadd.f32 %v2939_v42, %v5973_v39 }
0x1443   :  { %3010 = vperm.xlu1 %4711, %v6031_v27   ;;  %2978 = vperm.xlu2 %4710, %v6031_v27  }
0x1445   :  { %v6038_v43 = vpop.f32.mrf.mxu2 }
0x1446   :  { %v2936_v46 = vpop.permute.xlu0 %2935 }
0x1447   :  { %v2940_v56 = vmul.f32 %v4262_v44, %v2936_v46 }
0x1449   :  { %v6041_v48 = vadd.f32 %v2940_v56, %v5985_v47 }
0x144b   :  { %2982 = vperm.xlu0 %4713, %v6041_v48   ;;  %4712 = vset.pattern.permute.xlu1 %v4902_v24 }
0x144c   :  { %4714 = vset.pattern.permute.xlu2 %v4901_v37  ;;  %2945 = vperm.xlu1 %4712, %v6031_v27  }
0x144d   :  { %3014 = vperm.xlu2 %4714, %v6041_v48   ;;  %v6048_v39 = vpop.f32.mrf.mxu2 }
0x1453   :  { %4716 = vset.pattern.permute.xlu0 %v4903_v26 }
0x1454   :  { %3042 = vperm.xlu0 %4716, %v6031_v27   ;;  %4717 = vset.pattern.permute.xlu1 %v4903_v26 }
0x1455   :  { %4715 = vset.pattern.permute.xlu2 %v4902_v24  ;;  %v3615_v47 = vpop.f32.mrf.mxu2  ;;  %3046 = vperm.xlu1 %4717, %v6041_v48  }
0x1456   :  { %2950 = vperm.xlu2 %4715, %v6041_v48   ;;  %v3616_v49 = vadd.f32 %v4749_v14, %v3615_v47 }
0x1458   :  { %v3620_v54 = vmax.f32 %v3616_v49, 0.0 }
0x145c   :  { %4718 = vset.pattern.permute.xlu0 %v4902_v24 }
0x145d   :  { %v3617_v45 = vpop.f32.mrf.mxu2  ;;  %4721 = vset.pattern.permute.xlu1 %v4902_v24 }
0x145e   :  { %v3618_v53 = vadd.f32 %v4749_v14, %v3617_v45  ;;  %4719 = vset.pattern.permute.xlu2 %v4900_v4 }
0x1460   :  { %v3621_v33 = vmax.f32 %v3618_v53, 0.0 }
0x1462   :  { %v3622_v55 = vpack.c.bf16 %v3621_v33, %v3620_v54 }
0x1464   :  { %3701 = vmatmul.bf16.vlgmr.msra.gmra.mxu3 %v3622_v55 }
0x149d   :  { %v2979_v50 = vpop.permute.xlu2 %2978 }
0x149e   :  { %vm2985_vm12 = vcmp.gt.f32.partialorder %v6031_v27, %v2979_v50  ;;  %vm2987_vm1 = vcmp.eq.f32.partialorder %v6031_v27, %v2979_v50 }
0x149f   :  { %vm2989_vm5 = vmand %vm2987_vm1, %vm1200_vm6 }
0x14a0   :  { %vm2991_vm13 = vmor %vm2985_vm12, %vm2989_vm5 }
0x14a1   :  { %v4267_v57 = vsel %vm2991_vm13, 1.0, %v4904_v38 }
0x14a2   :  { %v2997_v24 = vsel %vm1175_vm3, %v4267_v57, 0.0 }
0x14a3   :  { %2998 = vadd.xlane.f32.xlu0 %v2997_v24 }
0x14a7   :  { %v3015_v62 = vpop.permute.xlu2 %3014 }
0x14a8   :  { %vm3020_vm13 = vcmp.eq.f32.partialorder %v6041_v48, %v3015_v62 }
0x14b0   :  { %v2951_v63 = vpop.permute.xlu2 %2950 }
0x14b1   :  { %vm2954_vm4 = vcmp.gt.f32.partialorder %v6041_v48, %v2951_v63 }
0x14b2   :  { %v4264_v6 = vsel %vm2954_vm4, 1.0, %v4904_v38 }
0x14b3   :  { %v2968_v11 = vsel %vm1175_vm3, %v4264_v6, 0.0 }
0x14b5   :  { %v3011_v58 = vpop.permute.xlu1 %3010 }
0x14b6   :  { %vm3017_vm15 = vcmp.gt.f32.partialorder %v6031_v27, %v3011_v58  ;;  %vm3019_vm9 = vcmp.eq.f32.partialorder %v6031_v27, %v3011_v58 }
0x14b7   :  { %vm3021_vm2 = vmand %vm3019_vm9, %vm6321_vm8  ;;  %vm3018_vm9 = vcmp.gt.f32.partialorder %v6041_v48, %v3015_v62 }
0x14b8   :  { %vm3023_vm11 = vmor %vm3017_vm15, %vm3021_vm2 }
0x14b9   :  { %v4271_v7 = vsel %vm3023_vm11, 1.0, %v4904_v38  ;;  %vm3022_vm2 = vmand %vm3020_vm13, %vm6321_vm8 }
0x14ba   :  { %v3029_v12 = vsel %vm1175_vm3, %v4271_v7, 0.0  ;;  %vm3024_vm4 = vmor %vm3018_vm9, %vm3022_vm2 }
0x14bb   :  { %3030 = vadd.xlane.f32.xlu1 %v3029_v12  ;;  %v4272_v19 = vsel %vm3024_vm4, 1.0, %v4904_v38  ;;  %vm6325_vm4 = vcmask 23552  }
0x14bd   :  { %v2983_v2 = vpop.permute.xlu0 %2982 }
0x14be   :  { %vm2988_vm14 = vcmp.eq.f32.partialorder %v6041_v48, %v2983_v2  ;;  %v2946_v18 = vpop.permute.xlu1 %2945  ;;  %vm2986_vm1 = vcmp.gt.f32.partialorder %v6041_v48, %v2983_v2 }
0x14bf   :  { %vm2953_vm12 = vcmp.gt.f32.partialorder %v6031_v27, %v2946_v18  ;;  %vm2990_vm5 = vmand %vm2988_vm14, %vm1200_vm6  ;;  %vm6322_vm14 = vcmp.lt.s32.totalorder %v5489_v34, 3  ;;  %v3032_v34 = vsel %vm1175_vm3, %v4272_v19, 0.0 }
0x14c0   :  { %v4263_v8 = vsel %vm2953_vm12, 1.0, %v4904_v38  ;;  %vm2992_vm15 = vmor %vm2986_vm1, %vm2990_vm5 }
0x14c1   :  { %v2965_v9 = vsel %vm1175_vm3, %v4263_v8, 0.0  ;;  %v4268_v60 = vsel %vm2992_vm15, 1.0, %v4904_v38  ;;  %vm6323_vm5 = vmmov %vm6322_vm14 }
0x14c2   :  { %2966 = vadd.xlane.f32.xlu2 %v2965_v9  ;;  %v3000_v0 = vsel %vm1175_vm3, %v4268_v60, 0.0 }
0x14c3   :  { %2969 = vadd.xlane.f32.xlu1 %v2968_v11 }
0x14c6   :  { %v3043_v13 = vpop.permute.xlu0 %3042 }
0x14c7   :  { %vm3049_vm6 = vcmp.gt.f32.partialorder %v6031_v27, %v3043_v13  ;;  %vm3051_vm11 = vcmp.eq.f32.partialorder %v6031_v27, %v3043_v13  ;;  %v3047_v16 = vpop.permute.xlu1 %3046 }
0x14c8   :  { %vm3053_vm12 = vmand %vm3051_vm11, %vm6322_vm14  ;;  %vm3050_vm0 = vcmp.gt.f32.partialorder %v6041_v48, %v3047_v16  ;;  %vm3052_vm1 = vcmp.eq.f32.partialorder %v6041_v48, %v3047_v16 }
0x14c9   :  { %vm3054_vm10 = vmand %vm3052_vm1, %vm6323_vm5  ;;  %vm6326_vm1 = vcmask 1040384  }
0x14ca   :  { %3001 = vadd.xlane.f32.xlu2 %v3000_v0  ;;  %vm3055_vm13 = vmor %vm3049_vm6, %vm3053_vm12  ;;  %vm6324_vm6 = vcmask 15360  }
0x14cb   :  { %v4275_v1 = vsel %vm3055_vm13, 1.0, %v4904_v38  ;;  %vm3056_vm15 = vmor %vm3050_vm0, %vm3054_vm10 }
0x14cc   :  { %v3061_v61 = vsel %vm1175_vm3, %v4275_v1, 0.0  ;;  %v4276_v59 = vsel %vm3056_vm15, 1.0, %v4904_v38  ;;  %vm6327_vm13 = vmmov %vm6324_vm6 }
0x14cd   :  { %3062 = vadd.xlane.f32.xlu0 %v3061_v61  ;;  %v3064_v17 = vsel %vm1175_vm3, %v4276_v59, 0.0  ;;  %vm6328_vm15 = vmmov %vm6325_vm4 }
0x14ce   :  { %3065 = vadd.xlane.f32.xlu1 %v3064_v17 }
0x14d2   :  { %3033 = vadd.xlane.f32.xlu2 %v3032_v34 }
0x1516   :  { %v2999_v5 = vpop.xlane.xlu0 %2998 }
0x1517   :  { %vm3003_vm8 = vcmp.lt.f32.partialorder %v2999_v5, 2.0 }
0x1518   :  { %v4269_v28 = vsel %vm3003_vm8, 1.0, %v4904_v38  ;;  %vm6329_vm8 = vcmask 1041408  }
0x152e   :  { %v3031_v20 = vpop.xlane.xlu1 %3030 }
0x152f   :  { %vm3035_vm0 = vcmp.lt.f32.partialorder %v3031_v20, 2.0 }
0x1530   :  { %v4273_v52 = vsel %vm3035_vm0, 1.0, %v4904_v38  ;;  %vm6330_vm0 = vmmov %vm6326_vm1 }
0x1535   :  { %v2967_v21 = vpop.xlane.xlu2 %2966 }
0x1536   :  { %vm2971_vm9 = vcmp.lt.f32.partialorder %v2967_v21, 2.0  ;;  %v2970_v22 = vpop.xlane.xlu1 %2969 }
0x1537   :  { %v4265_v41 = vsel %vm2971_vm9, 1.0, %v4904_v38  ;;  %vm2972_vm11 = vcmp.lt.f32.partialorder %v2970_v22, 2.0 }
0x1538   :  { %v3073_v29 = vsel %vm1287_vm7, %v4265_v41, %v4269_v28  ;;  %v4266_v44 = vsel %vm2972_vm11, 1.0, %v4904_v38 }
0x1539   :  { %v3075_v32 = vsel %vm6324_vm6, %v3073_v29, %v4273_v52 }
0x153d   :  { %v3002_v23 = vpop.xlane.xlu2 %3001 }
0x153e   :  { %vm3004_vm10 = vcmp.lt.f32.partialorder %v3002_v23, 2.0 }
0x153f   :  { %v4270_v35 = vsel %vm3004_vm10, 1.0, %v4904_v38  ;;  %vm6331_vm10 = vmmov %vm6329_vm8 }
0x1540   :  { %v3063_v30 = vpop.xlane.xlu0 %3062  ;;  %v3074_v47 = vsel %vm1287_vm7, %v4266_v44, %v4270_v35 }
0x1541   :  { %vm3067_vm2 = vcmp.lt.f32.partialorder %v3063_v30, 2.0  ;;  %v3066_v51 = vpop.xlane.xlu1 %3065 }
0x1542   :  { %v4277_v31 = vsel %vm3067_vm2, 1.0, %v4904_v38  ;;  %vm3068_vm12 = vcmp.lt.f32.partialorder %v3066_v51, 2.0  ;;  %vm6332_vm2 = vcmask 1043456  }
0x1543   :  { %v6111_v36 = vsel %vm6325_vm4, %v3075_v32, %v4277_v31  ;;  %v4278_v45 = vsel %vm3068_vm12, 1.0, %v4904_v38  ;;  %vm6333_vm6 = vmmov %vm6332_vm2 }
0x1544   :  { %v3133_v40 = vrot.slane %v6111_v36, 7  ;;  %vm3079_vm14 = vcmp.gt.f32.partialorder %v6111_v36, 0.0 }
0x1545   :  { %v3034_v42 = vpop.xlane.xlu2 %3033  ;;  %v3081_v25 = vsel %vm3079_vm14, %v6031_v27, -1e+30 }
0x1546   :  { %v3138_v46 = vsel %vm6326_vm1, 0.0, %v3133_v40  ;;  %vm3036_vm5 = vcmp.lt.f32.partialorder %v3034_v42, 2.0  ;;  %v3083_v56 = vsel %vm1175_vm3, %v3081_v25, -inf }
0x1547   :  { %v3139_v14 = vadd.f32 %v3138_v46, %v6111_v36  ;;  %v4274_v49 = vsel %vm3036_vm5, 1.0, %v4904_v38  ;;  %3084 = vmax.xlane.f32.xlu2 %v3083_v56 }
0x1548   :  { %v3076_v53 = vsel %vm6327_vm13, %v3074_v47, %v4274_v49 }
0x1549   :  { %v3143_v54 = vrot.slane %v3139_v14, 6  ;;  %v3078_v27 = vsel %vm6328_vm15, %v3076_v53, %v4278_v45 }
0x154a   :  { %v3134_v33 = vrot.slane %v3078_v27, 7  ;;  %vm3080_vm9 = vcmp.gt.f32.partialorder %v3078_v27, 0.0 }
0x154b   :  { %v3148_v55 = vsel %vm6329_vm8, 0.0, %v3143_v54  ;;  %v3082_v50 = vsel %vm3080_vm9, %v6041_v48, -1e+30  ;;  %vm6334_vm8 = vcmask 261120  }
0x154c   :  { %v3149_v57 = vadd.f32 %v3148_v55, %v3139_v14  ;;  %v3135_v24 = vsel %vm6330_vm0, %v3133_v40, %v3134_v33  ;;  %v3086_v62 = vsel %vm1175_vm3, %v3082_v50, -inf  ;;  %vm6335_vm0 = vmmov %vm6334_vm8 }
0x154d   :  { %v3140_v58 = vadd.f32 %v3135_v24, %v3078_v27  ;;  %3087 = vmax.xlane.f32.xlu0 %v3086_v62  ;;  %v4748_v24 = vld [vmem:[%s6247_s15 + $0x5] ss:$0 sm:$0xff]  ;;  %v3432_v62 = vpop.f32.mrf.mxu1 }
0x154e   :  { %v3153_v7 = vrot.slane %v3149_v57, 4 }
0x154f   :  { %v3144_v63 = vrot.slane %v3140_v58, 6 }
0x1550   :  { %v3158_v18 = vsel %vm6332_vm2, 0.0, %v3153_v7  ;;  %vm6337_vm2 = vmmov %vm6335_vm0 }
0x1551   :  { %v3145_v12 = vsel %vm6331_vm10, %v3143_v54, %v3144_v63  ;;  %v3159_v9 = vadd.f32 %v3158_v18, %v3149_v57  ;;  %v4747_v57 = vld [vmem:[%s6247_s15 + $0x4] ss:$0 sm:$0xff]  ;;  %v4751_v63 = vld [vmem:[%s6247_s15 + $0x7] ss:$0 sm:$0xff]  ;;  %vm6336_vm10 = vmmov %vm6335_vm0 }
0x1552   :  { %v3150_v2 = vadd.f32 %v3145_v12, %v3140_v58  ;;  %v3296_v58 = vadd.f32 %v4747_v57, %v6038_v43 }
0x1553   :  { %vm3163_vm4 = vcmp.le.f32.partialorder %v3159_v9, 8.0 }
0x1554   :  { %v3154_v6 = vrot.slane %v3150_v2, 4  ;;  %v4279_v32 = vsel %vm3163_vm4, 1.0, %v4904_v38 }
0x1555   :  { %v3169_v44 = vmul.f32 %v4279_v32, %v6111_v36 }
0x1556   :  { %v3155_v8 = vsel %vm6333_vm6, %v3153_v7, %v3154_v6  ;;  %v3702_v7 = vpop.f32.mrf.mxu3 }
0x1557   :  { %v3160_v11 = vadd.f32 %v3155_v8, %v3150_v2 }
0x1559   :  { %v3162_v48 = vadd.f32 %v3160_v11, %v3159_v9  ;;  %v3703_v9 = vadd.f32 %v4751_v63, %v3702_v7 }
0x155b   :  { %vm3164_vm11 = vcmp.le.f32.partialorder %v3162_v48, 8.0 }
0x155c   :  { %v4280_v13 = vsel %vm3164_vm11, 1.0, %v4904_v38 }
0x155d   :  { %v3170_v60 = vmul.f32 %v4280_v13, %v3078_v27 }
0x15ba   :  { %v3085_v16 = vpop.xlane.xlu2 %3084 }
0x15bb   :  { %v3089_v0 = vsub.f32 %v3081_v25, %v3085_v16 }
0x15bd   :  { %v3091_v1 = vmul.f32 1.442695, %v3089_v0 }
0x15bf   :  { %4863 = vpow2.f32 %v3091_v1 }
0x15c0   :  { %v3088_v61 = vpop.xlane.xlu0 %3087 }
0x15c1   :  { %v3090_v59 = vsub.f32 %v3082_v50, %v3088_v61 }
0x15c3   :  { %v3093_v17 = vmul.f32 1.442695, %v3090_v59  ;;  %v3434_v59 = vpop.f32.mrf.mxu1 }
0x15c5   :  { %v4864_v19 = vpop.eup %4863  ;;  %4865 = vpow2.f32 %v3093_v17  ;;  %v3435_v17 = vadd.f32 %v4748_v24, %v3434_v59  ;;  %v31_v59 = vstv %s6253_s23 }
0x15c6   :  { %v3095_v34 = vsel %vm1175_vm3, %v4864_v19, 0.0  ;;  %32 = vst [vmem:[#allocation3] sm:$0x1] %v31_v59 }
0x15c7   :  { %3096 = vadd.xlane.f32.xlu1 %v3095_v34  ;;  %v3298_v34 = vadd.f32 %v4747_v57, %v6048_v39 }
0x15cb   :  { %v4866_v20 = vpop.eup %4865 }
0x15cc   :  { %v3098_v21 = vsel %vm1175_vm3, %v4866_v20, 0.0 }
0x15cd   :  { %3099 = vadd.xlane.f32.xlu2 %v3098_v21  ;;  %v3704_v21 = vpop.f32.mrf.mxu3 }
0x163a   :  { %v3097_v5 = vpop.xlane.xlu1 %3096 }
0x163b   :  { %4867 = vrcp.f32 %v3097_v5  ;;  %v3112_v29 = vand.u32 2147483648, %v3097_v5  ;;  %v3110_v52 = vand.u32 2147483647, %v3097_v5  ;;  %vm3106_vm12 = vweird.f32 %v3097_v5 }
0x163d   :  { %v3113_v40 = vor.u32 1.1754944e-38, %v3112_v29  ;;  %vm3111_vm1 = vcmp.eq.f32.partialorder %v3110_v52, 8.507059e+37 }
0x1640   :  { %v3100_v22 = vpop.xlane.xlu2 %3099 }
0x1641   :  { %v4868_v41 = vpop.eup %4867  ;;  %4869 = vrcp.f32 %v3100_v22  ;;  %v3127_v46 = vand.u32 2147483648, %v3100_v22  ;;  %v3125_v14 = vand.u32 2147483647, %v3100_v22  ;;  %vm3121_vm13 = vweird.f32 %v3100_v22 }
0x1642   :  { %v3102_v23 = vmul.f32 %v4868_v41, %v3097_v5  ;;  %vm3107_vm14 = vweird.f32 %v4868_v41 }
0x1643   :  { %vm3108_vm3 = vmor %vm3106_vm12, %vm3107_vm14  ;;  %v3128_v38 = vor.u32 1.1754944e-38, %v3127_v46  ;;  %vm3126_vm9 = vcmp.eq.f32.partialorder %v3125_v14, 8.507059e+37 }
0x1644   :  { %v3103_v28 = vsub.f32 1.0, %v3102_v23  ;;  %vm6338_vm14 = vmmov %vm6335_vm0 }
0x1646   :  { %v3104_v30 = vmul.f32 %v4868_v41, %v3103_v28  ;;  %v3705_v28 = vadd.f32 %v4751_v63, %v3704_v21  ;;  %v4753_v63 = vld [vmem:[%s6250_s17] ss:$0 sm:$0xff] }
0x1647   :  { %v4870_v31 = vpop.eup %4869 }
0x1648   :  { %v3105_v51 = vadd.f32 %v4868_v41, %v3104_v30  ;;  %v3117_v35 = vmul.f32 %v4870_v31, %v3100_v22  ;;  %vm3122_vm5 = vweird.f32 %v4870_v31 }
0x1649   :  { %vm3123_vm15 = vmor %vm3121_vm13, %vm3122_vm5 }
0x164a   :  { %v3109_v42 = vsel %vm3108_vm3, %v4868_v41, %v3105_v51  ;;  %v3118_v25 = vsub.f32 1.0, %v3117_v35  ;;  %vm6339_vm5 = vmmov %vm6335_vm0 }
0x164b   :  { %v3114_v56 = vsel %vm3111_vm1, %v3113_v40, %v3109_v42 }
0x164c   :  { %v3119_v47 = vmul.f32 %v4870_v31, %v3118_v25  ;;  %v3115_v49 = vmul.f32 %v4864_v19, %v3114_v56 }
0x164e   :  { %v3120_v45 = vadd.f32 %v4870_v31, %v3119_v47  ;;  %v3171_v53 = vmul.f32 %v3169_v44, %v3115_v49 }
0x1650   :  { %v3124_v54 = vsel %vm3123_vm15, %v4870_v31, %v3120_v45  ;;  %3438 = vperm.xlu2 %4719, %v3171_v53   ;;  %3302 = vperm.xlu0 %4718, %v3171_v53   ;;  %vm6340_vm15 = vcmask 1040384  }
0x1651   :  { %v3129_v27 = vsel %vm3126_vm9, %v3128_v38, %v3124_v54  ;;  %vm6341_vm9 = vmmov %vm6335_vm0 }
0x1652   :  { %v3130_v33 = vmul.f32 %v4866_v20, %v3129_v27 }
0x1654   :  { %v3172_v55 = vmul.f32 %v3170_v60, %v3130_v33 }
0x1656   :  { %3307 = vperm.xlu1 %4721, %v3172_v55  }
0x1658   :  { %4720 = vset.pattern.permute.xlu2 %v4901_v37  ;;  %4725 = vset.pattern.permute.xlu0 %v4903_v26 }
0x1659   :  { %3573 = vperm.xlu2 %4720, %v3171_v53   ;;  %3712 = vperm.xlu0 %4725, %v3172_v55  }
0x165e   :  { %4722 = vset.pattern.permute.xlu1 %v4900_v4  ;;  %v4750_v4 = vld [vmem:[%s6247_s15 + $0x6] ss:$0 sm:$0xff] }
0x165f   :  { %3442 = vperm.xlu1 %4722, %v3172_v55  }
0x1661   :  { %4724 = vset.pattern.permute.xlu2 %v4903_v26  ;;  %v3567_v26 = vpop.f32.mrf.mxu0 }
0x1662   :  { %3708 = vperm.xlu2 %4724, %v3171_v53   ;;  %v3568_v2 = vadd.f32 %v4750_v4, %v3567_v26 }
0x1667   :  { %4723 = vset.pattern.permute.xlu1 %v4901_v37  ;;  %v3433_v37 = vadd.f32 %v4748_v24, %v3432_v62  ;;  %v3804_v24 = vld [vmem:[%s6251_s22 + $0x18] sm:$0xff]  ;;  %v3803_v62 = vld [vmem:[%s6251_s22 + $0x10] sm:$0xff] }
0x1668   :  { %3577 = vperm.xlu1 %4723, %v3172_v55   ;;  %3824 = vmatpush.msrb.mxu1 %v3804_v24 }
0x1669   :  { %v3569_v19 = vpop.f32.mrf.mxu0 }
0x166a   :  { %v3570_v5 = vadd.f32 %v4750_v4, %v3569_v19  ;;  %v4752_v4 = vld [vmem:[%s6249_s16] ss:$0 sm:$0xff]  ;;  %3825 = vmatpush.msrb.mxu1 %v3803_v62 }
0x16aa   :  { %v3439_v36 = vpop.permute.xlu2 %3438 }
0x16ab   :  { %v3445_v18 = vmul.f32 %v3439_v36, %v3433_v37  ;;  %v3802_v37 = vld [vmem:[%s6251_s22 + $0x8] sm:$0xff] }
0x16ac   :  { %3826 = vmatpush.msrb.mxu1 %v3802_v37 }
0x16b3   :  { %v3574_v50 = vpop.permute.xlu2 %3573 }
0x16b4   :  { %v3580_v11 = vmul.f32 %v3574_v50, %v3568_v2 }
0x16bc   :  { %v3709_v8 = vpop.permute.xlu2 %3708 }
0x16bd   :  { %v3715_v13 = vmul.f32 %v3709_v8, %v3703_v9  ;;  %v3834_v8 = vld [vmem:[%s6252_s18 + $0x10] sm:$0xff] }
0x16c2   :  { %v3303_v12 = vpop.permute.xlu0 %3302 }
0x16c3   :  { %v3310_v6 = vmul.f32 %v3303_v12, %v3296_v58 }
0x16c5   :  { %v3447_v48 = vadd.f32 %v3445_v18, %v3310_v6  ;;  %v3835_v6 = vld [vmem:[%s6252_s18 + $0x18] sm:$0xff] }
0x16c7   :  { %v3582_v60 = vadd.f32 %v3580_v11, %v3447_v48  ;;  %v4905_v11 = vmov 8.0  }
0x16c8   :  { %v3308_v16 = vpop.permute.xlu1 %3307 }
0x16c9   :  { %v3717_v0 = vadd.f32 %v3715_v13, %v3582_v60  ;;  %v3311_v22 = vmul.f32 %v3308_v16, %v3298_v34  ;;  %v3833_v13 = vld [vmem:[%s6252_s18 + $0x8] sm:$0xff]  ;;  %v3832_v16 = vld [vmem:[%s6252_s18] sm:$0xff] }
0x16cb   :  { %v3719_v43 = vadd.f32 %v3717_v0, %v5838_v3  ;;  %v3713_v41 = vpop.permute.xlu0 %3712 }
0x16cc   :  { %v3716_v52 = vmul.f32 %v3713_v41, %v3705_v28 }
0x16cd   :  { %v3723_v1 = vsel %vm6334_vm8, %v3719_v43, 0.0  ;;  %vm6342_vm8 = vmmov %vm6335_vm0 }
0x16ce   :  { %3724 = vadd.xlane.f32.xlu1 %v3723_v1 }
0x16d1   :  { %v3443_v61 = vpop.permute.xlu1 %3442 }
0x16d2   :  { %v3446_v20 = vmul.f32 %v3443_v61, %v3435_v17 }
0x16d4   :  { %v3448_v29 = vadd.f32 %v3446_v20, %v3311_v22 }
0x16da   :  { %v3578_v23 = vpop.permute.xlu1 %3577 }
0x16db   :  { %v3581_v30 = vmul.f32 %v3578_v23, %v3570_v5 }
0x16dd   :  { %v3583_v3 = vadd.f32 %v3581_v30, %v3448_v29 }
0x16df   :  { %v3718_v31 = vadd.f32 %v3716_v52, %v3583_v3 }
0x16e1   :  { %v3720_v32 = vadd.f32 %v3718_v31, %v5843_v15 }
0x16e3   :  { %v3726_v51 = vsel %vm6335_vm0, %v3720_v32, 0.0 }
0x16e4   :  { %3727 = vadd.xlane.f32.xlu2 %v3726_v51 }
0x1741   :  { %v3725_v35 = vpop.xlane.xlu1 %3724 }
0x1742   :  { %v3729_v39 = vmul.f32 %v3725_v35, %v5040_v10 }
0x1744   :  { %v3731_v40 = vsub.f32 %v3719_v43, %v3729_v39 }
0x1746   :  { %v3733_v42 = vmul.f32 %v3731_v40, %v3731_v40 }
0x1748   :  { %v3735_v25 = vsel %vm6336_vm10, %v3733_v42, 0.0  ;;  %vm3897_vm10 = vcmask 9216  }
0x1749   :  { %3736 = vadd.xlane.f32.xlu0 %v3735_v25 }
0x1757   :  { %v3728_v44 = vpop.xlane.xlu2 %3727 }
0x1758   :  { %v3730_v46 = vmul.f32 %v3728_v44, %v5040_v10 }
0x175a   :  { %v6164_v56 = vsub.f32 %v3720_v32, %v3730_v46 }
0x175c   :  { %v3734_v47 = vmul.f32 %v6164_v56, %v6164_v56 }
0x175e   :  { %v3738_v15 = vsel %vm6337_vm2, %v3734_v47, 0.0  ;;  %v3863_v47 = vld [vmem:[%s6255_s20 + $0x10] sm:$0xff] }
0x175f   :  { %3739 = vadd.xlane.f32.xlu1 %v3738_v15  ;;  %v3862_v15 = vld [vmem:[%s6255_s20 + $0x8] sm:$0xff] }
0x17bc   :  { %v3737_v14 = vpop.xlane.xlu0 %3736 }
0x17bd   :  { %v3741_v49 = vmul.f32 %v3737_v14, %v5040_v10  ;;  %v3861_v14 = vld [vmem:[%s6255_s20] sm:$0xff] }
0x17bf   :  { %v3743_v45 = vadd.f32 1e-05, %v3741_v49  ;;  %v29_v49 = vstv %s6343_s10 }
0x17c0   :  { %30 = vst [vmem:[#allocation2] sm:$0x1] %v29_v49 }
0x17c1   :  { %4871 = vrsqrt.f32 %v3743_v45  ;;  %vm3751_vm11 = vweird.f32 %v3743_v45 }
0x17c7   :  { %v4872_v53 = vpop.eup %4871 }
0x17c8   :  { %v3746_v38 = vmul.f32 %v4872_v53, %v3743_v45  ;;  %vm3752_vm6 = vweird.f32 %v4872_v53 }
0x17c9   :  { %vm3753_vm4 = vmor %vm3751_vm11, %vm3752_vm6 }
0x17ca   :  { %v3747_v54 = vmul.f32 %v4872_v53, %v3746_v38 }
0x17cc   :  { %v3748_v27 = vmul.f32 0.5, %v3747_v54 }
0x17ce   :  { %v3749_v33 = vsub.f32 1.5, %v3748_v27 }
0x17d0   :  { %v3750_v55 = vmul.f32 %v4872_v53, %v3749_v33  ;;  %v4756_v33 = vld [vmem:[#allocation2] ss:$0 sm:$0xff] }
0x17d2   :  { %v3754_v36 = vsel %vm3753_vm4, %v4872_v53, %v3750_v55  ;;  %v3740_v50 = vpop.xlane.xlu1 %3739  ;;  %v4755_v53 = vld [vmem:[%s6344_s21] ss:$0 sm:$0xff] }
0x17d3   :  { %v3742_v57 = vmul.f32 %v3740_v50, %v5040_v10  ;;  %v3765_v26 = vmul.f32 %v3754_v36, %v3731_v40  ;;  %v3801_v10 = vld [vmem:[%s6251_s22] sm:$0xff] }
0x17d4   :  { %3827 = vmatpush.msrb.mxu1 %v3801_v10  ;;  %v4754_v50 = vld [vmem:[#allocation3] ss:$0 sm:$0xff] }
0x17d5   :  { %v3744_v58 = vadd.f32 1e-05, %v3742_v57  ;;  %v3770_v7 = vmul.f32 %v4752_v4, %v3765_v26 }
0x17d6   :  { %3852 = vmatpush.msra.mxu1 %v3835_v6 }
0x17d7   :  { %4873 = vrsqrt.f32 %v3744_v58  ;;  %v3775_v2 = vadd.f32 %v4753_v63, %v3770_v7  ;;  %vm3761_vm3 = vweird.f32 %v3744_v58 }
0x17d8   :  { %4875 = vrcp.f32 %v4905_v11  ;;  %3853 = vmatpush.msra.mxu1 %v3834_v8 }
0x17d9   :  { %v3777_v48 = vsel %vm6338_vm14, %v3775_v2, 0.0 }
0x17da   :  { %v3778_v0 = vrot.slane %v3777_v48, 4  ;;  %3854 = vmatpush.msra.mxu1 %v3833_v13 }
0x17dc   :  { %3855 = vmatpush.msra.mxu1 %v3832_v16  ;;  %v3779_v17 = vadd.f32 %v3778_v0, %v3777_v48 }
0x17dd   :  { %v4874_v12 = vpop.eup %4873 }
0x17de   :  { %v3756_v18 = vmul.f32 %v4874_v12, %v3744_v58  ;;  %vm3762_vm12 = vweird.f32 %v4874_v12  ;;  %v4876_v1 = vpop.eup %4875  ;;  %v3780_v5 = vrot.slane %v3779_v17, 2 }
0x17df   :  { %vm3763_vm1 = vmor %vm3761_vm3, %vm3762_vm12  ;;  %v3785_v20 = vmul.f32 8.0, %v4876_v1  ;;  %vm3789_vm13 = vweird.f32 %v4876_v1 }
0x17e0   :  { %v3757_v9 = vmul.f32 %v4874_v12, %v3756_v18  ;;  %v3781_v29 = vadd.f32 %v3780_v5, %v3779_v17 }
0x17e1   :  { %v3786_v41 = vsub.f32 1.0, %v3785_v20 }
0x17e2   :  { %v3758_v60 = vmul.f32 0.5, %v3757_v9  ;;  %v3782_v31 = vrot.slane %v3781_v29, 1 }
0x17e3   :  { %v3787_v30 = vmul.f32 %v4876_v1, %v3786_v41 }
0x17e4   :  { %v3759_v43 = vsub.f32 1.5, %v3758_v60  ;;  %v3783_v35 = vadd.f32 %v3782_v31, %v3781_v29 }
0x17e5   :  { %v3788_v32 = vadd.f32 %v4876_v1, %v3787_v30 }
0x17e6   :  { %v3760_v61 = vmul.f32 %v4874_v12, %v3759_v43 }
0x17e7   :  { %v3790_v40 = vsel %vm3789_vm13, %v4876_v1, %v3788_v32 }
0x17e8   :  { %v3764_v19 = vsel %vm3763_vm1, %v4874_v12, %v3760_v61  ;;  %v3791_v25 = vmul.f32 %v3790_v40, %v3783_v35 }
0x17e9   :  { %v3766_v34 = vmul.f32 %v3764_v19, %v6164_v56  ;;  %v3864_v56 = vld [vmem:[%s6255_s20 + $0x18] sm:$0xff]  ;;  %s4906_s20 = smov 1  }
0x17ea   :  { %3884 = vmatpush.msra.mxu0 %v3864_v56 }
0x17eb   :  { %v3771_v21 = vmul.f32 %v4752_v4, %v3766_v34 }
0x17ec   :  { %3885 = vmatpush.msra.mxu0 %v3863_v47 }
0x17ed   :  { %v3776_v22 = vadd.f32 %v4753_v63, %v3771_v21 }
0x17ee   :  { %3886 = vmatpush.msra.mxu0 %v3862_v15 }
0x17ef   :  { %v3792_v23 = vsel %vm6339_vm5, %v3776_v22, 0.0 }
0x17f0   :  { %v3793_v28 = vrot.slane %v3792_v23, 4  ;;  %3887 = vmatpush.msra.mxu0 %v3861_v14 }
0x17f2   :  { %v3794_v52 = vadd.f32 %v3793_v28, %v3792_v23 }
0x17f4   :  { %v3795_v3 = vrot.slane %v3794_v52, 2 }
0x17f6   :  { %v3796_v51 = vadd.f32 %v3795_v3, %v3794_v52 }
0x17f8   :  { %v3797_v39 = vrot.slane %v3796_v51, 1 }
0x17fa   :  { %v3798_v42 = vadd.f32 %v3797_v39, %v3796_v51 }
0x17fc   :  { %v3799_v44 = vmul.f32 %v3798_v42, %v3790_v40 }
0x17fe   :  { %v3800_v46 = vsel %vm6340_vm15, %v3791_v25, %v3799_v44 }
0x17ff   :  { %4533 = vmatmul.msk.f32.vlgmr.msrb.gmra.mxu1 %vm6341_vm9, %v3800_v46 }
0x1807   :  { %4534 = vmatmul.msk.f32.vlgmr.msra.gmra.mxu1 %vm6342_vm8, %v3800_v46 }
0x187c   :  { %v3829_v45 = vpop.f32.mrf.mxu1 }
0x187d   :  { %v3830_v57 = vadd.f32 %v4754_v50, %v3829_v45 }
0x1884   :  { %v3857_v38 = vpop.f32.mrf.mxu1 }
0x1885   :  { %v3858_v54 = vadd.f32 %v4755_v53, %v3857_v38 }
0x1887   :  { %v3860_v27 = vmax.f32 %v3858_v54, 0.0 }
0x1889   :  { %4535 = vmatmul.msk.f32.vlgmr.msra.gmra.mxu0 %vm6335_vm0, %v3860_v27 }
0x1906   :  { %v3889_v55 = vpop.f32.mrf.mxu0 }
0x1907   :  { %v3890_v36 = vadd.f32 %v4756_v33, %v3889_v55 }
0x1909   :  { %3893 = vrot.lane.b32.xlu2 %v3890_v36, %s4906_s20 }
0x1963   :  { %v3894_v24 = vpop.permute.xlu2 %3893 }
0x1964   :  { %v3896_v62 = vsel %vm1287_vm7, %v3830_v57, %v3894_v24 }
0x1965   :  { %3898 = vst.msk [vmem:[%s6345_s6] sm:$0x3] %vm3897_vm10, %v3896_v62 }

</bundles_post_ra>
